<compile_context>
chip_gen: v7x
topology: tpu7x:2x2x1
jax: 0.10.0
libtpu: 0.0.40
codegen_flags: <defaults>
</compile_context>

<pallas_src>
import functools

import jax
import jax.numpy as jnp
from jax import lax
from jax.experimental import pallas as pl
from jax.experimental.pallas import tpu as pltpu


def _round_up(n, m):
    return ((n + m - 1) // m) * m


def lstm_fc_kernel(xg_ref,            # (Tc, Bblk, 4*Hp) precomputed layer-0 x-gates (+bias)
                   whh0_ref,          # (Hp, 4*Hp)    layer-0 recurrent weights
                   w1_ref,            # (2*Hp, 4*Hp)  fused [W_ih_l1 ; W_hh_l1]
                   b1_ref,            # (1, 4*Hp)     layer-1 combined bias (f32)
                   wfc_ref,           # (Hp, OUTp)
                   bfc_ref,           # (1, OUTp)     f32
                   out_ref,           # (Bblk, OUTp)
                   h1, c1, h2, c2,    # VMEM scratch (Bblk, Hp) f32, persist across time chunks
                   *, hp, tc, t_total, tail_mask):
    g = pl.program_id(1)   # time-chunk index (innermost, "arbitrary" axis)

    # zero-init h0/c0 for both layers at the start of every batch block
    # (matches torch.zeros(h0), torch.zeros(c0)).
    @pl.when(g == 0)
    def _():
        h1[...] = jnp.zeros_like(h1)
        c1[...] = jnp.zeros_like(c1)
        h2[...] = jnp.zeros_like(h2)
        c2[...] = jnp.zeros_like(c2)

    wdt = whh0_ref.dtype

    def sigmoid(x):
        # Single EUP push (tanh); the mul/add land in spare VALU slots.
        return 0.5 * jnp.tanh(0.5 * x) + 0.5

    def activate(gates, c_prev):
        # PyTorch gate order i, f, g, o.  hp is a multiple of 128, so every
        # slice below is a lane-aligned (free) vreg view.
        i = sigmoid(gates[:, 0 * hp:1 * hp])
        f = sigmoid(gates[:, 1 * hp:2 * hp])
        gg = jnp.tanh(gates[:, 2 * hp:3 * hp])
        o = sigmoid(gates[:, 3 * hp:4 * hp])
        c_new = f * c_prev + i * gg
        h_new = o * jnp.tanh(c_new)
        return h_new, c_new

    def step(t, carry):
        h1v, c1v, h2v, c2v = carry
        xg_t = xg_ref[t].astype(jnp.float32)                       # (Bblk, 4Hp)
        # TODO(synk): stage whh0/w1 on the MXU across the chunk with
        # pltpu.matmul_push_rhs/matmul_acc_lhs/matmul_pop to avoid re-pushing
        # the same weights every timestep at tiny M.
        g0 = xg_t + jnp.dot(h1v.astype(wdt), whh0_ref[...],
                            preferred_element_type=jnp.float32)
        h1n, c1n = activate(g0, c1v)
        # layer 1: single fused matmul over [h1_new, h2_prev]; both halves are
        # lane-aligned (Hp multiple of 128).
        inp = jnp.concatenate([h1n, h2v], axis=1).astype(wdt)      # (Bblk, 2Hp)
        g1 = (jnp.dot(inp, w1_ref[...], preferred_element_type=jnp.float32)
              + b1_ref[...])
        h2n, c2n = activate(g1, c2v)
        if tail_mask:
            # Ragged T: padded tail timesteps keep the previous state.
            valid = (g * tc + t) < t_total
            h1n = jnp.where(valid, h1n, h1v)
            c1n = jnp.where(valid, c1n, c1v)
            h2n = jnp.where(valid, h2n, h2v)
            c2n = jnp.where(valid, c2n, c2v)
        return h1n, c1n, h2n, c2n

    carry = (h1[...], c1[...], h2[...], c2[...])
    carry = lax.fori_loop(0, tc, step, carry, unroll=True)
    h1[...] = carry[0]
    c1[...] = carry[1]
    h2[...] = carry[2]
    c2[...] = carry[3]

    # fc applied once, on the final timestep's top-layer hidden state.
    @pl.when(g == pl.num_programs(1) - 1)
    def _():
        out_ref[...] = (jnp.dot(carry[2].astype(wfc_ref.dtype), wfc_ref[...],
                                preferred_element_type=jnp.float32)
                        + bfc_ref[...])


def my_lstm_forward(x, params, hidden, *, compute_dtype=jnp.float32,
                    xg_dtype=None, vmem_budget_bytes=48 * 1024 * 1024):
    """x: (B, T, F) float32 (batch_first, like the PyTorch module).

    compute_dtype / xg_dtype: set to jnp.bfloat16 on v6e/v7x for ~3x fewer MXU
    passes and half the xg HBM traffic (f32 accumulation and f32 h/c kept).
    Defaults stay f32 so the exactness test passes.
    """
    B, T, F = x.shape
    OUT = params["w_fc"].shape[0]

    Hp = _round_up(hidden, 128)
    OUTp = _round_up(OUT, 128)
    G = 4 * Hp
    Bp = _round_up(B, 8)                     # sublane-dense state / dense vst / MXU rows
    if xg_dtype is None:
        xg_dtype = jnp.bfloat16 if compute_dtype == jnp.bfloat16 else jnp.float32

    # v7x has 2 TensorCores: shard independent batch blocks when there are
    # enough padded rows for two dense blocks; no-op on single-TC v5e/v6e.
    nb = 2 if (Bp >= 16 and Bp % 16 == 0) else 1
    Bblk = Bp // nb

    # ---- time chunking against an explicit VMEM budget (v7x: 64 MiB physical)
    cd_isize = jnp.dtype(compute_dtype).itemsize
    xg_isize = jnp.dtype(xg_dtype).itemsize
    weights_bytes = ((Hp * G + 2 * Hp * G + Hp * OUTp) * cd_isize    # single-buffered
                     + (G + OUTp) * 4)                               # f32 biases
    fixed_bytes = weights_bytes + 2 * Bblk * OUTp * 4 + 4 * Bblk * Hp * 4
    Tc = max(1, min(T, 16))
    while Tc > 1 and 2 * Tc * Bblk * G * xg_isize + fixed_bytes > vmem_budget_bytes:
        Tc -= 1
    nt = int(pl.cdiv(T, Tc))
    Tpad = nt * Tc
    tail_mask = (Tpad != T)

    def pad_gate_cols(w_t):
        # (rows, 4H) -> (rows, 4Hp): each gate block zero-padded to Hp lanes.
        rows = w_t.shape[0]
        w4 = w_t.reshape(rows, 4, hidden)
        return jnp.pad(w4, ((0, 0), (0, 0), (0, Hp - hidden))).reshape(rows, G)

    def pad_rows(w, rows_to):
        return jnp.pad(w, ((0, rows_to - w.shape[0]), (0, 0)))

    # ---- layer 0: precompute x-side gate pre-activations for ALL timesteps
    x_p = jnp.pad(x.astype(jnp.float32), ((0, Bp - B), (0, 0), (0, 0)))     # (Bp, T, F)
    wih0 = pad_gate_cols(params["w_ih_l0"].T)                               # (F, 4Hp)
    b0 = pad_gate_cols((params["b_ih_l0"] + params["b_hh_l0"])[None, :])    # (1, 4Hp)
    x_tm = jnp.transpose(x_p, (1, 0, 2))                                    # (T, Bp, F)
    xg = jnp.einsum("tbf,fg->tbg", x_tm, wih0) + b0[None]                   # (T, Bp, 4Hp)
    if tail_mask:
        xg = jnp.pad(xg, ((0, Tpad - T), (0, 0), (0, 0)))
    xg = xg.astype(xg_dtype)

    whh0 = pad_rows(pad_gate_cols(params["w_hh_l0"].T), Hp)                 # (Hp, 4Hp)

    # ---- layer 1: fuse input/recurrent weights into one stacked matrix
    wih1 = pad_rows(pad_gate_cols(params["w_ih_l1"].T), Hp)                 # (Hp, 4Hp)
    whh1 = pad_rows(pad_gate_cols(params["w_hh_l1"].T), Hp)                 # (Hp, 4Hp)
    w1 = jnp.concatenate([wih1, whh1], axis=0)                              # (2Hp, 4Hp)
    b1 = pad_gate_cols((params["b_ih_l1"] + params["b_hh_l1"])[None, :])    # (1, 4Hp)

    # ---- fc (lane-padded output, sliced back in the wrapper)
    wfc = pad_rows(params["w_fc"].T, Hp)                                    # (Hp, OUT)
    wfc = jnp.pad(wfc, ((0, 0), (0, OUTp - OUT)))                           # (Hp, OUTp)
    bfc = jnp.pad(params["b_fc"][None, :], ((0, 0), (0, OUTp - OUT)))       # (1, OUTp)

    whh0 = whh0.astype(compute_dtype)
    w1 = w1.astype(compute_dtype)
    wfc = wfc.astype(compute_dtype)

    kernel = functools.partial(lstm_fc_kernel, hp=Hp, tc=Tc, t_total=T,
                               tail_mask=tail_mask)

    def const_spec(arr):
        # Grid-invariant weights: single-buffered (half the VMEM of default
        # double-buffering), never re-fetched.
        nd = arr.ndim
        return pl.BlockSpec(arr.shape, lambda b, g, _nd=nd: (0,) * _nd,
                            pipeline_mode=pl.Buffered(1))

    vmem_need = int(2 * Tc * Bblk * G * xg_isize + fixed_bytes)
    vmem_limit = int(min(100 * 1024 * 1024, max(32 * 1024 * 1024, 2 * vmem_need)))

    out_p = pl.pallas_call(
        kernel,
        out_shape=jax.ShapeDtypeStruct((Bp, OUTp), jnp.float32),
        grid_spec=pltpu.PrefetchScalarGridSpec(
            num_scalar_prefetch=0,
            grid=(nb, nt),
            in_specs=[
                pl.BlockSpec((Tc, Bblk, G), lambda b, g: (g, b, 0)),  # xg slab
                const_spec(whh0), const_spec(w1), const_spec(b1),
                const_spec(wfc), const_spec(bfc),
            ],
            out_specs=pl.BlockSpec((Bblk, OUTp), lambda b, g: (b, 0)),
            scratch_shapes=[pltpu.VMEM((Bblk, Hp), jnp.float32)] * 4,
        ),
        compiler_params=pltpu.CompilerParams(
            # batch blocks are independent (v7x megacore); time is a recurrence
            dimension_semantics=("parallel", "arbitrary"),
            vmem_limit_bytes=vmem_limit),
    )(xg, whh0, w1, b1, wfc, bfc)

    return out_p[:B, :OUT]


def ref_forward(x, params, hidden):
    """Pure-JAX reference matching torch.nn.LSTM(batch_first) + Linear."""
    B, T, _ = x.shape

    def cell(inp, h, c, wih, whh, bih, bhh):
        gates = inp @ wih.T + bih + h @ whh.T + bhh
        i, f, g, o = jnp.split(gates, 4, axis=-1)
        i = jax.nn.sigmoid(i)
        f = jax.nn.sigmoid(f)
        g = jnp.tanh(g)
        o = jax.nn.sigmoid(o)
        c = f * c + i * g
        h = o * jnp.tanh(c)
        return h, c

    z = jnp.zeros((B, hidden), jnp.float32)
    h1, c1, h2, c2 = z, z, z, z
    for t in range(T):
        h1, c1 = cell(x[:, t], h1, c1,
                      params["w_ih_l0"], params["w_hh_l0"],
                      params["b_ih_l0"], params["b_hh_l0"])
        h2, c2 = cell(h1, h2, c2,
                      params["w_ih_l1"], params["w_hh_l1"],
                      params["b_ih_l1"], params["b_hh_l1"])
    return h2 @ params["w_fc"].T + params["b_fc"]


def init_params(key, in_features, hidden, out_features):
    """Deterministic init mimicking PyTorch's U(-1/sqrt(H), 1/sqrt(H))."""
    k = 1.0 / jnp.sqrt(jnp.float32(hidden))
    names_shapes = [
        ("w_ih_l0", (4 * hidden, in_features)),
        ("w_hh_l0", (4 * hidden, hidden)),
        ("b_ih_l0", (4 * hidden,)),
        ("b_hh_l0", (4 * hidden,)),
        ("w_ih_l1", (4 * hidden, hidden)),
        ("w_hh_l1", (4 * hidden, hidden)),
        ("b_ih_l1", (4 * hidden,)),
        ("b_hh_l1", (4 * hidden,)),
        ("w_fc",    (out_features, hidden)),
        ("b_fc",    (out_features,)),
    ]
    keys = jax.random.split(key, len(names_shapes))
    return {
        name: jax.random.uniform(kk, shape, jnp.float32, -k, k)
        for kk, (name, shape) in zip(keys, names_shapes)
    }


if __name__ == "__main__":
    # small shapes consistent with the module's forward: (B, T, in_features),
    # hidden_size=100 as in the spec, 2 LSTM layers.
    B, T, F = 2, 8, 8
    H, OUT = 100, 4

    key = jax.random.PRNGKey(0)
    pkey, xkey = jax.random.split(key)
    params = init_params(pkey, F, H, OUT)
    x = jax.random.normal(xkey, (B, T, F), jnp.float32)

    out = my_lstm_forward(x, params, H)
    out = jax.block_until_ready(out)

    ref = ref_forward(x, params, H)
    assert out.shape == (B, OUT)
    assert jnp.allclose(out, ref, rtol=1e-4, atol=1e-4), (out, ref)

    print("KERNEL_OK")
</pallas_src>

<mosaic_0001>
module attributes {stable_mosaic.version = 11 : i64} {
  func.func @lstm_fc_kernel(%arg0: i32, %arg1: i32, %arg2: memref<8x8x512xf32, #tpu.memory_space<vmem>>, %arg3: memref<128x512xf32, #tpu.memory_space<vmem>>, %arg4: memref<256x512xf32, #tpu.memory_space<vmem>>, %arg5: memref<1x512xf32, #tpu.memory_space<vmem>>, %arg6: memref<128x128xf32, #tpu.memory_space<vmem>>, %arg7: memref<1x128xf32, #tpu.memory_space<vmem>>, %arg8: memref<8x128xf32, #tpu.memory_space<vmem>>, %arg9: memref<8x128xf32, #tpu.memory_space<vmem>>, %arg10: memref<8x128xf32, #tpu.memory_space<vmem>>, %arg11: memref<8x128xf32, #tpu.memory_space<vmem>>, %arg12: memref<8x128xf32, #tpu.memory_space<vmem>>) attributes {dimension_semantics = [#tpu.dimension_semantics<parallel>, #tpu.dimension_semantics<arbitrary>], iteration_bounds = array<i64: 1, 1>, scalar_prefetch = 0 : i64, scratch_operands = 4 : i64, tpu.core_type = #tpu.core_type<tc>, window_params = [{transform_indices = @transform_0, window_bounds = array<i64: 8, 8, 512>}, {pipeline_mode = #tpu.pipeline_mode<synchronous>, transform_indices = @transform_1, window_bounds = array<i64: 128, 512>}, {pipeline_mode = #tpu.pipeline_mode<synchronous>, transform_indices = @transform_2, window_bounds = array<i64: 256, 512>}, {pipeline_mode = #tpu.pipeline_mode<synchronous>, transform_indices = @transform_3, window_bounds = array<i64: 1, 512>}, {pipeline_mode = #tpu.pipeline_mode<synchronous>, transform_indices = @transform_4, window_bounds = array<i64: 128, 128>}, {pipeline_mode = #tpu.pipeline_mode<synchronous>, transform_indices = @transform_5, window_bounds = array<i64: 1, 128>}, {transform_indices = @transform_6, window_bounds = array<i64: 8, 128>}]} {
    %c0_i32 = arith.constant 0 : i32
    %0 = arith.cmpi eq, %arg1, %c0_i32 : i32
    %1 = arith.extui %0 : i1 to i32
    %c0_i32_0 = arith.constant 0 : i32
    %2 = arith.cmpi ne, %1, %c0_i32_0 : i32
    scf.if %2 {
      %cst_242 = arith.constant 0.000000e+00 : f32
      %606 = vector.broadcast %cst_242 : f32 to vector<8x128xf32>
      %c0_243 = arith.constant 0 : index
      %c0_244 = arith.constant 0 : index
      %607 = vector.load %arg9[%c0_243, %c0_244] : memref<8x128xf32, #tpu.memory_space<vmem>>, vector<8x128xf32>
      tpu.vector_store %arg9[%c0_243, %c0_244], %606 {strides = array<i32>} : memref<8x128xf32, #tpu.memory_space<vmem>>, vector<8x128xf32>,
      %cst_245 = arith.constant 0.000000e+00 : f32
      %608 = vector.broadcast %cst_245 : f32 to vector<8x128xf32>
      %c0_246 = arith.constant 0 : index
      %c0_247 = arith.constant 0 : index
      %609 = vector.load %arg10[%c0_246, %c0_247] : memref<8x128xf32, #tpu.memory_space<vmem>>, vector<8x128xf32>
      tpu.vector_store %arg10[%c0_246, %c0_247], %608 {strides = array<i32>} : memref<8x128xf32, #tpu.memory_space<vmem>>, vector<8x128xf32>,
      %cst_248 = arith.constant 0.000000e+00 : f32
      %610 = vector.broadcast %cst_248 : f32 to vector<8x128xf32>
      %c0_249 = arith.constant 0 : index
      %c0_250 = arith.constant 0 : index
      %611 = vector.load %arg11[%c0_249, %c0_250] : memref<8x128xf32, #tpu.memory_space<vmem>>, vector<8x128xf32>
      tpu.vector_store %arg11[%c0_249, %c0_250], %610 {strides = array<i32>} : memref<8x128xf32, #tpu.memory_space<vmem>>, vector<8x128xf32>,
      %cst_251 = arith.constant 0.000000e+00 : f32
      %612 = vector.broadcast %cst_251 : f32 to vector<8x128xf32>
      %c0_252 = arith.constant 0 : index
      %c0_253 = arith.constant 0 : index
      %613 = vector.load %arg12[%c0_252, %c0_253] : memref<8x128xf32, #tpu.memory_space<vmem>>, vector<8x128xf32>
      tpu.vector_store %arg12[%c0_252, %c0_253], %612 {strides = array<i32>} : memref<8x128xf32, #tpu.memory_space<vmem>>, vector<8x128xf32>,
    } else {
    }
    %c0 = arith.constant 0 : index
    %c0_1 = arith.constant 0 : index
    %3 = vector.load %arg9[%c0, %c0_1] : memref<8x128xf32, #tpu.memory_space<vmem>>, vector<8x128xf32>
    %c0_2 = arith.constant 0 : index
    %c0_3 = arith.constant 0 : index
    %4 = vector.load %arg10[%c0_2, %c0_3] : memref<8x128xf32, #tpu.memory_space<vmem>>, vector<8x128xf32>
    %c0_4 = arith.constant 0 : index
    %c0_5 = arith.constant 0 : index
    %5 = vector.load %arg11[%c0_4, %c0_5] : memref<8x128xf32, #tpu.memory_space<vmem>>, vector<8x128xf32>
    %c0_6 = arith.constant 0 : index
    %c0_7 = arith.constant 0 : index
    %6 = vector.load %arg12[%c0_6, %c0_7] : memref<8x128xf32, #tpu.memory_space<vmem>>, vector<8x128xf32>
    %c0_i32_8 = arith.constant 0 : i32
    %7 = arith.index_cast %c0_i32_8 : i32 to index
    %c0_9 = arith.constant 0 : index
    %c0_10 = arith.constant 0 : index
    %8 = vector.load %arg2[%7, %c0_9, %c0_10] : memref<8x8x512xf32, #tpu.memory_space<vmem>>, vector<1x8x512xf32>
    %9 = vector.shape_cast %8 : vector<1x8x512xf32> to vector<8x512xf32>
    %c0_11 = arith.constant 0 : index
    %c0_12 = arith.constant 0 : index
    %10 = vector.load %arg3[%c0_11, %c0_12] : memref<128x512xf32, #tpu.memory_space<vmem>>, vector<128x512xf32>
    %cst = arith.constant dense<0.000000e+00> : vector<8x512xf32>
    %11 = tpu.matmul %3, %10, %cst {dimension_numbers = #tpu.dot_dimension_numbers<[1], [0], [0], [1], [0, 0, 1, 1], [], []>} : vector<8x128xf32>, vector<128x512xf32>, vector<8x512xf32> -> vector<8x512xf32>
    %12 = arith.addf %9, %11 : vector<8x512xf32>
    %13 = vector.extract_strided_slice %12 {offsets = [0, 0], sizes = [8, 128], strides = [1, 1]} : vector<8x512xf32> to vector<8x128xf32>
    %cst_13 = arith.constant 5.000000e-01 : f32
    %14 = vector.broadcast %cst_13 : f32 to vector<8x128xf32>
    %15 = arith.mulf %14, %13 : vector<8x128xf32>
    %16 = math.tanh %15 : vector<8x128xf32>
    %cst_14 = arith.constant 5.000000e-01 : f32
    %17 = vector.broadcast %cst_14 : f32 to vector<8x128xf32>
    %18 = arith.mulf %17, %16 : vector<8x128xf32>
    %cst_15 = arith.constant 5.000000e-01 : f32
    %19 = vector.broadcast %cst_15 : f32 to vector<8x128xf32>
    %20 = arith.addf %18, %19 : vector<8x128xf32>
    %21 = vector.extract_strided_slice %12 {offsets = [0, 128], sizes = [8, 128], strides = [1, 1]} : vector<8x512xf32> to vector<8x128xf32>
    %cst_16 = arith.constant 5.000000e-01 : f32
    %22 = vector.broadcast %cst_16 : f32 to vector<8x128xf32>
    %23 = arith.mulf %22, %21 : vector<8x128xf32>
    %24 = math.tanh %23 : vector<8x128xf32>
    %cst_17 = arith.constant 5.000000e-01 : f32
    %25 = vector.broadcast %cst_17 : f32 to vector<8x128xf32>
    %26 = arith.mulf %25, %24 : vector<8x128xf32>
    %cst_18 = arith.constant 5.000000e-01 : f32
    %27 = vector.broadcast %cst_18 : f32 to vector<8x128xf32>
    %28 = arith.addf %26, %27 : vector<8x128xf32>
    %29 = vector.extract_strided_slice %12 {offsets = [0, 256], sizes = [8, 128], strides = [1, 1]} : vector<8x512xf32> to vector<8x128xf32>
    %30 = math.tanh %29 : vector<8x128xf32>
    %31 = vector.extract_strided_slice %12 {offsets = [0, 384], sizes = [8, 128], strides = [1, 1]} : vector<8x512xf32> to vector<8x128xf32>
    %cst_19 = arith.constant 5.000000e-01 : f32
    %32 = vector.broadcast %cst_19 : f32 to vector<8x128xf32>
    %33 = arith.mulf %32, %31 : vector<8x128xf32>
    %34 = math.tanh %33 : vector<8x128xf32>
    %cst_20 = arith.constant 5.000000e-01 : f32
    %35 = vector.broadcast %cst_20 : f32 to vector<8x128xf32>
    %36 = arith.mulf %35, %34 : vector<8x128xf32>
    %cst_21 = arith.constant 5.000000e-01 : f32
    %37 = vector.broadcast %cst_21 : f32 to vector<8x128xf32>
    %38 = arith.addf %36, %37 : vector<8x128xf32>
    %39 = arith.mulf %28, %4 : vector<8x128xf32>
    %40 = arith.mulf %20, %30 : vector<8x128xf32>
    %41 = arith.addf %39, %40 : vector<8x128xf32>
    %42 = math.tanh %41 : vector<8x128xf32>
    %43 = arith.mulf %38, %42 : vector<8x128xf32>
    %44 = tpu.concatenate %43, %5 in 1 : vector<8x128xf32>, vector<8x128xf32> -> vector<8x256xf32>
    %c0_22 = arith.constant 0 : index
    %c0_23 = arith.constant 0 : index
    %45 = vector.load %arg4[%c0_22, %c0_23] : memref<256x512xf32, #tpu.memory_space<vmem>>, vector<256x512xf32>
    %cst_24 = arith.constant dense<0.000000e+00> : vector<8x512xf32>
    %46 = tpu.matmul %44, %45, %cst_24 {dimension_numbers = #tpu.dot_dimension_numbers<[1], [0], [0], [1], [0, 0, 1, 1], [], []>} : vector<8x256xf32>, vector<256x512xf32>, vector<8x512xf32> -> vector<8x512xf32>
    %c0_25 = arith.constant 0 : index
    %c0_26 = arith.constant 0 : index
    %47 = vector.load %arg5[%c0_25, %c0_26] : memref<1x512xf32, #tpu.memory_space<vmem>>, vector<1x512xf32>
    %48 = vector.broadcast %47 : vector<1x512xf32> to vector<8x512xf32>
    %49 = arith.addf %46, %48 : vector<8x512xf32>
    %50 = vector.extract_strided_slice %49 {offsets = [0, 0], sizes = [8, 128], strides = [1, 1]} : vector<8x512xf32> to vector<8x128xf32>
    %cst_27 = arith.constant 5.000000e-01 : f32
    %51 = vector.broadcast %cst_27 : f32 to vector<8x128xf32>
    %52 = arith.mulf %51, %50 : vector<8x128xf32>
    %53 = math.tanh %52 : vector<8x128xf32>
    %cst_28 = arith.constant 5.000000e-01 : f32
    %54 = vector.broadcast %cst_28 : f32 to vector<8x128xf32>
    %55 = arith.mulf %54, %53 : vector<8x128xf32>
    %cst_29 = arith.constant 5.000000e-01 : f32
    %56 = vector.broadcast %cst_29 : f32 to vector<8x128xf32>
    %57 = arith.addf %55, %56 : vector<8x128xf32>
    %58 = vector.extract_strided_slice %49 {offsets = [0, 128], sizes = [8, 128], strides = [1, 1]} : vector<8x512xf32> to vector<8x128xf32>
    %cst_30 = arith.constant 5.000000e-01 : f32
    %59 = vector.broadcast %cst_30 : f32 to vector<8x128xf32>
    %60 = arith.mulf %59, %58 : vector<8x128xf32>
    %61 = math.tanh %60 : vector<8x128xf32>
    %cst_31 = arith.constant 5.000000e-01 : f32
    %62 = vector.broadcast %cst_31 : f32 to vector<8x128xf32>
    %63 = arith.mulf %62, %61 : vector<8x128xf32>
    %cst_32 = arith.constant 5.000000e-01 : f32
    %64 = vector.broadcast %cst_32 : f32 to vector<8x128xf32>
    %65 = arith.addf %63, %64 : vector<8x128xf32>
    %66 = vector.extract_strided_slice %49 {offsets = [0, 256], sizes = [8, 128], strides = [1, 1]} : vector<8x512xf32> to vector<8x128xf32>
    %67 = math.tanh %66 : vector<8x128xf32>
    %68 = vector.extract_strided_slice %49 {offsets = [0, 384], sizes = [8, 128], strides = [1, 1]} : vector<8x512xf32> to vector<8x128xf32>
    %cst_33 = arith.constant 5.000000e-01 : f32
    %69 = vector.broadcast %cst_33 : f32 to vector<8x128xf32>
    %70 = arith.mulf %69, %68 : vector<8x128xf32>
    %71 = math.tanh %70 : vector<8x128xf32>
    %cst_34 = arith.constant 5.000000e-01 : f32
    %72 = vector.broadcast %cst_34 : f32 to vector<8x128xf32>
    %73 = arith.mulf %72, %71 : vector<8x128xf32>
    %cst_35 = arith.constant 5.000000e-01 : f32
    %74 = vector.broadcast %cst_35 : f32 to vector<8x128xf32>
    %75 = arith.addf %73, %74 : vector<8x128xf32>
    %76 = arith.mulf %65, %6 : vector<8x128xf32>
    %77 = arith.mulf %57, %67 : vector<8x128xf32>
    %78 = arith.addf %76, %77 : vector<8x128xf32>
    %79 = math.tanh %78 : vector<8x128xf32>
    %80 = arith.mulf %75, %79 : vector<8x128xf32>
    %c1_i32 = arith.constant 1 : i32
    %81 = arith.index_cast %c1_i32 : i32 to index
    %c0_36 = arith.constant 0 : index
    %c0_37 = arith.constant 0 : index
    %82 = vector.load %arg2[%81, %c0_36, %c0_37] : memref<8x8x512xf32, #tpu.memory_space<vmem>>, vector<1x8x512xf32>
    %83 = vector.shape_cast %82 : vector<1x8x512xf32> to vector<8x512xf32>
    %c0_38 = arith.constant 0 : index
    %c0_39 = arith.constant 0 : index
    %84 = vector.load %arg3[%c0_38, %c0_39] : memref<128x512xf32, #tpu.memory_space<vmem>>, vector<128x512xf32>
    %cst_40 = arith.constant dense<0.000000e+00> : vector<8x512xf32>
    %85 = tpu.matmul %43, %84, %cst_40 {dimension_numbers = #tpu.dot_dimension_numbers<[1], [0], [0], [1], [0, 0, 1, 1], [], []>} : vector<8x128xf32>, vector<128x512xf32>, vector<8x512xf32> -> vector<8x512xf32>
    %86 = arith.addf %83, %85 : vector<8x512xf32>
    %87 = vector.extract_strided_slice %86 {offsets = [0, 0], sizes = [8, 128], strides = [1, 1]} : vector<8x512xf32> to vector<8x128xf32>
    %cst_41 = arith.constant 5.000000e-01 : f32
    %88 = vector.broadcast %cst_41 : f32 to vector<8x128xf32>
    %89 = arith.mulf %88, %87 : vector<8x128xf32>
    %90 = math.tanh %89 : vector<8x128xf32>
    %cst_42 = arith.constant 5.000000e-01 : f32
    %91 = vector.broadcast %cst_42 : f32 to vector<8x128xf32>
    %92 = arith.mulf %91, %90 : vector<8x128xf32>
    %cst_43 = arith.constant 5.000000e-01 : f32
    %93 = vector.broadcast %cst_43 : f32 to vector<8x128xf32>
    %94 = arith.addf %92, %93 : vector<8x128xf32>
    %95 = vector.extract_strided_slice %86 {offsets = [0, 128], sizes = [8, 128], strides = [1, 1]} : vector<8x512xf32> to vector<8x128xf32>
    %cst_44 = arith.constant 5.000000e-01 : f32
    %96 = vector.broadcast %cst_44 : f32 to vector<8x128xf32>
    %97 = arith.mulf %96, %95 : vector<8x128xf32>
    %98 = math.tanh %97 : vector<8x128xf32>
    %cst_45 = arith.constant 5.000000e-01 : f32
    %99 = vector.broadcast %cst_45 : f32 to vector<8x128xf32>
    %100 = arith.mulf %99, %98 : vector<8x128xf32>
    %cst_46 = arith.constant 5.000000e-01 : f32
    %101 = vector.broadcast %cst_46 : f32 to vector<8x128xf32>
    %102 = arith.addf %100, %101 : vector<8x128xf32>
    %103 = vector.extract_strided_slice %86 {offsets = [0, 256], sizes = [8, 128], strides = [1, 1]} : vector<8x512xf32> to vector<8x128xf32>
    %104 = math.tanh %103 : vector<8x128xf32>
    %105 = vector.extract_strided_slice %86 {offsets = [0, 384], sizes = [8, 128], strides = [1, 1]} : vector<8x512xf32> to vector<8x128xf32>
    %cst_47 = arith.constant 5.000000e-01 : f32
    %106 = vector.broadcast %cst_47 : f32 to vector<8x128xf32>
    %107 = arith.mulf %106, %105 : vector<8x128xf32>
    %108 = math.tanh %107 : vector<8x128xf32>
    %cst_48 = arith.constant 5.000000e-01 : f32
    %109 = vector.broadcast %cst_48 : f32 to vector<8x128xf32>
    %110 = arith.mulf %109, %108 : vector<8x128xf32>
    %cst_49 = arith.constant 5.000000e-01 : f32
    %111 = vector.broadcast %cst_49 : f32 to vector<8x128xf32>
    %112 = arith.addf %110, %111 : vector<8x128xf32>
    %113 = arith.mulf %102, %41 : vector<8x128xf32>
    %114 = arith.mulf %94, %104 : vector<8x128xf32>
    %115 = arith.addf %113, %114 : vector<8x128xf32>
    %116 = math.tanh %115 : vector<8x128xf32>
    %117 = arith.mulf %112, %116 : vector<8x128xf32>
    %118 = tpu.concatenate %117, %80 in 1 : vector<8x128xf32>, vector<8x128xf32> -> vector<8x256xf32>
    %c0_50 = arith.constant 0 : index
    %c0_51 = arith.constant 0 : index
    %119 = vector.load %arg4[%c0_50, %c0_51] : memref<256x512xf32, #tpu.memory_space<vmem>>, vector<256x512xf32>
    %cst_52 = arith.constant dense<0.000000e+00> : vector<8x512xf32>
    %120 = tpu.matmul %118, %119, %cst_52 {dimension_numbers = #tpu.dot_dimension_numbers<[1], [0], [0], [1], [0, 0, 1, 1], [], []>} : vector<8x256xf32>, vector<256x512xf32>, vector<8x512xf32> -> vector<8x512xf32>
    %c0_53 = arith.constant 0 : index
    %c0_54 = arith.constant 0 : index
    %121 = vector.load %arg5[%c0_53, %c0_54] : memref<1x512xf32, #tpu.memory_space<vmem>>, vector<1x512xf32>
    %122 = vector.broadcast %121 : vector<1x512xf32> to vector<8x512xf32>
    %123 = arith.addf %120, %122 : vector<8x512xf32>
    %124 = vector.extract_strided_slice %123 {offsets = [0, 0], sizes = [8, 128], strides = [1, 1]} : vector<8x512xf32> to vector<8x128xf32>
    %cst_55 = arith.constant 5.000000e-01 : f32
    %125 = vector.broadcast %cst_55 : f32 to vector<8x128xf32>
    %126 = arith.mulf %125, %124 : vector<8x128xf32>
    %127 = math.tanh %126 : vector<8x128xf32>
    %cst_56 = arith.constant 5.000000e-01 : f32
    %128 = vector.broadcast %cst_56 : f32 to vector<8x128xf32>
    %129 = arith.mulf %128, %127 : vector<8x128xf32>
    %cst_57 = arith.constant 5.000000e-01 : f32
    %130 = vector.broadcast %cst_57 : f32 to vector<8x128xf32>
    %131 = arith.addf %129, %130 : vector<8x128xf32>
    %132 = vector.extract_strided_slice %123 {offsets = [0, 128], sizes = [8, 128], strides = [1, 1]} : vector<8x512xf32> to vector<8x128xf32>
    %cst_58 = arith.constant 5.000000e-01 : f32
    %133 = vector.broadcast %cst_58 : f32 to vector<8x128xf32>
    %134 = arith.mulf %133, %132 : vector<8x128xf32>
    %135 = math.tanh %134 : vector<8x128xf32>
    %cst_59 = arith.constant 5.000000e-01 : f32
    %136 = vector.broadcast %cst_59 : f32 to vector<8x128xf32>
    %137 = arith.mulf %136, %135 : vector<8x128xf32>
    %cst_60 = arith.constant 5.000000e-01 : f32
    %138 = vector.broadcast %cst_60 : f32 to vector<8x128xf32>
    %139 = arith.addf %137, %138 : vector<8x128xf32>
    %140 = vector.extract_strided_slice %123 {offsets = [0, 256], sizes = [8, 128], strides = [1, 1]} : vector<8x512xf32> to vector<8x128xf32>
    %141 = math.tanh %140 : vector<8x128xf32>
    %142 = vector.extract_strided_slice %123 {offsets = [0, 384], sizes = [8, 128], strides = [1, 1]} : vector<8x512xf32> to vector<8x128xf32>
    %cst_61 = arith.constant 5.000000e-01 : f32
    %143 = vector.broadcast %cst_61 : f32 to vector<8x128xf32>
    %144 = arith.mulf %143, %142 : vector<8x128xf32>
    %145 = math.tanh %144 : vector<8x128xf32>
    %cst_62 = arith.constant 5.000000e-01 : f32
    %146 = vector.broadcast %cst_62 : f32 to vector<8x128xf32>
    %147 = arith.mulf %146, %145 : vector<8x128xf32>
    %cst_63 = arith.constant 5.000000e-01 : f32
    %148 = vector.broadcast %cst_63 : f32 to vector<8x128xf32>
    %149 = arith.addf %147, %148 : vector<8x128xf32>
    %150 = arith.mulf %139, %78 : vector<8x128xf32>
    %151 = arith.mulf %131, %141 : vector<8x128xf32>
    %152 = arith.addf %150, %151 : vector<8x128xf32>
    %153 = math.tanh %152 : vector<8x128xf32>
    %154 = arith.mulf %149, %153 : vector<8x128xf32>
    %c2_i32 = arith.constant 2 : i32
    %155 = arith.index_cast %c2_i32 : i32 to index
    %c0_64 = arith.constant 0 : index
    %c0_65 = arith.constant 0 : index
    %156 = vector.load %arg2[%155, %c0_64, %c0_65] : memref<8x8x512xf32, #tpu.memory_space<vmem>>, vector<1x8x512xf32>
    %157 = vector.shape_cast %156 : vector<1x8x512xf32> to vector<8x512xf32>
    %c0_66 = arith.constant 0 : index
    %c0_67 = arith.constant 0 : index
    %158 = vector.load %arg3[%c0_66, %c0_67] : memref<128x512xf32, #tpu.memory_space<vmem>>, vector<128x512xf32>
    %cst_68 = arith.constant dense<0.000000e+00> : vector<8x512xf32>
    %159 = tpu.matmul %117, %158, %cst_68 {dimension_numbers = #tpu.dot_dimension_numbers<[1], [0], [0], [1], [0, 0, 1, 1], [], []>} : vector<8x128xf32>, vector<128x512xf32>, vector<8x512xf32> -> vector<8x512xf32>
    %160 = arith.addf %157, %159 : vector<8x512xf32>
    %161 = vector.extract_strided_slice %160 {offsets = [0, 0], sizes = [8, 128], strides = [1, 1]} : vector<8x512xf32> to vector<8x128xf32>
    %cst_69 = arith.constant 5.000000e-01 : f32
    %162 = vector.broadcast %cst_69 : f32 to vector<8x128xf32>
    %163 = arith.mulf %162, %161 : vector<8x128xf32>
    %164 = math.tanh %163 : vector<8x128xf32>
    %cst_70 = arith.constant 5.000000e-01 : f32
    %165 = vector.broadcast %cst_70 : f32 to vector<8x128xf32>
    %166 = arith.mulf %165, %164 : vector<8x128xf32>
    %cst_71 = arith.constant 5.000000e-01 : f32
    %167 = vector.broadcast %cst_71 : f32 to vector<8x128xf32>
    %168 = arith.addf %166, %167 : vector<8x128xf32>
    %169 = vector.extract_strided_slice %160 {offsets = [0, 128], sizes = [8, 128], strides = [1, 1]} : vector<8x512xf32> to vector<8x128xf32>
    %cst_72 = arith.constant 5.000000e-01 : f32
    %170 = vector.broadcast %cst_72 : f32 to vector<8x128xf32>
    %171 = arith.mulf %170, %169 : vector<8x128xf32>
    %172 = math.tanh %171 : vector<8x128xf32>
    %cst_73 = arith.constant 5.000000e-01 : f32
    %173 = vector.broadcast %cst_73 : f32 to vector<8x128xf32>
    %174 = arith.mulf %173, %172 : vector<8x128xf32>
    %cst_74 = arith.constant 5.000000e-01 : f32
    %175 = vector.broadcast %cst_74 : f32 to vector<8x128xf32>
    %176 = arith.addf %174, %175 : vector<8x128xf32>
    %177 = vector.extract_strided_slice %160 {offsets = [0, 256], sizes = [8, 128], strides = [1, 1]} : vector<8x512xf32> to vector<8x128xf32>
    %178 = math.tanh %177 : vector<8x128xf32>
    %179 = vector.extract_strided_slice %160 {offsets = [0, 384], sizes = [8, 128], strides = [1, 1]} : vector<8x512xf32> to vector<8x128xf32>
    %cst_75 = arith.constant 5.000000e-01 : f32
    %180 = vector.broadcast %cst_75 : f32 to vector<8x128xf32>
    %181 = arith.mulf %180, %179 : vector<8x128xf32>
    %182 = math.tanh %181 : vector<8x128xf32>
    %cst_76 = arith.constant 5.000000e-01 : f32
    %183 = vector.broadcast %cst_76 : f32 to vector<8x128xf32>
    %184 = arith.mulf %183, %182 : vector<8x128xf32>
    %cst_77 = arith.constant 5.000000e-01 : f32
    %185 = vector.broadcast %cst_77 : f32 to vector<8x128xf32>
    %186 = arith.addf %184, %185 : vector<8x128xf32>
    %187 = arith.mulf %176, %115 : vector<8x128xf32>
    %188 = arith.mulf %168, %178 : vector<8x128xf32>
    %189 = arith.addf %187, %188 : vector<8x128xf32>
    %190 = math.tanh %189 : vector<8x128xf32>
    %191 = arith.mulf %186, %190 : vector<8x128xf32>
    %192 = tpu.concatenate %191, %154 in 1 : vector<8x128xf32>, vector<8x128xf32> -> vector<8x256xf32>
    %c0_78 = arith.constant 0 : index
    %c0_79 = arith.constant 0 : index
    %193 = vector.load %arg4[%c0_78, %c0_79] : memref<256x512xf32, #tpu.memory_space<vmem>>, vector<256x512xf32>
    %cst_80 = arith.constant dense<0.000000e+00> : vector<8x512xf32>
    %194 = tpu.matmul %192, %193, %cst_80 {dimension_numbers = #tpu.dot_dimension_numbers<[1], [0], [0], [1], [0, 0, 1, 1], [], []>} : vector<8x256xf32>, vector<256x512xf32>, vector<8x512xf32> -> vector<8x512xf32>
    %c0_81 = arith.constant 0 : index
    %c0_82 = arith.constant 0 : index
    %195 = vector.load %arg5[%c0_81, %c0_82] : memref<1x512xf32, #tpu.memory_space<vmem>>, vector<1x512xf32>
    %196 = vector.broadcast %195 : vector<1x512xf32> to vector<8x512xf32>
    %197 = arith.addf %194, %196 : vector<8x512xf32>
    %198 = vector.extract_strided_slice %197 {offsets = [0, 0], sizes = [8, 128], strides = [1, 1]} : vector<8x512xf32> to vector<8x128xf32>
    %cst_83 = arith.constant 5.000000e-01 : f32
    %199 = vector.broadcast %cst_83 : f32 to vector<8x128xf32>
    %200 = arith.mulf %199, %198 : vector<8x128xf32>
    %201 = math.tanh %200 : vector<8x128xf32>
    %cst_84 = arith.constant 5.000000e-01 : f32
    %202 = vector.broadcast %cst_84 : f32 to vector<8x128xf32>
    %203 = arith.mulf %202, %201 : vector<8x128xf32>
    %cst_85 = arith.constant 5.000000e-01 : f32
    %204 = vector.broadcast %cst_85 : f32 to vector<8x128xf32>
    %205 = arith.addf %203, %204 : vector<8x128xf32>
    %206 = vector.extract_strided_slice %197 {offsets = [0, 128], sizes = [8, 128], strides = [1, 1]} : vector<8x512xf32> to vector<8x128xf32>
    %cst_86 = arith.constant 5.000000e-01 : f32
    %207 = vector.broadcast %cst_86 : f32 to vector<8x128xf32>
    %208 = arith.mulf %207, %206 : vector<8x128xf32>
    %209 = math.tanh %208 : vector<8x128xf32>
    %cst_87 = arith.constant 5.000000e-01 : f32
    %210 = vector.broadcast %cst_87 : f32 to vector<8x128xf32>
    %211 = arith.mulf %210, %209 : vector<8x128xf32>
    %cst_88 = arith.constant 5.000000e-01 : f32
    %212 = vector.broadcast %cst_88 : f32 to vector<8x128xf32>
    %213 = arith.addf %211, %212 : vector<8x128xf32>
    %214 = vector.extract_strided_slice %197 {offsets = [0, 256], sizes = [8, 128], strides = [1, 1]} : vector<8x512xf32> to vector<8x128xf32>
    %215 = math.tanh %214 : vector<8x128xf32>
    %216 = vector.extract_strided_slice %197 {offsets = [0, 384], sizes = [8, 128], strides = [1, 1]} : vector<8x512xf32> to vector<8x128xf32>
    %cst_89 = arith.constant 5.000000e-01 : f32
    %217 = vector.broadcast %cst_89 : f32 to vector<8x128xf32>
    %218 = arith.mulf %217, %216 : vector<8x128xf32>
    %219 = math.tanh %218 : vector<8x128xf32>
    %cst_90 = arith.constant 5.000000e-01 : f32
    %220 = vector.broadcast %cst_90 : f32 to vector<8x128xf32>
    %221 = arith.mulf %220, %219 : vector<8x128xf32>
    %cst_91 = arith.constant 5.000000e-01 : f32
    %222 = vector.broadcast %cst_91 : f32 to vector<8x128xf32>
    %223 = arith.addf %221, %222 : vector<8x128xf32>
    %224 = arith.mulf %213, %152 : vector<8x128xf32>
    %225 = arith.mulf %205, %215 : vector<8x128xf32>
    %226 = arith.addf %224, %225 : vector<8x128xf32>
    %227 = math.tanh %226 : vector<8x128xf32>
    %228 = arith.mulf %223, %227 : vector<8x128xf32>
    %c3_i32 = arith.constant 3 : i32
    %229 = arith.index_cast %c3_i32 : i32 to index
    %c0_92 = arith.constant 0 : index
    %c0_93 = arith.constant 0 : index
    %230 = vector.load %arg2[%229, %c0_92, %c0_93] : memref<8x8x512xf32, #tpu.memory_space<vmem>>, vector<1x8x512xf32>
    %231 = vector.shape_cast %230 : vector<1x8x512xf32> to vector<8x512xf32>
    %c0_94 = arith.constant 0 : index
    %c0_95 = arith.constant 0 : index
    %232 = vector.load %arg3[%c0_94, %c0_95] : memref<128x512xf32, #tpu.memory_space<vmem>>, vector<128x512xf32>
    %cst_96 = arith.constant dense<0.000000e+00> : vector<8x512xf32>
    %233 = tpu.matmul %191, %232, %cst_96 {dimension_numbers = #tpu.dot_dimension_numbers<[1], [0], [0], [1], [0, 0, 1, 1], [], []>} : vector<8x128xf32>, vector<128x512xf32>, vector<8x512xf32> -> vector<8x512xf32>
    %234 = arith.addf %231, %233 : vector<8x512xf32>
    %235 = vector.extract_strided_slice %234 {offsets = [0, 0], sizes = [8, 128], strides = [1, 1]} : vector<8x512xf32> to vector<8x128xf32>
    %cst_97 = arith.constant 5.000000e-01 : f32
    %236 = vector.broadcast %cst_97 : f32 to vector<8x128xf32>
    %237 = arith.mulf %236, %235 : vector<8x128xf32>
    %238 = math.tanh %237 : vector<8x128xf32>
    %cst_98 = arith.constant 5.000000e-01 : f32
    %239 = vector.broadcast %cst_98 : f32 to vector<8x128xf32>
    %240 = arith.mulf %239, %238 : vector<8x128xf32>
    %cst_99 = arith.constant 5.000000e-01 : f32
    %241 = vector.broadcast %cst_99 : f32 to vector<8x128xf32>
    %242 = arith.addf %240, %241 : vector<8x128xf32>
    %243 = vector.extract_strided_slice %234 {offsets = [0, 128], sizes = [8, 128], strides = [1, 1]} : vector<8x512xf32> to vector<8x128xf32>
    %cst_100 = arith.constant 5.000000e-01 : f32
    %244 = vector.broadcast %cst_100 : f32 to vector<8x128xf32>
    %245 = arith.mulf %244, %243 : vector<8x128xf32>
    %246 = math.tanh %245 : vector<8x128xf32>
    %cst_101 = arith.constant 5.000000e-01 : f32
    %247 = vector.broadcast %cst_101 : f32 to vector<8x128xf32>
    %248 = arith.mulf %247, %246 : vector<8x128xf32>
    %cst_102 = arith.constant 5.000000e-01 : f32
    %249 = vector.broadcast %cst_102 : f32 to vector<8x128xf32>
    %250 = arith.addf %248, %249 : vector<8x128xf32>
    %251 = vector.extract_strided_slice %234 {offsets = [0, 256], sizes = [8, 128], strides = [1, 1]} : vector<8x512xf32> to vector<8x128xf32>
    %252 = math.tanh %251 : vector<8x128xf32>
    %253 = vector.extract_strided_slice %234 {offsets = [0, 384], sizes = [8, 128], strides = [1, 1]} : vector<8x512xf32> to vector<8x128xf32>
    %cst_103 = arith.constant 5.000000e-01 : f32
    %254 = vector.broadcast %cst_103 : f32 to vector<8x128xf32>
    %255 = arith.mulf %254, %253 : vector<8x128xf32>
    %256 = math.tanh %255 : vector<8x128xf32>
    %cst_104 = arith.constant 5.000000e-01 : f32
    %257 = vector.broadcast %cst_104 : f32 to vector<8x128xf32>
    %258 = arith.mulf %257, %256 : vector<8x128xf32>
    %cst_105 = arith.constant 5.000000e-01 : f32
    %259 = vector.broadcast %cst_105 : f32 to vector<8x128xf32>
    %260 = arith.addf %258, %259 : vector<8x128xf32>
    %261 = arith.mulf %250, %189 : vector<8x128xf32>
    %262 = arith.mulf %242, %252 : vector<8x128xf32>
    %263 = arith.addf %261, %262 : vector<8x128xf32>
    %264 = math.tanh %263 : vector<8x128xf32>
    %265 = arith.mulf %260, %264 : vector<8x128xf32>
    %266 = tpu.concatenate %265, %228 in 1 : vector<8x128xf32>, vector<8x128xf32> -> vector<8x256xf32>
    %c0_106 = arith.constant 0 : index
    %c0_107 = arith.constant 0 : index
    %267 = vector.load %arg4[%c0_106, %c0_107] : memref<256x512xf32, #tpu.memory_space<vmem>>, vector<256x512xf32>
    %cst_108 = arith.constant dense<0.000000e+00> : vector<8x512xf32>
    %268 = tpu.matmul %266, %267, %cst_108 {dimension_numbers = #tpu.dot_dimension_numbers<[1], [0], [0], [1], [0, 0, 1, 1], [], []>} : vector<8x256xf32>, vector<256x512xf32>, vector<8x512xf32> -> vector<8x512xf32>
    %c0_109 = arith.constant 0 : index
    %c0_110 = arith.constant 0 : index
    %269 = vector.load %arg5[%c0_109, %c0_110] : memref<1x512xf32, #tpu.memory_space<vmem>>, vector<1x512xf32>
    %270 = vector.broadcast %269 : vector<1x512xf32> to vector<8x512xf32>
    %271 = arith.addf %268, %270 : vector<8x512xf32>
    %272 = vector.extract_strided_slice %271 {offsets = [0, 0], sizes = [8, 128], strides = [1, 1]} : vector<8x512xf32> to vector<8x128xf32>
    %cst_111 = arith.constant 5.000000e-01 : f32
    %273 = vector.broadcast %cst_111 : f32 to vector<8x128xf32>
    %274 = arith.mulf %273, %272 : vector<8x128xf32>
    %275 = math.tanh %274 : vector<8x128xf32>
    %cst_112 = arith.constant 5.000000e-01 : f32
    %276 = vector.broadcast %cst_112 : f32 to vector<8x128xf32>
    %277 = arith.mulf %276, %275 : vector<8x128xf32>
    %cst_113 = arith.constant 5.000000e-01 : f32
    %278 = vector.broadcast %cst_113 : f32 to vector<8x128xf32>
    %279 = arith.addf %277, %278 : vector<8x128xf32>
    %280 = vector.extract_strided_slice %271 {offsets = [0, 128], sizes = [8, 128], strides = [1, 1]} : vector<8x512xf32> to vector<8x128xf32>
    %cst_114 = arith.constant 5.000000e-01 : f32
    %281 = vector.broadcast %cst_114 : f32 to vector<8x128xf32>
    %282 = arith.mulf %281, %280 : vector<8x128xf32>
    %283 = math.tanh %282 : vector<8x128xf32>
    %cst_115 = arith.constant 5.000000e-01 : f32
    %284 = vector.broadcast %cst_115 : f32 to vector<8x128xf32>
    %285 = arith.mulf %284, %283 : vector<8x128xf32>
    %cst_116 = arith.constant 5.000000e-01 : f32
    %286 = vector.broadcast %cst_116 : f32 to vector<8x128xf32>
    %287 = arith.addf %285, %286 : vector<8x128xf32>
    %288 = vector.extract_strided_slice %271 {offsets = [0, 256], sizes = [8, 128], strides = [1, 1]} : vector<8x512xf32> to vector<8x128xf32>
    %289 = math.tanh %288 : vector<8x128xf32>
    %290 = vector.extract_strided_slice %271 {offsets = [0, 384], sizes = [8, 128], strides = [1, 1]} : vector<8x512xf32> to vector<8x128xf32>
    %cst_117 = arith.constant 5.000000e-01 : f32
    %291 = vector.broadcast %cst_117 : f32 to vector<8x128xf32>
    %292 = arith.mulf %291, %290 : vector<8x128xf32>
    %293 = math.tanh %292 : vector<8x128xf32>
    %cst_118 = arith.constant 5.000000e-01 : f32
    %294 = vector.broadcast %cst_118 : f32 to vector<8x128xf32>
    %295 = arith.mulf %294, %293 : vector<8x128xf32>
    %cst_119 = arith.constant 5.000000e-01 : f32
    %296 = vector.broadcast %cst_119 : f32 to vector<8x128xf32>
    %297 = arith.addf %295, %296 : vector<8x128xf32>
    %298 = arith.mulf %287, %226 : vector<8x128xf32>
    %299 = arith.mulf %279, %289 : vector<8x128xf32>
    %300 = arith.addf %298, %299 : vector<8x128xf32>
    %301 = math.tanh %300 : vector<8x128xf32>
    %302 = arith.mulf %297, %301 : vector<8x128xf32>
    %c4_i32 = arith.constant 4 : i32
    %303 = arith.index_cast %c4_i32 : i32 to index
    %c0_120 = arith.constant 0 : index
    %c0_121 = arith.constant 0 : index
    %304 = vector.load %arg2[%303, %c0_120, %c0_121] : memref<8x8x512xf32, #tpu.memory_space<vmem>>, vector<1x8x512xf32>
    %305 = vector.shape_cast %304 : vector<1x8x512xf32> to vector<8x512xf32>
    %c0_122 = arith.constant 0 : index
    %c0_123 = arith.constant 0 : index
    %306 = vector.load %arg3[%c0_122, %c0_123] : memref<128x512xf32, #tpu.memory_space<vmem>>, vector<128x512xf32>
    %cst_124 = arith.constant dense<0.000000e+00> : vector<8x512xf32>
    %307 = tpu.matmul %265, %306, %cst_124 {dimension_numbers = #tpu.dot_dimension_numbers<[1], [0], [0], [1], [0, 0, 1, 1], [], []>} : vector<8x128xf32>, vector<128x512xf32>, vector<8x512xf32> -> vector<8x512xf32>
    %308 = arith.addf %305, %307 : vector<8x512xf32>
    %309 = vector.extract_strided_slice %308 {offsets = [0, 0], sizes = [8, 128], strides = [1, 1]} : vector<8x512xf32> to vector<8x128xf32>
    %cst_125 = arith.constant 5.000000e-01 : f32
    %310 = vector.broadcast %cst_125 : f32 to vector<8x128xf32>
    %311 = arith.mulf %310, %309 : vector<8x128xf32>
    %312 = math.tanh %311 : vector<8x128xf32>
    %cst_126 = arith.constant 5.000000e-01 : f32
    %313 = vector.broadcast %cst_126 : f32 to vector<8x128xf32>
    %314 = arith.mulf %313, %312 : vector<8x128xf32>
    %cst_127 = arith.constant 5.000000e-01 : f32
    %315 = vector.broadcast %cst_127 : f32 to vector<8x128xf32>
    %316 = arith.addf %314, %315 : vector<8x128xf32>
    %317 = vector.extract_strided_slice %308 {offsets = [0, 128], sizes = [8, 128], strides = [1, 1]} : vector<8x512xf32> to vector<8x128xf32>
    %cst_128 = arith.constant 5.000000e-01 : f32
    %318 = vector.broadcast %cst_128 : f32 to vector<8x128xf32>
    %319 = arith.mulf %318, %317 : vector<8x128xf32>
    %320 = math.tanh %319 : vector<8x128xf32>
    %cst_129 = arith.constant 5.000000e-01 : f32
    %321 = vector.broadcast %cst_129 : f32 to vector<8x128xf32>
    %322 = arith.mulf %321, %320 : vector<8x128xf32>
    %cst_130 = arith.constant 5.000000e-01 : f32
    %323 = vector.broadcast %cst_130 : f32 to vector<8x128xf32>
    %324 = arith.addf %322, %323 : vector<8x128xf32>
    %325 = vector.extract_strided_slice %308 {offsets = [0, 256], sizes = [8, 128], strides = [1, 1]} : vector<8x512xf32> to vector<8x128xf32>
    %326 = math.tanh %325 : vector<8x128xf32>
    %327 = vector.extract_strided_slice %308 {offsets = [0, 384], sizes = [8, 128], strides = [1, 1]} : vector<8x512xf32> to vector<8x128xf32>
    %cst_131 = arith.constant 5.000000e-01 : f32
    %328 = vector.broadcast %cst_131 : f32 to vector<8x128xf32>
    %329 = arith.mulf %328, %327 : vector<8x128xf32>
    %330 = math.tanh %329 : vector<8x128xf32>
    %cst_132 = arith.constant 5.000000e-01 : f32
    %331 = vector.broadcast %cst_132 : f32 to vector<8x128xf32>
    %332 = arith.mulf %331, %330 : vector<8x128xf32>
    %cst_133 = arith.constant 5.000000e-01 : f32
    %333 = vector.broadcast %cst_133 : f32 to vector<8x128xf32>
    %334 = arith.addf %332, %333 : vector<8x128xf32>
    %335 = arith.mulf %324, %263 : vector<8x128xf32>
    %336 = arith.mulf %316, %326 : vector<8x128xf32>
    %337 = arith.addf %335, %336 : vector<8x128xf32>
    %338 = math.tanh %337 : vector<8x128xf32>
    %339 = arith.mulf %334, %338 : vector<8x128xf32>
    %340 = tpu.concatenate %339, %302 in 1 : vector<8x128xf32>, vector<8x128xf32> -> vector<8x256xf32>
    %c0_134 = arith.constant 0 : index
    %c0_135 = arith.constant 0 : index
    %341 = vector.load %arg4[%c0_134, %c0_135] : memref<256x512xf32, #tpu.memory_space<vmem>>, vector<256x512xf32>
    %cst_136 = arith.constant dense<0.000000e+00> : vector<8x512xf32>
    %342 = tpu.matmul %340, %341, %cst_136 {dimension_numbers = #tpu.dot_dimension_numbers<[1], [0], [0], [1], [0, 0, 1, 1], [], []>} : vector<8x256xf32>, vector<256x512xf32>, vector<8x512xf32> -> vector<8x512xf32>
    %c0_137 = arith.constant 0 : index
    %c0_138 = arith.constant 0 : index
    %343 = vector.load %arg5[%c0_137, %c0_138] : memref<1x512xf32, #tpu.memory_space<vmem>>, vector<1x512xf32>
    %344 = vector.broadcast %343 : vector<1x512xf32> to vector<8x512xf32>
    %345 = arith.addf %342, %344 : vector<8x512xf32>
    %346 = vector.extract_strided_slice %345 {offsets = [0, 0], sizes = [8, 128], strides = [1, 1]} : vector<8x512xf32> to vector<8x128xf32>
    %cst_139 = arith.constant 5.000000e-01 : f32
    %347 = vector.broadcast %cst_139 : f32 to vector<8x128xf32>
    %348 = arith.mulf %347, %346 : vector<8x128xf32>
    %349 = math.tanh %348 : vector<8x128xf32>
    %cst_140 = arith.constant 5.000000e-01 : f32
    %350 = vector.broadcast %cst_140 : f32 to vector<8x128xf32>
    %351 = arith.mulf %350, %349 : vector<8x128xf32>
    %cst_141 = arith.constant 5.000000e-01 : f32
    %352 = vector.broadcast %cst_141 : f32 to vector<8x128xf32>
    %353 = arith.addf %351, %352 : vector<8x128xf32>
    %354 = vector.extract_strided_slice %345 {offsets = [0, 128], sizes = [8, 128], strides = [1, 1]} : vector<8x512xf32> to vector<8x128xf32>
    %cst_142 = arith.constant 5.000000e-01 : f32
    %355 = vector.broadcast %cst_142 : f32 to vector<8x128xf32>
    %356 = arith.mulf %355, %354 : vector<8x128xf32>
    %357 = math.tanh %356 : vector<8x128xf32>
    %cst_143 = arith.constant 5.000000e-01 : f32
    %358 = vector.broadcast %cst_143 : f32 to vector<8x128xf32>
    %359 = arith.mulf %358, %357 : vector<8x128xf32>
    %cst_144 = arith.constant 5.000000e-01 : f32
    %360 = vector.broadcast %cst_144 : f32 to vector<8x128xf32>
    %361 = arith.addf %359, %360 : vector<8x128xf32>
    %362 = vector.extract_strided_slice %345 {offsets = [0, 256], sizes = [8, 128], strides = [1, 1]} : vector<8x512xf32> to vector<8x128xf32>
    %363 = math.tanh %362 : vector<8x128xf32>
    %364 = vector.extract_strided_slice %345 {offsets = [0, 384], sizes = [8, 128], strides = [1, 1]} : vector<8x512xf32> to vector<8x128xf32>
    %cst_145 = arith.constant 5.000000e-01 : f32
    %365 = vector.broadcast %cst_145 : f32 to vector<8x128xf32>
    %366 = arith.mulf %365, %364 : vector<8x128xf32>
    %367 = math.tanh %366 : vector<8x128xf32>
    %cst_146 = arith.constant 5.000000e-01 : f32
    %368 = vector.broadcast %cst_146 : f32 to vector<8x128xf32>
    %369 = arith.mulf %368, %367 : vector<8x128xf32>
    %cst_147 = arith.constant 5.000000e-01 : f32
    %370 = vector.broadcast %cst_147 : f32 to vector<8x128xf32>
    %371 = arith.addf %369, %370 : vector<8x128xf32>
    %372 = arith.mulf %361, %300 : vector<8x128xf32>
    %373 = arith.mulf %353, %363 : vector<8x128xf32>
    %374 = arith.addf %372, %373 : vector<8x128xf32>
    %375 = math.tanh %374 : vector<8x128xf32>
    %376 = arith.mulf %371, %375 : vector<8x128xf32>
    %c5_i32 = arith.constant 5 : i32
    %377 = arith.index_cast %c5_i32 : i32 to index
    %c0_148 = arith.constant 0 : index
    %c0_149 = arith.constant 0 : index
    %378 = vector.load %arg2[%377, %c0_148, %c0_149] : memref<8x8x512xf32, #tpu.memory_space<vmem>>, vector<1x8x512xf32>
    %379 = vector.shape_cast %378 : vector<1x8x512xf32> to vector<8x512xf32>
    %c0_150 = arith.constant 0 : index
    %c0_151 = arith.constant 0 : index
    %380 = vector.load %arg3[%c0_150, %c0_151] : memref<128x512xf32, #tpu.memory_space<vmem>>, vector<128x512xf32>
    %cst_152 = arith.constant dense<0.000000e+00> : vector<8x512xf32>
    %381 = tpu.matmul %339, %380, %cst_152 {dimension_numbers = #tpu.dot_dimension_numbers<[1], [0], [0], [1], [0, 0, 1, 1], [], []>} : vector<8x128xf32>, vector<128x512xf32>, vector<8x512xf32> -> vector<8x512xf32>
    %382 = arith.addf %379, %381 : vector<8x512xf32>
    %383 = vector.extract_strided_slice %382 {offsets = [0, 0], sizes = [8, 128], strides = [1, 1]} : vector<8x512xf32> to vector<8x128xf32>
    %cst_153 = arith.constant 5.000000e-01 : f32
    %384 = vector.broadcast %cst_153 : f32 to vector<8x128xf32>
    %385 = arith.mulf %384, %383 : vector<8x128xf32>
    %386 = math.tanh %385 : vector<8x128xf32>
    %cst_154 = arith.constant 5.000000e-01 : f32
    %387 = vector.broadcast %cst_154 : f32 to vector<8x128xf32>
    %388 = arith.mulf %387, %386 : vector<8x128xf32>
    %cst_155 = arith.constant 5.000000e-01 : f32
    %389 = vector.broadcast %cst_155 : f32 to vector<8x128xf32>
    %390 = arith.addf %388, %389 : vector<8x128xf32>
    %391 = vector.extract_strided_slice %382 {offsets = [0, 128], sizes = [8, 128], strides = [1, 1]} : vector<8x512xf32> to vector<8x128xf32>
    %cst_156 = arith.constant 5.000000e-01 : f32
    %392 = vector.broadcast %cst_156 : f32 to vector<8x128xf32>
    %393 = arith.mulf %392, %391 : vector<8x128xf32>
    %394 = math.tanh %393 : vector<8x128xf32>
    %cst_157 = arith.constant 5.000000e-01 : f32
    %395 = vector.broadcast %cst_157 : f32 to vector<8x128xf32>
    %396 = arith.mulf %395, %394 : vector<8x128xf32>
    %cst_158 = arith.constant 5.000000e-01 : f32
    %397 = vector.broadcast %cst_158 : f32 to vector<8x128xf32>
    %398 = arith.addf %396, %397 : vector<8x128xf32>
    %399 = vector.extract_strided_slice %382 {offsets = [0, 256], sizes = [8, 128], strides = [1, 1]} : vector<8x512xf32> to vector<8x128xf32>
    %400 = math.tanh %399 : vector<8x128xf32>
    %401 = vector.extract_strided_slice %382 {offsets = [0, 384], sizes = [8, 128], strides = [1, 1]} : vector<8x512xf32> to vector<8x128xf32>
    %cst_159 = arith.constant 5.000000e-01 : f32
    %402 = vector.broadcast %cst_159 : f32 to vector<8x128xf32>
    %403 = arith.mulf %402, %401 : vector<8x128xf32>
    %404 = math.tanh %403 : vector<8x128xf32>
    %cst_160 = arith.constant 5.000000e-01 : f32
    %405 = vector.broadcast %cst_160 : f32 to vector<8x128xf32>
    %406 = arith.mulf %405, %404 : vector<8x128xf32>
    %cst_161 = arith.constant 5.000000e-01 : f32
    %407 = vector.broadcast %cst_161 : f32 to vector<8x128xf32>
    %408 = arith.addf %406, %407 : vector<8x128xf32>
    %409 = arith.mulf %398, %337 : vector<8x128xf32>
    %410 = arith.mulf %390, %400 : vector<8x128xf32>
    %411 = arith.addf %409, %410 : vector<8x128xf32>
    %412 = math.tanh %411 : vector<8x128xf32>
    %413 = arith.mulf %408, %412 : vector<8x128xf32>
    %414 = tpu.concatenate %413, %376 in 1 : vector<8x128xf32>, vector<8x128xf32> -> vector<8x256xf32>
    %c0_162 = arith.constant 0 : index
    %c0_163 = arith.constant 0 : index
    %415 = vector.load %arg4[%c0_162, %c0_163] : memref<256x512xf32, #tpu.memory_space<vmem>>, vector<256x512xf32>
    %cst_164 = arith.constant dense<0.000000e+00> : vector<8x512xf32>
    %416 = tpu.matmul %414, %415, %cst_164 {dimension_numbers = #tpu.dot_dimension_numbers<[1], [0], [0], [1], [0, 0, 1, 1], [], []>} : vector<8x256xf32>, vector<256x512xf32>, vector<8x512xf32> -> vector<8x512xf32>
    %c0_165 = arith.constant 0 : index
    %c0_166 = arith.constant 0 : index
    %417 = vector.load %arg5[%c0_165, %c0_166] : memref<1x512xf32, #tpu.memory_space<vmem>>, vector<1x512xf32>
    %418 = vector.broadcast %417 : vector<1x512xf32> to vector<8x512xf32>
    %419 = arith.addf %416, %418 : vector<8x512xf32>
    %420 = vector.extract_strided_slice %419 {offsets = [0, 0], sizes = [8, 128], strides = [1, 1]} : vector<8x512xf32> to vector<8x128xf32>
    %cst_167 = arith.constant 5.000000e-01 : f32
    %421 = vector.broadcast %cst_167 : f32 to vector<8x128xf32>
    %422 = arith.mulf %421, %420 : vector<8x128xf32>
    %423 = math.tanh %422 : vector<8x128xf32>
    %cst_168 = arith.constant 5.000000e-01 : f32
    %424 = vector.broadcast %cst_168 : f32 to vector<8x128xf32>
    %425 = arith.mulf %424, %423 : vector<8x128xf32>
    %cst_169 = arith.constant 5.000000e-01 : f32
    %426 = vector.broadcast %cst_169 : f32 to vector<8x128xf32>
    %427 = arith.addf %425, %426 : vector<8x128xf32>
    %428 = vector.extract_strided_slice %419 {offsets = [0, 128], sizes = [8, 128], strides = [1, 1]} : vector<8x512xf32> to vector<8x128xf32>
    %cst_170 = arith.constant 5.000000e-01 : f32
    %429 = vector.broadcast %cst_170 : f32 to vector<8x128xf32>
    %430 = arith.mulf %429, %428 : vector<8x128xf32>
    %431 = math.tanh %430 : vector<8x128xf32>
    %cst_171 = arith.constant 5.000000e-01 : f32
    %432 = vector.broadcast %cst_171 : f32 to vector<8x128xf32>
    %433 = arith.mulf %432, %431 : vector<8x128xf32>
    %cst_172 = arith.constant 5.000000e-01 : f32
    %434 = vector.broadcast %cst_172 : f32 to vector<8x128xf32>
    %435 = arith.addf %433, %434 : vector<8x128xf32>
    %436 = vector.extract_strided_slice %419 {offsets = [0, 256], sizes = [8, 128], strides = [1, 1]} : vector<8x512xf32> to vector<8x128xf32>
    %437 = math.tanh %436 : vector<8x128xf32>
    %438 = vector.extract_strided_slice %419 {offsets = [0, 384], sizes = [8, 128], strides = [1, 1]} : vector<8x512xf32> to vector<8x128xf32>
    %cst_173 = arith.constant 5.000000e-01 : f32
    %439 = vector.broadcast %cst_173 : f32 to vector<8x128xf32>
    %440 = arith.mulf %439, %438 : vector<8x128xf32>
    %441 = math.tanh %440 : vector<8x128xf32>
    %cst_174 = arith.constant 5.000000e-01 : f32
    %442 = vector.broadcast %cst_174 : f32 to vector<8x128xf32>
    %443 = arith.mulf %442, %441 : vector<8x128xf32>
    %cst_175 = arith.constant 5.000000e-01 : f32
    %444 = vector.broadcast %cst_175 : f32 to vector<8x128xf32>
    %445 = arith.addf %443, %444 : vector<8x128xf32>
    %446 = arith.mulf %435, %374 : vector<8x128xf32>
    %447 = arith.mulf %427, %437 : vector<8x128xf32>
    %448 = arith.addf %446, %447 : vector<8x128xf32>
    %449 = math.tanh %448 : vector<8x128xf32>
    %450 = arith.mulf %445, %449 : vector<8x128xf32>
    %c6_i32 = arith.constant 6 : i32
    %451 = arith.index_cast %c6_i32 : i32 to index
    %c0_176 = arith.constant 0 : index
    %c0_177 = arith.constant 0 : index
    %452 = vector.load %arg2[%451, %c0_176, %c0_177] : memref<8x8x512xf32, #tpu.memory_space<vmem>>, vector<1x8x512xf32>
    %453 = vector.shape_cast %452 : vector<1x8x512xf32> to vector<8x512xf32>
    %c0_178 = arith.constant 0 : index
    %c0_179 = arith.constant 0 : index
    %454 = vector.load %arg3[%c0_178, %c0_179] : memref<128x512xf32, #tpu.memory_space<vmem>>, vector<128x512xf32>
    %cst_180 = arith.constant dense<0.000000e+00> : vector<8x512xf32>
    %455 = tpu.matmul %413, %454, %cst_180 {dimension_numbers = #tpu.dot_dimension_numbers<[1], [0], [0], [1], [0, 0, 1, 1], [], []>} : vector<8x128xf32>, vector<128x512xf32>, vector<8x512xf32> -> vector<8x512xf32>
    %456 = arith.addf %453, %455 : vector<8x512xf32>
    %457 = vector.extract_strided_slice %456 {offsets = [0, 0], sizes = [8, 128], strides = [1, 1]} : vector<8x512xf32> to vector<8x128xf32>
    %cst_181 = arith.constant 5.000000e-01 : f32
    %458 = vector.broadcast %cst_181 : f32 to vector<8x128xf32>
    %459 = arith.mulf %458, %457 : vector<8x128xf32>
    %460 = math.tanh %459 : vector<8x128xf32>
    %cst_182 = arith.constant 5.000000e-01 : f32
    %461 = vector.broadcast %cst_182 : f32 to vector<8x128xf32>
    %462 = arith.mulf %461, %460 : vector<8x128xf32>
    %cst_183 = arith.constant 5.000000e-01 : f32
    %463 = vector.broadcast %cst_183 : f32 to vector<8x128xf32>
    %464 = arith.addf %462, %463 : vector<8x128xf32>
    %465 = vector.extract_strided_slice %456 {offsets = [0, 128], sizes = [8, 128], strides = [1, 1]} : vector<8x512xf32> to vector<8x128xf32>
    %cst_184 = arith.constant 5.000000e-01 : f32
    %466 = vector.broadcast %cst_184 : f32 to vector<8x128xf32>
    %467 = arith.mulf %466, %465 : vector<8x128xf32>
    %468 = math.tanh %467 : vector<8x128xf32>
    %cst_185 = arith.constant 5.000000e-01 : f32
    %469 = vector.broadcast %cst_185 : f32 to vector<8x128xf32>
    %470 = arith.mulf %469, %468 : vector<8x128xf32>
    %cst_186 = arith.constant 5.000000e-01 : f32
    %471 = vector.broadcast %cst_186 : f32 to vector<8x128xf32>
    %472 = arith.addf %470, %471 : vector<8x128xf32>
    %473 = vector.extract_strided_slice %456 {offsets = [0, 256], sizes = [8, 128], strides = [1, 1]} : vector<8x512xf32> to vector<8x128xf32>
    %474 = math.tanh %473 : vector<8x128xf32>
    %475 = vector.extract_strided_slice %456 {offsets = [0, 384], sizes = [8, 128], strides = [1, 1]} : vector<8x512xf32> to vector<8x128xf32>
    %cst_187 = arith.constant 5.000000e-01 : f32
    %476 = vector.broadcast %cst_187 : f32 to vector<8x128xf32>
    %477 = arith.mulf %476, %475 : vector<8x128xf32>
    %478 = math.tanh %477 : vector<8x128xf32>
    %cst_188 = arith.constant 5.000000e-01 : f32
    %479 = vector.broadcast %cst_188 : f32 to vector<8x128xf32>
    %480 = arith.mulf %479, %478 : vector<8x128xf32>
    %cst_189 = arith.constant 5.000000e-01 : f32
    %481 = vector.broadcast %cst_189 : f32 to vector<8x128xf32>
    %482 = arith.addf %480, %481 : vector<8x128xf32>
    %483 = arith.mulf %472, %411 : vector<8x128xf32>
    %484 = arith.mulf %464, %474 : vector<8x128xf32>
    %485 = arith.addf %483, %484 : vector<8x128xf32>
    %486 = math.tanh %485 : vector<8x128xf32>
    %487 = arith.mulf %482, %486 : vector<8x128xf32>
    %488 = tpu.concatenate %487, %450 in 1 : vector<8x128xf32>, vector<8x128xf32> -> vector<8x256xf32>
    %c0_190 = arith.constant 0 : index
    %c0_191 = arith.constant 0 : index
    %489 = vector.load %arg4[%c0_190, %c0_191] : memref<256x512xf32, #tpu.memory_space<vmem>>, vector<256x512xf32>
    %cst_192 = arith.constant dense<0.000000e+00> : vector<8x512xf32>
    %490 = tpu.matmul %488, %489, %cst_192 {dimension_numbers = #tpu.dot_dimension_numbers<[1], [0], [0], [1], [0, 0, 1, 1], [], []>} : vector<8x256xf32>, vector<256x512xf32>, vector<8x512xf32> -> vector<8x512xf32>
    %c0_193 = arith.constant 0 : index
    %c0_194 = arith.constant 0 : index
    %491 = vector.load %arg5[%c0_193, %c0_194] : memref<1x512xf32, #tpu.memory_space<vmem>>, vector<1x512xf32>
    %492 = vector.broadcast %491 : vector<1x512xf32> to vector<8x512xf32>
    %493 = arith.addf %490, %492 : vector<8x512xf32>
    %494 = vector.extract_strided_slice %493 {offsets = [0, 0], sizes = [8, 128], strides = [1, 1]} : vector<8x512xf32> to vector<8x128xf32>
    %cst_195 = arith.constant 5.000000e-01 : f32
    %495 = vector.broadcast %cst_195 : f32 to vector<8x128xf32>
    %496 = arith.mulf %495, %494 : vector<8x128xf32>
    %497 = math.tanh %496 : vector<8x128xf32>
    %cst_196 = arith.constant 5.000000e-01 : f32
    %498 = vector.broadcast %cst_196 : f32 to vector<8x128xf32>
    %499 = arith.mulf %498, %497 : vector<8x128xf32>
    %cst_197 = arith.constant 5.000000e-01 : f32
    %500 = vector.broadcast %cst_197 : f32 to vector<8x128xf32>
    %501 = arith.addf %499, %500 : vector<8x128xf32>
    %502 = vector.extract_strided_slice %493 {offsets = [0, 128], sizes = [8, 128], strides = [1, 1]} : vector<8x512xf32> to vector<8x128xf32>
    %cst_198 = arith.constant 5.000000e-01 : f32
    %503 = vector.broadcast %cst_198 : f32 to vector<8x128xf32>
    %504 = arith.mulf %503, %502 : vector<8x128xf32>
    %505 = math.tanh %504 : vector<8x128xf32>
    %cst_199 = arith.constant 5.000000e-01 : f32
    %506 = vector.broadcast %cst_199 : f32 to vector<8x128xf32>
    %507 = arith.mulf %506, %505 : vector<8x128xf32>
    %cst_200 = arith.constant 5.000000e-01 : f32
    %508 = vector.broadcast %cst_200 : f32 to vector<8x128xf32>
    %509 = arith.addf %507, %508 : vector<8x128xf32>
    %510 = vector.extract_strided_slice %493 {offsets = [0, 256], sizes = [8, 128], strides = [1, 1]} : vector<8x512xf32> to vector<8x128xf32>
    %511 = math.tanh %510 : vector<8x128xf32>
    %512 = vector.extract_strided_slice %493 {offsets = [0, 384], sizes = [8, 128], strides = [1, 1]} : vector<8x512xf32> to vector<8x128xf32>
    %cst_201 = arith.constant 5.000000e-01 : f32
    %513 = vector.broadcast %cst_201 : f32 to vector<8x128xf32>
    %514 = arith.mulf %513, %512 : vector<8x128xf32>
    %515 = math.tanh %514 : vector<8x128xf32>
    %cst_202 = arith.constant 5.000000e-01 : f32
    %516 = vector.broadcast %cst_202 : f32 to vector<8x128xf32>
    %517 = arith.mulf %516, %515 : vector<8x128xf32>
    %cst_203 = arith.constant 5.000000e-01 : f32
    %518 = vector.broadcast %cst_203 : f32 to vector<8x128xf32>
    %519 = arith.addf %517, %518 : vector<8x128xf32>
    %520 = arith.mulf %509, %448 : vector<8x128xf32>
    %521 = arith.mulf %501, %511 : vector<8x128xf32>
    %522 = arith.addf %520, %521 : vector<8x128xf32>
    %523 = math.tanh %522 : vector<8x128xf32>
    %524 = arith.mulf %519, %523 : vector<8x128xf32>
    %c7_i32 = arith.constant 7 : i32
    %525 = arith.index_cast %c7_i32 : i32 to index
    %c0_204 = arith.constant 0 : index
    %c0_205 = arith.constant 0 : index
    %526 = vector.load %arg2[%525, %c0_204, %c0_205] : memref<8x8x512xf32, #tpu.memory_space<vmem>>, vector<1x8x512xf32>
    %527 = vector.shape_cast %526 : vector<1x8x512xf32> to vector<8x512xf32>
    %c0_206 = arith.constant 0 : index
    %c0_207 = arith.constant 0 : index
    %528 = vector.load %arg3[%c0_206, %c0_207] : memref<128x512xf32, #tpu.memory_space<vmem>>, vector<128x512xf32>
    %cst_208 = arith.constant dense<0.000000e+00> : vector<8x512xf32>
    %529 = tpu.matmul %487, %528, %cst_208 {dimension_numbers = #tpu.dot_dimension_numbers<[1], [0], [0], [1], [0, 0, 1, 1], [], []>} : vector<8x128xf32>, vector<128x512xf32>, vector<8x512xf32> -> vector<8x512xf32>
    %530 = arith.addf %527, %529 : vector<8x512xf32>
    %531 = vector.extract_strided_slice %530 {offsets = [0, 0], sizes = [8, 128], strides = [1, 1]} : vector<8x512xf32> to vector<8x128xf32>
    %cst_209 = arith.constant 5.000000e-01 : f32
    %532 = vector.broadcast %cst_209 : f32 to vector<8x128xf32>
    %533 = arith.mulf %532, %531 : vector<8x128xf32>
    %534 = math.tanh %533 : vector<8x128xf32>
    %cst_210 = arith.constant 5.000000e-01 : f32
    %535 = vector.broadcast %cst_210 : f32 to vector<8x128xf32>
    %536 = arith.mulf %535, %534 : vector<8x128xf32>
    %cst_211 = arith.constant 5.000000e-01 : f32
    %537 = vector.broadcast %cst_211 : f32 to vector<8x128xf32>
    %538 = arith.addf %536, %537 : vector<8x128xf32>
    %539 = vector.extract_strided_slice %530 {offsets = [0, 128], sizes = [8, 128], strides = [1, 1]} : vector<8x512xf32> to vector<8x128xf32>
    %cst_212 = arith.constant 5.000000e-01 : f32
    %540 = vector.broadcast %cst_212 : f32 to vector<8x128xf32>
    %541 = arith.mulf %540, %539 : vector<8x128xf32>
    %542 = math.tanh %541 : vector<8x128xf32>
    %cst_213 = arith.constant 5.000000e-01 : f32
    %543 = vector.broadcast %cst_213 : f32 to vector<8x128xf32>
    %544 = arith.mulf %543, %542 : vector<8x128xf32>
    %cst_214 = arith.constant 5.000000e-01 : f32
    %545 = vector.broadcast %cst_214 : f32 to vector<8x128xf32>
    %546 = arith.addf %544, %545 : vector<8x128xf32>
    %547 = vector.extract_strided_slice %530 {offsets = [0, 256], sizes = [8, 128], strides = [1, 1]} : vector<8x512xf32> to vector<8x128xf32>
    %548 = math.tanh %547 : vector<8x128xf32>
    %549 = vector.extract_strided_slice %530 {offsets = [0, 384], sizes = [8, 128], strides = [1, 1]} : vector<8x512xf32> to vector<8x128xf32>
    %cst_215 = arith.constant 5.000000e-01 : f32
    %550 = vector.broadcast %cst_215 : f32 to vector<8x128xf32>
    %551 = arith.mulf %550, %549 : vector<8x128xf32>
    %552 = math.tanh %551 : vector<8x128xf32>
    %cst_216 = arith.constant 5.000000e-01 : f32
    %553 = vector.broadcast %cst_216 : f32 to vector<8x128xf32>
    %554 = arith.mulf %553, %552 : vector<8x128xf32>
    %cst_217 = arith.constant 5.000000e-01 : f32
    %555 = vector.broadcast %cst_217 : f32 to vector<8x128xf32>
    %556 = arith.addf %554, %555 : vector<8x128xf32>
    %557 = arith.mulf %546, %485 : vector<8x128xf32>
    %558 = arith.mulf %538, %548 : vector<8x128xf32>
    %559 = arith.addf %557, %558 : vector<8x128xf32>
    %560 = math.tanh %559 : vector<8x128xf32>
    %561 = arith.mulf %556, %560 : vector<8x128xf32>
    %562 = tpu.concatenate %561, %524 in 1 : vector<8x128xf32>, vector<8x128xf32> -> vector<8x256xf32>
    %c0_218 = arith.constant 0 : index
    %c0_219 = arith.constant 0 : index
    %563 = vector.load %arg4[%c0_218, %c0_219] : memref<256x512xf32, #tpu.memory_space<vmem>>, vector<256x512xf32>
    %cst_220 = arith.constant dense<0.000000e+00> : vector<8x512xf32>
    %564 = tpu.matmul %562, %563, %cst_220 {dimension_numbers = #tpu.dot_dimension_numbers<[1], [0], [0], [1], [0, 0, 1, 1], [], []>} : vector<8x256xf32>, vector<256x512xf32>, vector<8x512xf32> -> vector<8x512xf32>
    %c0_221 = arith.constant 0 : index
    %c0_222 = arith.constant 0 : index
    %565 = vector.load %arg5[%c0_221, %c0_222] : memref<1x512xf32, #tpu.memory_space<vmem>>, vector<1x512xf32>
    %566 = vector.broadcast %565 : vector<1x512xf32> to vector<8x512xf32>
    %567 = arith.addf %564, %566 : vector<8x512xf32>
    %568 = vector.extract_strided_slice %567 {offsets = [0, 0], sizes = [8, 128], strides = [1, 1]} : vector<8x512xf32> to vector<8x128xf32>
    %cst_223 = arith.constant 5.000000e-01 : f32
    %569 = vector.broadcast %cst_223 : f32 to vector<8x128xf32>
    %570 = arith.mulf %569, %568 : vector<8x128xf32>
    %571 = math.tanh %570 : vector<8x128xf32>
    %cst_224 = arith.constant 5.000000e-01 : f32
    %572 = vector.broadcast %cst_224 : f32 to vector<8x128xf32>
    %573 = arith.mulf %572, %571 : vector<8x128xf32>
    %cst_225 = arith.constant 5.000000e-01 : f32
    %574 = vector.broadcast %cst_225 : f32 to vector<8x128xf32>
    %575 = arith.addf %573, %574 : vector<8x128xf32>
    %576 = vector.extract_strided_slice %567 {offsets = [0, 128], sizes = [8, 128], strides = [1, 1]} : vector<8x512xf32> to vector<8x128xf32>
    %cst_226 = arith.constant 5.000000e-01 : f32
    %577 = vector.broadcast %cst_226 : f32 to vector<8x128xf32>
    %578 = arith.mulf %577, %576 : vector<8x128xf32>
    %579 = math.tanh %578 : vector<8x128xf32>
    %cst_227 = arith.constant 5.000000e-01 : f32
    %580 = vector.broadcast %cst_227 : f32 to vector<8x128xf32>
    %581 = arith.mulf %580, %579 : vector<8x128xf32>
    %cst_228 = arith.constant 5.000000e-01 : f32
    %582 = vector.broadcast %cst_228 : f32 to vector<8x128xf32>
    %583 = arith.addf %581, %582 : vector<8x128xf32>
    %584 = vector.extract_strided_slice %567 {offsets = [0, 256], sizes = [8, 128], strides = [1, 1]} : vector<8x512xf32> to vector<8x128xf32>
    %585 = math.tanh %584 : vector<8x128xf32>
    %586 = vector.extract_strided_slice %567 {offsets = [0, 384], sizes = [8, 128], strides = [1, 1]} : vector<8x512xf32> to vector<8x128xf32>
    %cst_229 = arith.constant 5.000000e-01 : f32
    %587 = vector.broadcast %cst_229 : f32 to vector<8x128xf32>
    %588 = arith.mulf %587, %586 : vector<8x128xf32>
    %589 = math.tanh %588 : vector<8x128xf32>
    %cst_230 = arith.constant 5.000000e-01 : f32
    %590 = vector.broadcast %cst_230 : f32 to vector<8x128xf32>
    %591 = arith.mulf %590, %589 : vector<8x128xf32>
    %cst_231 = arith.constant 5.000000e-01 : f32
    %592 = vector.broadcast %cst_231 : f32 to vector<8x128xf32>
    %593 = arith.addf %591, %592 : vector<8x128xf32>
    %594 = arith.mulf %583, %522 : vector<8x128xf32>
    %595 = arith.mulf %575, %585 : vector<8x128xf32>
    %596 = arith.addf %594, %595 : vector<8x128xf32>
    %597 = math.tanh %596 : vector<8x128xf32>
    %598 = arith.mulf %593, %597 : vector<8x128xf32>
    %c8_i32 = arith.constant 8 : i32
    %c0_232 = arith.constant 0 : index
    %c0_233 = arith.constant 0 : index
    %599 = vector.load %arg9[%c0_232, %c0_233] : memref<8x128xf32, #tpu.memory_space<vmem>>, vector<8x128xf32>
    tpu.vector_store %arg9[%c0_232, %c0_233], %561 {strides = array<i32>} : memref<8x128xf32, #tpu.memory_space<vmem>>, vector<8x128xf32>,
    %c0_234 = arith.constant 0 : index
    %c0_235 = arith.constant 0 : index
    %600 = vector.load %arg10[%c0_234, %c0_235] : memref<8x128xf32, #tpu.memory_space<vmem>>, vector<8x128xf32>
    tpu.vector_store %arg10[%c0_234, %c0_235], %559 {strides = array<i32>} : memref<8x128xf32, #tpu.memory_space<vmem>>, vector<8x128xf32>,
    %c0_236 = arith.constant 0 : index
    %c0_237 = arith.constant 0 : index
    %601 = vector.load %arg11[%c0_236, %c0_237] : memref<8x128xf32, #tpu.memory_space<vmem>>, vector<8x128xf32>
    tpu.vector_store %arg11[%c0_236, %c0_237], %598 {strides = array<i32>} : memref<8x128xf32, #tpu.memory_space<vmem>>, vector<8x128xf32>,
    %c0_238 = arith.constant 0 : index
    %c0_239 = arith.constant 0 : index
    %602 = vector.load %arg12[%c0_238, %c0_239] : memref<8x128xf32, #tpu.memory_space<vmem>>, vector<8x128xf32>
    tpu.vector_store %arg12[%c0_238, %c0_239], %596 {strides = array<i32>} : memref<8x128xf32, #tpu.memory_space<vmem>>, vector<8x128xf32>,
    %c0_i32_240 = arith.constant 0 : i32
    %603 = arith.cmpi eq, %arg1, %c0_i32_240 : i32
    %604 = arith.extui %603 : i1 to i32
    %c0_i32_241 = arith.constant 0 : i32
    %605 = arith.cmpi ne, %604, %c0_i32_241 : i32
    scf.if %605 {
      %c0_242 = arith.constant 0 : index
      %c0_243 = arith.constant 0 : index
      %606 = vector.load %arg6[%c0_242, %c0_243] : memref<128x128xf32, #tpu.memory_space<vmem>>, vector<128x128xf32>
      %cst_244 = arith.constant dense<0.000000e+00> : vector<8x128xf32>
      %607 = tpu.matmul %598, %606, %cst_244 {dimension_numbers = #tpu.dot_dimension_numbers<[1], [0], [0], [1], [0, 0, 1, 1], [], []>} : vector<8x128xf32>, vector<128x128xf32>, vector<8x128xf32> -> vector<8x128xf32>
      %c0_245 = arith.constant 0 : index
      %c0_246 = arith.constant 0 : index
      %608 = vector.load %arg7[%c0_245, %c0_246] : memref<1x128xf32, #tpu.memory_space<vmem>>, vector<1x128xf32>
      %609 = vector.broadcast %608 : vector<1x128xf32> to vector<8x128xf32>
      %610 = arith.addf %607, %609 : vector<8x128xf32>
      %c0_247 = arith.constant 0 : index
      %c0_248 = arith.constant 0 : index
      %611 = vector.load %arg8[%c0_247, %c0_248] : memref<8x128xf32, #tpu.memory_space<vmem>>, vector<8x128xf32>
      tpu.vector_store %arg8[%c0_247, %c0_248], %610 {strides = array<i32>} : memref<8x128xf32, #tpu.memory_space<vmem>>, vector<8x128xf32>,
    } else {
    }
    return
  }
  func.func @transform_0(%arg0: i32, %arg1: i32) -> (i32, i32, i32) {
    %c0_i32 = arith.constant 0 : i32
    %c0_i32_0 = arith.constant 0 : i32
    return %arg1, %arg0, %c0_i32 : i32, i32, i32
  }
  func.func @transform_1(%arg0: i32, %arg1: i32) -> (i32, i32) {
    %c0_i32 = arith.constant 0 : i32
    %c0_i32_0 = arith.constant 0 : i32
    %c0_i32_1 = arith.constant 0 : i32
    return %c0_i32, %c0_i32_0 : i32, i32
  }
  func.func @transform_2(%arg0: i32, %arg1: i32) -> (i32, i32) {
    %c0_i32 = arith.constant 0 : i32
    %c0_i32_0 = arith.constant 0 : i32
    %c0_i32_1 = arith.constant 0 : i32
    return %c0_i32, %c0_i32_0 : i32, i32
  }
  func.func @transform_3(%arg0: i32, %arg1: i32) -> (i32, i32) {
    %c0_i32 = arith.constant 0 : i32
    %c0_i32_0 = arith.constant 0 : i32
    %c0_i32_1 = arith.constant 0 : i32
    return %c0_i32, %c0_i32_0 : i32, i32
  }
  func.func @transform_4(%arg0: i32, %arg1: i32) -> (i32, i32) {
    %c0_i32 = arith.constant 0 : i32
    %c0_i32_0 = arith.constant 0 : i32
    %c0_i32_1 = arith.constant 0 : i32
    return %c0_i32, %c0_i32_0 : i32, i32
  }
  func.func @transform_5(%arg0: i32, %arg1: i32) -> (i32, i32) {
    %c0_i32 = arith.constant 0 : i32
    %c0_i32_0 = arith.constant 0 : i32
    %c0_i32_1 = arith.constant 0 : i32
    return %c0_i32, %c0_i32_0 : i32, i32
  }
  func.func @transform_6(%arg0: i32, %arg1: i32) -> (i32, i32) {
    %c0_i32 = arith.constant 0 : i32
    %c0_i32_0 = arith.constant 0 : i32
    return %arg0, %c0_i32 : i32, i32
  }
}

</mosaic_0001>

<bundles_post_ra>
// kernel: tpu_custom_call.1
= control target key start
LH: loop header
LB: loop body
LE: loop exit
PB: predicated region body
PF: predicated region fallthrough
CT: control target
= control target key end

     0   :  { %11 = vsyncpa [#allocation7], 0  ;;  %s6170_s0 = inlined_call_operand.hbm [shape: f32[8,8,512], index: 0, kind: input, shape index: {}]   ;;  %s6171_s1 = inlined_call_operand.hbm [shape: f32[128,512], index: 1, kind: input, shape index: {}]   ;;  %s6172_s2 = inlined_call_operand.hbm [shape: f32[256,512], index: 2, kind: input, shape index: {}]   ;;  %s6173_s3 = inlined_call_operand.vmem [shape: f32[1,512], index: 3, kind: input, shape index: {}]   ;;  %s6174_s4 = inlined_call_operand.hbm [shape: f32[128,128], index: 4, kind: input, shape index: {}]   ;;  %s6175_s5 = inlined_call_operand.vmem [shape: f32[1,128], index: 5, kind: input, shape index: {}]   ;;  %s6176_s6 = inlined_call_operand.hbm [shape: f32[8,128], index: 6, kind: output, shape index: {}]  }
   0x1   :  { %12 = vsyncpa [#allocation10], 0 }
   0x2   :  { %13 = vsyncpa [#allocation13], 0 }
   0x3   :  { %14 = vsyncpa [#allocation8], 0  ;;  %s4957_s21 = smov [#allocation9]   ;;  %s4958_s23 = smov [#allocation6]  }
   0x4   :  { %s32_s22 = sshll.u32 %s4957_s21, 4  ;;  %s20_s24 = sshll.u32 %s4958_s23, 4  ;;  %s33_s22 = int_to_ptr.vmem [resolvable:$true] %s32_s22  ;;  %s5004_s24 = int_to_ptr.vmem [resolvable:$true] %s20_s24 }
   0x5   :  { %s4839_s27 = scalar_lea.hbm %s6171_s1, 8192 }
   0x6   :  { %p4840_p0 = scmp.ne.s32.totalorder %s6171_s1, %s4839_s27  ;;  %p4843_p1 = scmp.lt.u32.totalorder %s4839_s27, %s6171_s1 }
   0x8   :  { %p4845_p2 = pnand %p4843_p1, %p4840_p0 }
   0xa   :  { %4848 = shalt.err (!%p4845_p2)
}
   0xb   :  { %s4849_s8 = scalar_lea.vmem %s33_s22, 8192  ;;  %p4854_p4 = scmp.lt.s32.totalorder %s33_s22, %s33_s22 }
   0xc   :  { %p4850_p3 = scmp.ne.s32.totalorder %s33_s22, %s4849_s8  ;;  %p4855_p5 = scmp.lt.s32.totalorder %s4849_s8, %s4849_s8 }
   0xe   :  { %p4856_p6 = por %p4855_p5, %p4854_p4 }
  0x10   :  { %p4857_p7 = pnand %p4856_p6, %p4850_p3 }
  0x12   :  { %4860 = shalt.err (!%p4857_p7)
}
  0x13   :  { %s4959_s9 = smov 512   ;;  %s4960_s10 = smov 32  }
  0x14   :  { %38 = dma.hbm_to_vmem [thread:$0]  %s6171_s1, 8192, %s33_s22, [#allocation10], %s4959_s9, %s4959_s9, %s4960_s10  }
  0x15   :  { %s4861_s15 = scalar_lea.hbm %s6170_s0, 4096 }
  0x16   :  { %p4862_p8 = scmp.ne.s32.totalorder %s6170_s0, %s4861_s15  ;;  %p4865_p9 = scmp.lt.u32.totalorder %s4861_s15, %s6170_s0 }
  0x18   :  { %p4867_p10 = pnand %p4865_p9, %p4862_p8 }
  0x1a   :  { %4870 = shalt.err (!%p4867_p10)
}
  0x1b   :  { %s4871_s20 = scalar_lea.vmem %s5004_s24, 4096  ;;  %p4876_p12 = scmp.lt.s32.totalorder %s5004_s24, %s5004_s24 }
  0x1c   :  { %p4872_p11 = scmp.ne.s32.totalorder %s5004_s24, %s4871_s20  ;;  %p4877_p13 = scmp.lt.s32.totalorder %s4871_s20, %s4871_s20 }
  0x1e   :  { %p4878_p0 = por %p4877_p13, %p4876_p12 }
  0x20   :  { %p4879_p1 = pnand %p4878_p0, %p4872_p11 }
  0x22   :  { %4882 = shalt.err (!%p4879_p1)
}
  0x23   :  { %26 = dma.hbm_to_vmem [thread:$0]  %s6170_s0, 4096, %s5004_s24, [#allocation7], %s4959_s9, %s4959_s9, %s4960_s10  }
  0x24   :  { %s4961_s22 = smov [#allocation11]   ;;  %s4962_s25 = smov [#allocation12]  }
  0x25   :  { %s44_s23 = sshll.u32 %s4961_s22, 4  ;;  %s58_s26 = sshll.u32 %s4962_s25, 4  ;;  %s45_s23 = int_to_ptr.vmem [resolvable:$true] %s44_s23  ;;  %s5041_s26 = int_to_ptr.vmem [resolvable:$true] %s58_s26 }
  0x26   :  { %s4883_s29 = scalar_lea.hbm %s6172_s2, 16384 }
  0x27   :  { %p4884_p2 = scmp.ne.s32.totalorder %s6172_s2, %s4883_s29  ;;  %p4887_p3 = scmp.lt.u32.totalorder %s4883_s29, %s6172_s2 }
  0x29   :  { %p4889_p4 = pnand %p4887_p3, %p4884_p2 }
  0x2b   :  { %4892 = shalt.err (!%p4889_p4)
}
  0x2c   :  { %s4893_s0 = scalar_lea.vmem %s45_s23, 16384  ;;  %p4898_p6 = scmp.lt.s32.totalorder %s45_s23, %s45_s23 }
  0x2d   :  { %p4894_p5 = scmp.ne.s32.totalorder %s45_s23, %s4893_s0  ;;  %p4899_p7 = scmp.lt.s32.totalorder %s4893_s0, %s4893_s0 }
  0x2f   :  { %p4900_p8 = por %p4899_p7, %p4898_p6 }
  0x31   :  { %p4901_p9 = pnand %p4900_p8, %p4894_p5 }
  0x33   :  { %4904 = shalt.err (!%p4901_p9)
}
  0x34   :  { %50 = dma.hbm_to_vmem [thread:$0]  %s6172_s2, 16384, %s45_s23, [#allocation10], %s4959_s9, %s4959_s9, %s4960_s10  }
  0x35   :  { %s4905_s15 = scalar_lea.hbm %s6174_s4, 2048 }
  0x36   :  { %p4906_p10 = scmp.ne.s32.totalorder %s6174_s4, %s4905_s15  ;;  %p4909_p11 = scmp.lt.u32.totalorder %s4905_s15, %s6174_s4 }
  0x38   :  { %p4911_p12 = pnand %p4909_p11, %p4906_p10 }
  0x3a   :  { %4914 = shalt.err (!%p4911_p12)
}
  0x3b   :  { %s4915_s20 = scalar_lea.vmem %s5041_s26, 2048  ;;  %p4920_p0 = scmp.lt.s32.totalorder %s5041_s26, %s5041_s26 }
  0x3c   :  { %p4916_p13 = scmp.ne.s32.totalorder %s5041_s26, %s4915_s20  ;;  %p4921_p1 = scmp.lt.s32.totalorder %s4915_s20, %s4915_s20 }
  0x3e   :  { %p4922_p2 = por %p4921_p1, %p4920_p0 }
  0x40   :  { %p4923_p3 = pnand %p4922_p2, %p4916_p13 }
  0x42   :  { %4926 = shalt.err (!%p4923_p3)
}
  0x43   :  { %s4963_s2 = smov 128   ;;  %s4964_s9 = smov 8  }
  0x44   :  { %64 = dma.hbm_to_vmem [thread:$0]  %s6174_s4, 2048, %s5041_s26, [#allocation13], %s4963_s2, %s4963_s2, %s4964_s9  }
  0x45   :  { %4949 = dma.done.wait [#allocation7], 4096  }
  0x46   :  { %4950 = vsyncadd [#allocation7], 4294963200 }
  0x47   :  { %4951 = dma.done.wait [#allocation10], 24576  }
  0x48   :  { %4952 = vsyncadd [#allocation10], 4294942720 }
  0x49   :  { %4953 = dma.done.wait [#allocation13], 2048  }
  0x4a   :  { %4954 = vsyncadd [#allocation13], 4294965248  ;;  %v6177_v0 = vmov 0.0   ;;  %v96_v1 = vld [vmem:[#allocation9 + $0x8] sm:$0xff]  ;;  %v95_v3 = vld [vmem:[#allocation9] sm:$0xff]  ;;  %vm4967_vm0 = vmmov 0  }
  0x4b   :  { %223 = vmatprep.mubr.f32.mxu0 %v6177_v0  ;;  %294 = vmatprep.mubr.f32.mxu1 %v6177_v0  ;;  %v100_v2 = vld [vmem:[#allocation9 + $0x28] sm:$0xff]  ;;  %v99_v5 = vld [vmem:[#allocation9 + $0x20] sm:$0xff]  ;;  %v98_v12 = vld [vmem:[#allocation9 + $0x18] sm:$0xff]  ;;  %s4968_s23 = smov [#allocation14]  }
  0x4c   :  { %v5077_v4 = vpack.c.bf16 %v100_v2, %v96_v1  ;;  %v104_v6 = vld [vmem:[#allocation9 + $0x48] sm:$0xff]  ;;  %v5079_v8 = vpack.c.bf16 %v99_v5, %v95_v3  ;;  %v103_v10 = vld [vmem:[#allocation9 + $0x40] sm:$0xff]  ;;  %v102_v13 = vld [vmem:[#allocation9 + $0x38] sm:$0xff]  ;;  %s3043_s25 = sshll.u32 %s4968_s23, 4  ;;  %s3044_s25 = int_to_ptr.vmem [resolvable:$true] %s3043_s25 }
  0x4d   :  { %v108_v7 = vld [vmem:[#allocation9 + $0x68] sm:$0xff]  ;;  %v107_v11 = vld [vmem:[#allocation9 + $0x60] sm:$0xff]  ;;  %v97_v14 = vld [vmem:[#allocation9 + $0x10] sm:$0xff]  ;;  %v5087_v17 = vpack.c.bf16 %v102_v13, %v98_v12  ;;  %s4927_s26 = scalar_lea.vmem %s3044_s25, 128  ;;  %p4932_p5 = scmp.lt.s32.totalorder %s3044_s25, %s3044_s25 }
  0x4e   :  { %6303 = vst [vmem:[#allocation19_spill] sm:$0xff] %v5077_v4  ;;  %v5081_v9 = vpack.c.bf16 %v108_v7, %v104_v6  ;;  %3108 = vmatprep.subr.bf16.mxu0 %v5077_v4  ;;  %v101_v15 = vld [vmem:[#allocation9 + $0x30] sm:$0xff]  ;;  %v5085_v16 = vpack.c.bf16 %v107_v11, %v103_v10  ;;  %v112_v19 = vld [vmem:[#allocation9 + $0x88] sm:$0xff]  ;;  %v111_v21 = vld [vmem:[#allocation9 + $0x80] sm:$0xff]  ;;  %p4928_p4 = scmp.ne.s32.totalorder %s3044_s25, %s4927_s26  ;;  %p4933_p6 = scmp.lt.s32.totalorder %s4927_s26, %s4927_s26 }
  0x4f   :  { %3110 = vmatpush1.bf16.msra.mxu0 %v5079_v8  ;;  %6304 = vst [vmem:[#allocation20_spill] sm:$0xff] %v5087_v17  ;;  %v5089_v18 = vpack.c.bf16 %v101_v15, %v97_v14  ;;  %v116_v20 = vld [vmem:[#allocation9 + $0xa8] sm:$0xff]  ;;  %v115_v23 = vld [vmem:[#allocation9 + $0xa0] sm:$0xff]  ;;  %v106_v24 = vld [vmem:[#allocation9 + $0x58] sm:$0xff]  ;;  %3140 = vmatprep.subr.bf16.mxu1 %v5087_v17 }
  0x50   :  { %3112 = vmatprep.subr.bf16.mxu0 %v5081_v9  ;;  %v5092_v22 = vpack.c.bf16 %v116_v20, %v112_v19  ;;  %v110_v25 = vld [vmem:[#allocation9 + $0x78] sm:$0xff]  ;;  %v105_v27 = vld [vmem:[#allocation9 + $0x50] sm:$0xff]  ;;  %v120_v29 = vld [vmem:[#allocation9 + $0xc8] sm:$0xff]  ;;  %v5101_v32 = vpack.c.bf16 %v115_v23, %v111_v21  ;;  %p4934_p7 = por %p4933_p6, %p4932_p5 }
  0x51   :  { %v5095_v26 = vpack.c.bf16 %v110_v25, %v106_v24  ;;  %v109_v28 = vld [vmem:[#allocation9 + $0x70] sm:$0xff]  ;;  %3142 = vmatpush1.bf16.msra.mxu1 %v5089_v18  ;;  %v124_v31 = vld [vmem:[#allocation9 + $0xe8] sm:$0xff]  ;;  %v114_v33 = vld [vmem:[#allocation9 + $0x98] sm:$0xff] }
  0x52   :  { %v5098_v30 = vpack.c.bf16 %v109_v28, %v105_v27  ;;  %v118_v34 = vld [vmem:[#allocation9 + $0xb8] sm:$0xff]  ;;  %v113_v35 = vld [vmem:[#allocation9 + $0x90] sm:$0xff]  ;;  %v5105_v36 = vpack.c.bf16 %v124_v31, %v120_v29  ;;  %v119_v37 = vld [vmem:[#allocation9 + $0xc0] sm:$0xff]  ;;  %p4935_p8 = pnand %p4934_p7, %p4928_p4 }
  0x53   :  { %3114 = vmatpush1.bf16.msra.mxu0 %v5085_v16  ;;  %3144 = vmatprep.subr.bf16.mxu1 %v5095_v26  ;;  %v123_v38 = vld [vmem:[#allocation9 + $0xe0] sm:$0xff]  ;;  %v5107_v39 = vpack.c.bf16 %v118_v34, %v114_v33  ;;  %v117_v40 = vld [vmem:[#allocation9 + $0xb0] sm:$0xff]  ;;  %v128_v41 = vld [vmem:[#allocation9 + $0x108] sm:$0xff] }
  0x54   :  { %3116 = vmatprep.subr.bf16.mxu0 %v5092_v22  ;;  %v132_v42 = vld [vmem:[#allocation9 + $0x128] sm:$0xff]  ;;  %v122_v43 = vld [vmem:[#allocation9 + $0xd8] sm:$0xff]  ;;  %v5110_v44 = vpack.c.bf16 %v117_v40, %v113_v35  ;;  %v5113_v46 = vpack.c.bf16 %v123_v38, %v119_v37  ;;  %v127_v47 = vld [vmem:[#allocation9 + $0x100] sm:$0xff] }
  0x55   :  { %3146 = vmatpush1.bf16.msra.mxu1 %v5098_v30  ;;  %v126_v45 = vld [vmem:[#allocation9 + $0xf8] sm:$0xff]  ;;  %v121_v49 = vld [vmem:[#allocation9 + $0xd0] sm:$0xff]  ;;  %v5119_v51 = vpack.c.bf16 %v132_v42, %v128_v41  ;;  %v131_v52 = vld [vmem:[#allocation9 + $0x120] sm:$0xff] }
  0x56   :  { %3148 = vmatprep.subr.bf16.mxu1 %v5107_v39  ;;  %v5116_v48 = vpack.c.bf16 %v126_v45, %v122_v43  ;;  %v125_v50 = vld [vmem:[#allocation9 + $0xf0] sm:$0xff]  ;;  %v130_v53 = vld [vmem:[#allocation9 + $0x118] sm:$0xff]  ;;  %v136_v55 = vld [vmem:[#allocation9 + $0x148] sm:$0xff]  ;;  %v5125_v58 = vpack.c.bf16 %v131_v52, %v127_v47 }
  0x57   :  { %3118 = vmatpush1.bf16.msra.mxu0 %v5101_v32  ;;  %v134_v54 = vld [vmem:[#allocation9 + $0x138] sm:$0xff]  ;;  %v140_v56 = vld [vmem:[#allocation9 + $0x168] sm:$0xff]  ;;  %v5122_v57 = vpack.c.bf16 %v125_v50, %v121_v49  ;;  %v135_v59 = vld [vmem:[#allocation9 + $0x140] sm:$0xff] }
  0x58   :  { %3120 = vmatprep.subr.bf16.mxu0 %v5105_v36  ;;  %v5128_v60 = vpack.c.bf16 %v134_v54, %v130_v53  ;;  %v129_v61 = vld [vmem:[#allocation9 + $0x110] sm:$0xff]  ;;  %v5131_v63 = vpack.c.bf16 %v140_v56, %v136_v55  ;;  %v139_v1 = vld [vmem:[#allocation9 + $0x160] sm:$0xff]  ;;  %v138_v2 = vld [vmem:[#allocation9 + $0x158] sm:$0xff] }
  0x59   :  { %3150 = vmatpush1.bf16.msra.mxu1 %v5110_v44  ;;  %v133_v62 = vld [vmem:[#allocation9 + $0x130] sm:$0xff]  ;;  %v142_v3 = vld [vmem:[#allocation9 + $0x178] sm:$0xff]  ;;  %v144_v5 = vld [vmem:[#allocation9 + $0x188] sm:$0xff]  ;;  %v5137_v10 = vpack.c.bf16 %v139_v1, %v135_v59 }
  0x5a   :  { %3152 = vmatprep.subr.bf16.mxu1 %v5116_v48  ;;  %v148_v6 = vld [vmem:[#allocation9 + $0x1a8] sm:$0xff]  ;;  %v5134_v7 = vpack.c.bf16 %v133_v62, %v129_v61  ;;  %v143_v11 = vld [vmem:[#allocation9 + $0x180] sm:$0xff]  ;;  %v5140_v12 = vpack.c.bf16 %v142_v3, %v138_v2  ;;  %v137_v13 = vld [vmem:[#allocation9 + $0x150] sm:$0xff] }
  0x5b   :  { %3122 = vmatpush1.bf16.msra.mxu0 %v5113_v46  ;;  %v141_v14 = vld [vmem:[#allocation9 + $0x170] sm:$0xff]  ;;  %v5143_v15 = vpack.c.bf16 %v148_v6, %v144_v5  ;;  %v147_v19 = vld [vmem:[#allocation9 + $0x1a0] sm:$0xff]  ;;  %v146_v20 = vld [vmem:[#allocation9 + $0x198] sm:$0xff] }
  0x5c   :  { %3124 = vmatprep.subr.bf16.mxu0 %v5119_v51  ;;  %v150_v21 = vld [vmem:[#allocation9 + $0x1b8] sm:$0xff]  ;;  %v152_v23 = vld [vmem:[#allocation9 + $0x1c8] sm:$0xff]  ;;  %v5146_v25 = vpack.c.bf16 %v141_v14, %v137_v13  ;;  %v5149_v27 = vpack.c.bf16 %v147_v19, %v143_v11  ;;  %v151_v28 = vld [vmem:[#allocation9 + $0x1c0] sm:$0xff] }
  0x5d   :  { %3154 = vmatpush1.bf16.msra.mxu1 %v5122_v57  ;;  %v156_v24 = vld [vmem:[#allocation9 + $0x1e8] sm:$0xff]  ;;  %v5152_v29 = vpack.c.bf16 %v150_v21, %v146_v20  ;;  %v145_v31 = vld [vmem:[#allocation9 + $0x190] sm:$0xff]  ;;  %v155_v35 = vld [vmem:[#allocation9 + $0x1e0] sm:$0xff] }
  0x5e   :  { %3156 = vmatprep.subr.bf16.mxu1 %v5128_v60  ;;  %v149_v33 = vld [vmem:[#allocation9 + $0x1b0] sm:$0xff]  ;;  %v5155_v34 = vpack.c.bf16 %v156_v24, %v152_v23  ;;  %v154_v37 = vld [vmem:[#allocation9 + $0x1d8] sm:$0xff]  ;;  %v324_v40 = vld [vmem:[#allocation11 + $0x8] sm:$0xff]  ;;  %v5161_v43 = vpack.c.bf16 %v155_v35, %v151_v28 }
  0x5f   :  { %3126 = vmatpush1.bf16.msra.mxu0 %v5125_v58  ;;  %v158_v38 = vld [vmem:[#allocation9 + $0x1f8] sm:$0xff]  ;;  %v328_v41 = vld [vmem:[#allocation11 + $0x28] sm:$0xff]  ;;  %v5158_v42 = vpack.c.bf16 %v149_v33, %v145_v31  ;;  %v153_v47 = vld [vmem:[#allocation9 + $0x1d0] sm:$0xff] }
  0x60   :  { %3128 = vmatprep.subr.bf16.mxu0 %v5131_v63  ;;  %v5164_v45 = vpack.c.bf16 %v158_v38, %v154_v37  ;;  %v157_v49 = vld [vmem:[#allocation9 + $0x1f0] sm:$0xff]  ;;  %v326_v50 = vld [vmem:[#allocation11 + $0x18] sm:$0xff]  ;;  %v5167_v52 = vpack.c.bf16 %v328_v41, %v324_v40  ;;  %v323_v54 = vld [vmem:[#allocation11] sm:$0xff] }
  0x61   :  { %3158 = vmatpush1.bf16.msra.mxu1 %v5134_v7  ;;  %v330_v53 = vld [vmem:[#allocation11 + $0x38] sm:$0xff]  ;;  %v327_v55 = vld [vmem:[#allocation11 + $0x20] sm:$0xff]  ;;  %v332_v56 = vld [vmem:[#allocation11 + $0x48] sm:$0xff]  ;;  %v5170_v61 = vpack.c.bf16 %v157_v49, %v153_v47 }
  0x62   :  { %3160 = vmatprep.subr.bf16.mxu1 %v5140_v12  ;;  %v336_v59 = vld [vmem:[#allocation11 + $0x68] sm:$0xff]  ;;  %v5174_v62 = vpack.c.bf16 %v330_v53, %v326_v50  ;;  %v5176_v1 = vpack.c.bf16 %v327_v55, %v323_v54  ;;  %v325_v2 = vld [vmem:[#allocation11 + $0x10] sm:$0xff]  ;;  %v334_v5 = vld [vmem:[#allocation11 + $0x58] sm:$0xff] }
  0x63   :  { %3130 = vmatpush1.bf16.msra.mxu0 %v5137_v10  ;;  %v329_v3 = vld [vmem:[#allocation11 + $0x30] sm:$0xff]  ;;  %v5179_v6 = vpack.c.bf16 %v336_v59, %v332_v56  ;;  %v338_v11 = vld [vmem:[#allocation11 + $0x78] sm:$0xff]  ;;  %v331_v13 = vld [vmem:[#allocation11 + $0x40] sm:$0xff] }
  0x64   :  { %3132 = vmatprep.subr.bf16.mxu0 %v5143_v15  ;;  %v335_v14 = vld [vmem:[#allocation11 + $0x60] sm:$0xff]  ;;  %v340_v19 = vld [vmem:[#allocation11 + $0x88] sm:$0xff]  ;;  %v5183_v21 = vpack.c.bf16 %v329_v3, %v325_v2  ;;  %v5187_v23 = vpack.c.bf16 %v338_v11, %v334_v5  ;;  %v333_v28 = vld [vmem:[#allocation11 + $0x50] sm:$0xff] }
  0x65   :  { %3162 = vmatpush1.bf16.msra.mxu1 %v5146_v25  ;;  %v344_v20 = vld [vmem:[#allocation11 + $0xa8] sm:$0xff]  ;;  %v5189_v24 = vpack.c.bf16 %v335_v14, %v331_v13  ;;  %v337_v31 = vld [vmem:[#allocation11 + $0x70] sm:$0xff]  ;;  %v342_v33 = vld [vmem:[#allocation11 + $0x98] sm:$0xff] }
  0x66   :  { %3164 = vmatprep.subr.bf16.mxu1 %v5152_v29  ;;  %v5192_v35 = vpack.c.bf16 %v344_v20, %v340_v19  ;;  %v346_v37 = vld [vmem:[#allocation11 + $0xb8] sm:$0xff]  ;;  %v339_v38 = vld [vmem:[#allocation11 + $0x80] sm:$0xff]  ;;  %v348_v41 = vld [vmem:[#allocation11 + $0xc8] sm:$0xff]  ;;  %v5197_v49 = vpack.c.bf16 %v337_v31, %v333_v28 }
  0x67   :  { %3134 = vmatpush1.bf16.msra.mxu0 %v5149_v27  ;;  %v343_v40 = vld [vmem:[#allocation11 + $0xa0] sm:$0xff]  ;;  %v352_v47 = vld [vmem:[#allocation11 + $0xe8] sm:$0xff]  ;;  %v5202_v50 = vpack.c.bf16 %v346_v37, %v342_v33  ;;  %v341_v54 = vld [vmem:[#allocation11 + $0x90] sm:$0xff] }
  0x68   :  { %3136 = vmatprep.subr.bf16.mxu0 %v5155_v34  ;;  %v5204_v53 = vpack.c.bf16 %v343_v40, %v339_v38  ;;  %v345_v55 = vld [vmem:[#allocation11 + $0xb0] sm:$0xff]  ;;  %v350_v56 = vld [vmem:[#allocation11 + $0xd8] sm:$0xff]  ;;  %v5207_v59 = vpack.c.bf16 %v352_v47, %v348_v41  ;;  %v347_v3 = vld [vmem:[#allocation11 + $0xc0] sm:$0xff] }
  0x69   :  { %3166 = vmatpush1.bf16.msra.mxu1 %v5158_v42  ;;  %v354_v2 = vld [vmem:[#allocation11 + $0xf8] sm:$0xff]  ;;  %v351_v5 = vld [vmem:[#allocation11 + $0xe0] sm:$0xff]  ;;  %v356_v11 = vld [vmem:[#allocation11 + $0x108] sm:$0xff]  ;;  %v5210_v14 = vpack.c.bf16 %v345_v55, %v341_v54 }
  0x6a   :  { %3168 = vmatprep.subr.bf16.mxu1 %v5164_v45  ;;  %6305 = vst [vmem:[#allocation21_spill] sm:$0xff] %v5207_v59  ;;  %v360_v13 = vld [vmem:[#allocation11 + $0x128] sm:$0xff]  ;;  %v5214_v19 = vpack.c.bf16 %v354_v2, %v350_v56  ;;  %v5216_v20 = vpack.c.bf16 %v351_v5, %v347_v3  ;;  %v349_v28 = vld [vmem:[#allocation11 + $0xd0] sm:$0xff]  ;;  %v358_v33 = vld [vmem:[#allocation11 + $0x118] sm:$0xff] }
  0x6b   :  { %3138 = vmatpush1.bf16.msra.mxu0 %v5161_v43  ;;  %6306 = vst [vmem:[#allocation22_spill] sm:$0xff] %v5210_v14  ;;  %v353_v31 = vld [vmem:[#allocation11 + $0xf0] sm:$0xff]  ;;  %v5219_v37 = vpack.c.bf16 %v360_v13, %v356_v11  ;;  %v362_v38 = vld [vmem:[#allocation11 + $0x138] sm:$0xff]  ;;  %v355_v40 = vld [vmem:[#allocation11 + $0x100] sm:$0xff] }
  0x6c   :  { %3172 = vmatprep.subr.bf16.mxu0 %v5167_v52  ;;  %6307 = vst [vmem:[#allocation23_spill] sm:$0xff] %v5214_v19  ;;  %6308 = vst [vmem:[#allocation24_spill] sm:$0xff] %v5216_v20  ;;  %v359_v41 = vld [vmem:[#allocation11 + $0x120] sm:$0xff]  ;;  %v364_v47 = vld [vmem:[#allocation11 + $0x148] sm:$0xff]  ;;  %v5222_v55 = vpack.c.bf16 %v353_v31, %v349_v28  ;;  %v5226_v56 = vpack.c.bf16 %v362_v38, %v358_v33 }
  0x6d   :  { %3170 = vmatpush1.bf16.msra.mxu1 %v5170_v61  ;;  %6309 = vst [vmem:[#allocation25_spill] sm:$0xff] %v5219_v37  ;;  %v368_v54 = vld [vmem:[#allocation11 + $0x168] sm:$0xff]  ;;  %v5228_v2 = vpack.c.bf16 %v359_v41, %v355_v40  ;;  %v357_v3 = vld [vmem:[#allocation11 + $0x110] sm:$0xff]  ;;  %v366_v11 = vld [vmem:[#allocation11 + $0x158] sm:$0xff] }
  0x6e   :  { %224 = vmatmul.mubr.f32.vlgmr.msra.gmra.mrb[0].mxu0 %v6177_v0  ;;  %3236 = vmatprep.subr.bf16.mxu1 %v5174_v62  ;;  %6310 = vst [vmem:[#allocation26_spill] sm:$0xff] %v5222_v55  ;;  %6311 = vst [vmem:[#allocation27_spill] sm:$0xff] %v5226_v56  ;;  %v361_v5 = vld [vmem:[#allocation11 + $0x130] sm:$0xff]  ;;  %v5231_v13 = vpack.c.bf16 %v368_v54, %v364_v47  ;;  %v372_v28 = vld [vmem:[#allocation11 + $0x188] sm:$0xff] }
  0x6f   :  { %3174 = vmatpush1.bf16.msra.mxu0 %v5176_v1  ;;  %537 = vmatprep.mubr.f32.mxu0 %v6177_v0  ;;  %6312 = vst [vmem:[#allocation28_spill] sm:$0xff] %v5228_v2  ;;  %v376_v31 = vld [vmem:[#allocation11 + $0x1a8] sm:$0xff]  ;;  %v365_v40 = vld [vmem:[#allocation11 + $0x150] sm:$0xff]  ;;  %v374_v47 = vld [vmem:[#allocation11 + $0x198] sm:$0xff] }
  0x70   :  { %3176 = vmatprep.subr.bf16.mxu0 %v5179_v6  ;;  %295 = vmatmul.mubr.f32.vlgmr.msra.gmra.mrb[0].mxu1 %v6177_v0  ;;  %6313 = vst [vmem:[#allocation29_spill] sm:$0xff] %v5231_v13  ;;  %v369_v41 = vld [vmem:[#allocation11 + $0x170] sm:$0xff]  ;;  %v5243_v54 = vpack.c.bf16 %v376_v31, %v372_v28  ;;  %v380_v28 = vld [vmem:[#allocation11 + $0x1c8] sm:$0xff] }
  0x71   :  { %3238 = vmatpush1.bf16.msra.mxu1 %v5183_v21  ;;  %608 = vmatprep.mubr.f32.mxu1 %v6177_v0  ;;  %v370_v0 = vld [vmem:[#allocation11 + $0x178] sm:$0xff]  ;;  %v384_v31 = vld [vmem:[#allocation11 + $0x1e8] sm:$0xff] }
  0x72   :  { %3240 = vmatprep.subr.bf16.mxu1 %v5187_v23  ;;  %v5238_v33 = vpack.c.bf16 %v370_v0, %v366_v11  ;;  %6317 = vst [vmem:[#allocation33_spill] sm:$0xff] %v5243_v54 }
  0x73   :  { %3178 = vmatpush1.bf16.msra.mxu0 %v5189_v24 }
  0x74   :  { %3180 = vmatprep.subr.bf16.mxu0 %v5192_v35  ;;  %6315 = vst [vmem:[#allocation31_spill] sm:$0xff] %v5238_v33 }
  0x75   :  { %3242 = vmatpush1.bf16.msra.mxu1 %v5197_v49 }
  0x76   :  { %3244 = vmatprep.subr.bf16.mxu1 %v5202_v50 }
  0x77   :  { %3182 = vmatpush1.bf16.msra.mxu0 %v5204_v53 }
  0x78   :  { %3184 = vmatprep.subr.bf16.mxu0 %v5207_v59  ;;  %v363_v59 = vld [vmem:[#allocation11 + $0x140] sm:$0xff] }
  0x79   :  { %3246 = vmatpush1.bf16.msra.mxu1 %v5210_v14  ;;  %v367_v14 = vld [vmem:[#allocation11 + $0x160] sm:$0xff] }
  0x7a   :  { %3248 = vmatprep.subr.bf16.mxu1 %v5214_v19  ;;  %v5234_v19 = vpack.c.bf16 %v361_v5, %v357_v3  ;;  %v5240_v38 = vpack.c.bf16 %v367_v14, %v363_v59  ;;  %v5246_v3 = vpack.c.bf16 %v369_v41, %v365_v40  ;;  %v373_v14 = vld [vmem:[#allocation11 + $0x190] sm:$0xff]  ;;  %v5261_v40 = vpack.c.bf16 %v384_v31, %v380_v28  ;;  %v383_v41 = vld [vmem:[#allocation11 + $0x1e0] sm:$0xff]  ;;  %v392_v28 = vld [vmem:[#allocation11 + $0x228] sm:$0xff] }
  0x7b   :  { %3186 = vmatpush1.bf16.msra.mxu0 %v5216_v20  ;;  %v371_v20 = vld [vmem:[#allocation11 + $0x180] sm:$0xff]  ;;  %v377_v5 = vld [vmem:[#allocation11 + $0x1b0] sm:$0xff]  ;;  %v390_v31 = vld [vmem:[#allocation11 + $0x218] sm:$0xff] }
  0x7c   :  { %3188 = vmatprep.subr.bf16.mxu0 %v5219_v37  ;;  %6314 = vst [vmem:[#allocation30_spill] sm:$0xff] %v5234_v19  ;;  %6316 = vst [vmem:[#allocation32_spill] sm:$0xff] %v5240_v38  ;;  %v378_v37 = vld [vmem:[#allocation11 + $0x1b8] sm:$0xff]  ;;  %v5256_v11 = vpack.c.bf16 %v377_v5, %v373_v14  ;;  %v381_v14 = vld [vmem:[#allocation11 + $0x1d0] sm:$0xff] }
  0x7d   :  { %3250 = vmatpush1.bf16.msra.mxu1 %v5222_v55  ;;  %v375_v55 = vld [vmem:[#allocation11 + $0x1a0] sm:$0xff]  ;;  %6318 = vst [vmem:[#allocation34_spill] sm:$0xff] %v5246_v3  ;;  %v5250_v0 = vpack.c.bf16 %v378_v37, %v374_v47  ;;  %v382_v37 = vld [vmem:[#allocation11 + $0x1d8] sm:$0xff]  ;;  %6322 = vst [vmem:[#allocation38_spill] sm:$0xff] %v5261_v40 }
  0x7e   :  { %3252 = vmatprep.subr.bf16.mxu1 %v5226_v56  ;;  %v5252_v59 = vpack.c.bf16 %v375_v55, %v371_v20  ;;  %6321 = vst [vmem:[#allocation37_spill] sm:$0xff] %v5256_v11  ;;  %v386_v20 = vld [vmem:[#allocation11 + $0x1f8] sm:$0xff]  ;;  %v379_v55 = vld [vmem:[#allocation11 + $0x1c0] sm:$0xff]  ;;  %v385_v5 = vld [vmem:[#allocation11 + $0x1f0] sm:$0xff] }
  0x7f   :  { %3190 = vmatpush1.bf16.msra.mxu0 %v5228_v2  ;;  %6319 = vst [vmem:[#allocation35_spill] sm:$0xff] %v5250_v0  ;;  %v5263_v47 = vpack.c.bf16 %v386_v20, %v382_v37  ;;  %v394_v37 = vld [vmem:[#allocation11 + $0x238] sm:$0xff]  ;;  %v387_v20 = vld [vmem:[#allocation11 + $0x200] sm:$0xff] }
  0x80   :  { %3192 = vmatprep.subr.bf16.mxu0 %v5231_v13  ;;  %6320 = vst [vmem:[#allocation36_spill] sm:$0xff] %v5252_v59 }
  0x81   :  { %3254 = vmatpush1.bf16.msra.mxu1 %v5234_v19  ;;  %6323 = vst [vmem:[#allocation39_spill] sm:$0xff] %v5263_v47 }
  0x82   :  { %3256 = vmatprep.subr.bf16.mxu1 %v5238_v33 }
  0x83   :  { %3194 = vmatpush1.bf16.msra.mxu0 %v5240_v38 }
  0x84   :  { %3196 = vmatprep.subr.bf16.mxu0 %v5243_v54  ;;  %v5265_v54 = vpack.c.bf16 %v383_v41, %v379_v55  ;;  %v391_v55 = vld [vmem:[#allocation11 + $0x220] sm:$0xff]  ;;  %v5275_v41 = vpack.c.bf16 %v394_v37, %v390_v31  ;;  %v398_v31 = vld [vmem:[#allocation11 + $0x258] sm:$0xff] }
  0x85   :  { %3258 = vmatpush1.bf16.msra.mxu1 %v5246_v3  ;;  %v5277_v3 = vpack.c.bf16 %v391_v55, %v387_v20  ;;  %v402_v37 = vld [vmem:[#allocation11 + $0x278] sm:$0xff]  ;;  %v395_v55 = vld [vmem:[#allocation11 + $0x240] sm:$0xff] }
  0x86   :  { %3260 = vmatprep.subr.bf16.mxu1 %v5250_v0  ;;  %6324 = vst [vmem:[#allocation40_spill] sm:$0xff] %v5265_v54  ;;  %v5268_v0 = vpack.c.bf16 %v385_v5, %v381_v14  ;;  %6327 = vst [vmem:[#allocation43_spill] sm:$0xff] %v5275_v41  ;;  %v389_v14 = vld [vmem:[#allocation11 + $0x210] sm:$0xff]  ;;  %v5287_v20 = vpack.c.bf16 %v402_v37, %v398_v31  ;;  %v410_v31 = vld [vmem:[#allocation11 + $0x2b8] sm:$0xff] }
  0x87   :  { %3198 = vmatpush1.bf16.msra.mxu0 %v5252_v59  ;;  %6328 = vst [vmem:[#allocation44_spill] sm:$0xff] %v5277_v3  ;;  %v393_v5 = vld [vmem:[#allocation11 + $0x230] sm:$0xff]  ;;  %v403_v37 = vld [vmem:[#allocation11 + $0x280] sm:$0xff] }
  0x88   :  { %3200 = vmatprep.subr.bf16.mxu0 %v5261_v40  ;;  %6325 = vst [vmem:[#allocation41_spill] sm:$0xff] %v5268_v0  ;;  %6331 = vst [vmem:[#allocation47_spill] sm:$0xff] %v5287_v20  ;;  %v397_v40 = vld [vmem:[#allocation11 + $0x250] sm:$0xff] }
  0x89   :  { %3262 = vmatpush1.bf16.msra.mxu1 %v5256_v11  ;;  %v388_v11 = vld [vmem:[#allocation11 + $0x208] sm:$0xff] }
  0x8a   :  { %3264 = vmatprep.subr.bf16.mxu1 %v5263_v47  ;;  %v5273_v59 = vpack.c.bf16 %v392_v28, %v388_v11  ;;  %v5280_v47 = vpack.c.bf16 %v393_v5, %v389_v14  ;;  %v400_v11 = vld [vmem:[#allocation11 + $0x268] sm:$0xff]  ;;  %v401_v5 = vld [vmem:[#allocation11 + $0x270] sm:$0xff] }
  0x8b   :  { %3202 = vmatpush1.bf16.msra.mxu0 %v5265_v54  ;;  %v399_v54 = vld [vmem:[#allocation11 + $0x260] sm:$0xff] }
  0x8c   :  { %6326 = vst [vmem:[#allocation42_spill] sm:$0xff] %v5273_v59  ;;  %3204 = vmatprep.subr.bf16.mxu0 %v5273_v59  ;;  %6329 = vst [vmem:[#allocation45_spill] sm:$0xff] %v5280_v47  ;;  %v5290_v14 = vpack.c.bf16 %v399_v54, %v395_v55  ;;  %v407_v59 = vld [vmem:[#allocation11 + $0x2a0] sm:$0xff]  ;;  %v405_v55 = vld [vmem:[#allocation11 + $0x290] sm:$0xff] }
  0x8d   :  { %3266 = vmatpush1.bf16.msra.mxu1 %v5268_v0  ;;  %v396_v0 = vld [vmem:[#allocation11 + $0x248] sm:$0xff]  ;;  %v5301_v54 = vpack.c.bf16 %v407_v59, %v403_v37 }
  0x8e   :  { %3268 = vmatprep.subr.bf16.mxu1 %v5275_v41  ;;  %v5285_v28 = vpack.c.bf16 %v400_v11, %v396_v0  ;;  %6332 = vst [vmem:[#allocation48_spill] sm:$0xff] %v5290_v14  ;;  %v404_v41 = vld [vmem:[#allocation11 + $0x288] sm:$0xff]  ;;  %v406_v0 = vld [vmem:[#allocation11 + $0x298] sm:$0xff] }
  0x8f   :  { %3206 = vmatpush1.bf16.msra.mxu0 %v5277_v3  ;;  %v5293_v3 = vpack.c.bf16 %v401_v5, %v397_v40  ;;  %6336 = vst [vmem:[#allocation52_spill] sm:$0xff] %v5301_v54  ;;  %v412_v5 = vld [vmem:[#allocation11 + $0x2c8] sm:$0xff] }
  0x90   :  { %6330 = vst [vmem:[#allocation46_spill] sm:$0xff] %v5285_v28  ;;  %3208 = vmatprep.subr.bf16.mxu0 %v5285_v28  ;;  %v5299_v28 = vpack.c.bf16 %v410_v31, %v406_v0  ;;  %v411_v0 = vld [vmem:[#allocation11 + $0x2c0] sm:$0xff] }
  0x91   :  { %3270 = vmatpush1.bf16.msra.mxu1 %v5280_v47  ;;  %6333 = vst [vmem:[#allocation49_spill] sm:$0xff] %v5293_v3  ;;  %v408_v47 = vld [vmem:[#allocation11 + $0x2a8] sm:$0xff]  ;;  %v415_v31 = vld [vmem:[#allocation11 + $0x2e0] sm:$0xff] }
  0x92   :  { %3272 = vmatprep.subr.bf16.mxu1 %v5287_v20  ;;  %v5296_v11 = vpack.c.bf16 %v408_v47, %v404_v41  ;;  %6335 = vst [vmem:[#allocation51_spill] sm:$0xff] %v5299_v28  ;;  %v409_v20 = vld [vmem:[#allocation11 + $0x2b0] sm:$0xff]  ;;  %v416_v47 = vld [vmem:[#allocation11 + $0x2e8] sm:$0xff]  ;;  %v414_v41 = vld [vmem:[#allocation11 + $0x2d8] sm:$0xff]  ;;  %v5313_v37 = vpack.c.bf16 %v415_v31, %v411_v0 }
  0x93   :  { %3210 = vmatpush1.bf16.msra.mxu0 %v5290_v14  ;;  %v5304_v40 = vpack.c.bf16 %v409_v20, %v405_v55  ;;  %v5308_v14 = vpack.c.bf16 %v416_v47, %v412_v5  ;;  %v413_v20 = vld [vmem:[#allocation11 + $0x2d0] sm:$0xff]  ;;  %v424_v5 = vld [vmem:[#allocation11 + $0x328] sm:$0xff]  ;;  %v422_v47 = vld [vmem:[#allocation11 + $0x318] sm:$0xff] }
  0x94   :  { %6334 = vst [vmem:[#allocation50_spill] sm:$0xff] %v5296_v11  ;;  %3212 = vmatprep.subr.bf16.mxu0 %v5296_v11  ;;  %6340 = vst [vmem:[#allocation56_spill] sm:$0xff] %v5313_v37  ;;  %v417_v55 = vld [vmem:[#allocation11 + $0x2f0] sm:$0xff] }
  0x95   :  { %3274 = vmatpush1.bf16.msra.mxu1 %v5293_v3  ;;  %6337 = vst [vmem:[#allocation53_spill] sm:$0xff] %v5304_v40  ;;  %6338 = vst [vmem:[#allocation54_spill] sm:$0xff] %v5308_v14  ;;  %v418_v3 = vld [vmem:[#allocation11 + $0x2f8] sm:$0xff] }
  0x96   :  { %3276 = vmatprep.subr.bf16.mxu1 %v5299_v28  ;;  %v5311_v59 = vpack.c.bf16 %v418_v3, %v414_v41  ;;  %v5316_v28 = vpack.c.bf16 %v417_v55, %v413_v20  ;;  %v419_v3 = vld [vmem:[#allocation11 + $0x300] sm:$0xff]  ;;  %v421_v20 = vld [vmem:[#allocation11 + $0x310] sm:$0xff] }
  0x97   :  { %3214 = vmatpush1.bf16.msra.mxu0 %v5301_v54  ;;  %v420_v54 = vld [vmem:[#allocation11 + $0x308] sm:$0xff]  ;;  %v423_v41 = vld [vmem:[#allocation11 + $0x320] sm:$0xff]  ;;  %v425_v55 = vld [vmem:[#allocation11 + $0x330] sm:$0xff] }
  0x98   :  { %6339 = vst [vmem:[#allocation55_spill] sm:$0xff] %v5311_v59  ;;  %3216 = vmatprep.subr.bf16.mxu0 %v5308_v14  ;;  %6341 = vst [vmem:[#allocation57_spill] sm:$0xff] %v5316_v28  ;;  %v5320_v11 = vpack.c.bf16 %v424_v5, %v420_v54  ;;  %v5325_v31 = vpack.c.bf16 %v423_v41, %v419_v3  ;;  %v432_v54 = vld [vmem:[#allocation11 + $0x368] sm:$0xff]  ;;  %v430_v5 = vld [vmem:[#allocation11 + $0x358] sm:$0xff] }
  0x99   :  { %3278 = vmatpush1.bf16.msra.mxu1 %v5304_v40  ;;  %v426_v40 = vld [vmem:[#allocation11 + $0x338] sm:$0xff] }
  0x9a   :  { %3280 = vmatprep.subr.bf16.mxu1 %v5311_v59  ;;  %6342 = vst [vmem:[#allocation58_spill] sm:$0xff] %v5320_v11  ;;  %v5323_v0 = vpack.c.bf16 %v426_v40, %v422_v47  ;;  %6344 = vst [vmem:[#allocation60_spill] sm:$0xff] %v5325_v31  ;;  %v5328_v59 = vpack.c.bf16 %v425_v55, %v421_v20  ;;  %v427_v40 = vld [vmem:[#allocation11 + $0x340] sm:$0xff]  ;;  %v429_v20 = vld [vmem:[#allocation11 + $0x350] sm:$0xff] }
  0x9b   :  { %3218 = vmatpush1.bf16.msra.mxu0 %v5313_v37  ;;  %v428_v37 = vld [vmem:[#allocation11 + $0x348] sm:$0xff]  ;;  %v431_v47 = vld [vmem:[#allocation11 + $0x360] sm:$0xff]  ;;  %v433_v55 = vld [vmem:[#allocation11 + $0x370] sm:$0xff] }
  0x9c   :  { %6343 = vst [vmem:[#allocation59_spill] sm:$0xff] %v5323_v0  ;;  %3220 = vmatprep.subr.bf16.mxu0 %v5320_v11  ;;  %6345 = vst [vmem:[#allocation61_spill] sm:$0xff] %v5328_v59  ;;  %v5332_v14 = vpack.c.bf16 %v432_v54, %v428_v37  ;;  %v5337_v41 = vpack.c.bf16 %v431_v47, %v427_v40  ;;  %v440_v37 = vld [vmem:[#allocation11 + $0x3a8] sm:$0xff]  ;;  %v438_v54 = vld [vmem:[#allocation11 + $0x398] sm:$0xff] }
  0x9d   :  { %3282 = vmatpush1.bf16.msra.mxu1 %v5316_v28  ;;  %v434_v28 = vld [vmem:[#allocation11 + $0x378] sm:$0xff] }
  0x9e   :  { %3284 = vmatprep.subr.bf16.mxu1 %v5323_v0  ;;  %6346 = vst [vmem:[#allocation62_spill] sm:$0xff] %v5332_v14  ;;  %v5335_v3 = vpack.c.bf16 %v434_v28, %v430_v5  ;;  %6348 = vst [vmem:[#allocation64_spill] sm:$0xff] %v5337_v41  ;;  %v5340_v0 = vpack.c.bf16 %v433_v55, %v429_v20  ;;  %v435_v28 = vld [vmem:[#allocation11 + $0x380] sm:$0xff]  ;;  %v437_v20 = vld [vmem:[#allocation11 + $0x390] sm:$0xff] }
  0x9f   :  { %3222 = vmatpush1.bf16.msra.mxu0 %v5325_v31  ;;  %v436_v31 = vld [vmem:[#allocation11 + $0x388] sm:$0xff]  ;;  %v439_v5 = vld [vmem:[#allocation11 + $0x3a0] sm:$0xff]  ;;  %v441_v55 = vld [vmem:[#allocation11 + $0x3b0] sm:$0xff] }
  0xa0   :  { %6347 = vst [vmem:[#allocation63_spill] sm:$0xff] %v5335_v3  ;;  %3224 = vmatprep.subr.bf16.mxu0 %v5332_v14  ;;  %6349 = vst [vmem:[#allocation65_spill] sm:$0xff] %v5340_v0  ;;  %v5344_v11 = vpack.c.bf16 %v440_v37, %v436_v31  ;;  %v5349_v47 = vpack.c.bf16 %v439_v5, %v435_v28  ;;  %v448_v31 = vld [vmem:[#allocation11 + $0x3e8] sm:$0xff]  ;;  %v446_v37 = vld [vmem:[#allocation11 + $0x3d8] sm:$0xff] }
  0xa1   :  { %3286 = vmatpush1.bf16.msra.mxu1 %v5328_v59  ;;  %v442_v59 = vld [vmem:[#allocation11 + $0x3b8] sm:$0xff] }
  0xa2   :  { %3288 = vmatprep.subr.bf16.mxu1 %v5335_v3  ;;  %6350 = vst [vmem:[#allocation66_spill] sm:$0xff] %v5344_v11  ;;  %v5347_v40 = vpack.c.bf16 %v442_v59, %v438_v54  ;;  %6352 = vst [vmem:[#allocation68_spill] sm:$0xff] %v5349_v47  ;;  %v5352_v3 = vpack.c.bf16 %v441_v55, %v437_v20  ;;  %v443_v59 = vld [vmem:[#allocation11 + $0x3c0] sm:$0xff]  ;;  %v445_v20 = vld [vmem:[#allocation11 + $0x3d0] sm:$0xff] }
  0xa3   :  { %3226 = vmatpush1.bf16.msra.mxu0 %v5337_v41  ;;  %v444_v41 = vld [vmem:[#allocation11 + $0x3c8] sm:$0xff]  ;;  %v447_v54 = vld [vmem:[#allocation11 + $0x3e0] sm:$0xff]  ;;  %v449_v55 = vld [vmem:[#allocation11 + $0x3f0] sm:$0xff] }
  0xa4   :  { %6351 = vst [vmem:[#allocation67_spill] sm:$0xff] %v5347_v40  ;;  %3228 = vmatprep.subr.bf16.mxu0 %v5344_v11  ;;  %6353 = vst [vmem:[#allocation69_spill] sm:$0xff] %v5352_v3  ;;  %v5356_v14 = vpack.c.bf16 %v448_v31, %v444_v41  ;;  %v5361_v5 = vpack.c.bf16 %v447_v54, %v443_v59  ;;  %v92_v41 = vld [vmem:[#allocation6 + $0x8] sm:$0xff]  ;;  %v93_v54 = vld [vmem:[#allocation6 + $0x10] sm:$0xff] }
  0xa5   :  { %3290 = vmatpush1.bf16.msra.mxu1 %v5340_v0  ;;  %v450_v0 = vld [vmem:[#allocation11 + $0x3f8] sm:$0xff] }
  0xa6   :  { %3292 = vmatprep.subr.bf16.mxu1 %v5347_v40  ;;  %6354 = vst [vmem:[#allocation70_spill] sm:$0xff] %v5356_v14  ;;  %v5359_v28 = vpack.c.bf16 %v450_v0, %v446_v37  ;;  %6356 = vst [vmem:[#allocation72_spill] sm:$0xff] %v5361_v5  ;;  %v5364_v40 = vpack.c.bf16 %v449_v55, %v445_v20  ;;  %v91_v0 = vld [vmem:[#allocation6] sm:$0xff] }
  0xa7   :  { %3230 = vmatpush1.bf16.msra.mxu0 %v5349_v47 }
  0xa8   :  { %6355 = vst [vmem:[#allocation71_spill] sm:$0xff] %v5359_v28  ;;  %3232 = vmatprep.subr.bf16.mxu0 %v5356_v14  ;;  %6357 = vst [vmem:[#allocation73_spill] sm:$0xff] %v5364_v40 }
  0xa9   :  { %3294 = vmatpush1.bf16.msra.mxu1 %v5352_v3 }
  0xaa   :  { %3296 = vmatprep.subr.bf16.mxu1 %v5359_v28 }
  0xab   :  { %3234 = vmatpush1.bf16.msra.mxu0 %v5361_v5  ;;  %v94_v5 = vld [vmem:[#allocation6 + $0x18] sm:$0xff] }
  0xac   :  { %3300 = vmatprep.subr.bf16.mxu0 %v5077_v4 }
  0xad   :  { %3298 = vmatpush1.bf16.msra.mxu1 %v5364_v40 }
  0xae   :  { %3332 = vmatprep.subr.bf16.mxu1 %v5087_v17 }
 0x141   :  { %v225_v31 = vpop.f32.mrb[0].mxu0 }
 0x142   :  { %v301_v37 = vadd.f32 %v225_v31, %v91_v0  ;;  %v227_v59 = vpop.f32.mrb[1].mxu0 }
 0x143   :  { %v302_v3 = vadd.f32 %v227_v59, %v92_v41  ;;  %v296_v20 = vpop.f32.mrb[0].mxu1 }
 0x144   :  { %v305_v14 = vmul.f32 0.5, %v301_v37  ;;  %v303_v47 = vadd.f32 %v296_v20, %v93_v54  ;;  %v298_v28 = vpop.f32.mrb[1].mxu1  ;;  %v6366_v20 = vld [vmem:[#allocation31_spill] sm:$0xff] }
 0x145   :  { %v309_v55 = vmul.f32 0.5, %v302_v3  ;;  %v304_v40 = vadd.f32 %v298_v28, %v94_v5  ;;  %v6365_v5 = vld [vmem:[#allocation29_spill] sm:$0xff] }
 0x146   :  { %4679 = vtanh.f32 %v305_v14 }
 0x147   :  { %4681 = vtanh.f32 %v309_v55  ;;  %v314_v4 = vmul.f32 0.5, %v304_v40  ;;  %v6364_v40 = vld [vmem:[#allocation25_spill] sm:$0xff]  ;;  %v6367_v55 = vld [vmem:[#allocation32_spill] sm:$0xff] }
 0x148   :  { %4683 = vtanh.f32 %v303_v47 }
 0x149   :  { %4685 = vtanh.f32 %v314_v4  ;;  %v6358_v4 = vmov 0.0  }
 0x150   :  { %v4680_v11 = vpop.eup %4679 }
 0x151   :  { %v4682_v17 = vpop.eup %4681  ;;  %v307_v38 = vmul.f32 0.5, %v4680_v11  ;;  %v6363_v11 = vld [vmem:[#allocation26_spill] sm:$0xff] }
 0x152   :  { %v4684_v33 = vpop.eup %4683  ;;  %v311_v13 = vmul.f32 0.5, %v4682_v17  ;;  %v6359_v17 = vld [vmem:[#allocation22_spill] sm:$0xff] }
 0x153   :  { %v308_v0 = vadd.f32 0.5, %v307_v38  ;;  %v4686_v14 = vpop.eup %4685  ;;  %v6362_v38 = vld [vmem:[#allocation24_spill] sm:$0xff] }
 0x154   :  { %v312_v31 = vadd.f32 0.5, %v311_v13  ;;  %v316_v3 = vmul.f32 0.5, %v4686_v14  ;;  %v6360_v13 = vld [vmem:[#allocation21_spill] sm:$0xff] }
 0x155   :  { %v319_v41 = vmul.f32 %v4684_v33, %v308_v0  ;;  %v6361_v33 = vld [vmem:[#allocation23_spill] sm:$0xff]  ;;  %v6368_v0 = vld [vmem:[#allocation34_spill] sm:$0xff]  ;;  %v6372_v14 = vld [vmem:[#allocation37_spill] sm:$0xff] }
 0x156   :  { %v318_v37 = vmul.f32 0.0, %v312_v31  ;;  %v317_v54 = vadd.f32 0.5, %v316_v3  ;;  %v6369_v31 = vld [vmem:[#allocation33_spill] sm:$0xff]  ;;  %v6373_v3 = vld [vmem:[#allocation38_spill] sm:$0xff] }
 0x158   :  { %v5371_v59 = vadd.f32 %v319_v41, %v318_v37  ;;  %v6370_v41 = vld [vmem:[#allocation35_spill] sm:$0xff]  ;;  %v6371_v37 = vld [vmem:[#allocation36_spill] sm:$0xff] }
 0x15a   :  { %4687 = vtanh.f32 %v5371_v59 }
 0x164   :  { %v4688_v47 = vpop.eup %4687 }
 0x165   :  { %v322_v28 = vmul.f32 %v4688_v47, %v317_v54  ;;  %v6374_v54 = vld [vmem:[#allocation39_spill] sm:$0xff]  ;;  %v6375_v47 = vld [vmem:[#allocation40_spill] sm:$0xff] }
 0x167   :  { %538 = vmatmul.mubr.f32.vlgmr.msra.gmra.mrb[2].mxu0 %v322_v28  ;;  %609 = vmatmul.mubr.f32.vlgmr.msra.gmra.mrb[2].mxu1 %v322_v28 }
 0x168   :  { %3302 = vmatpush1.bf16.msra.mxu0 %v5079_v8  ;;  %3334 = vmatpush1.bf16.msra.mxu1 %v5089_v18 }
 0x169   :  { %3304 = vmatprep.subr.bf16.mxu0 %v5081_v9  ;;  %3336 = vmatprep.subr.bf16.mxu1 %v5095_v26 }
 0x16a   :  { %702 = vmatprep.mubr.f32.mxu0 %v6358_v4  ;;  %773 = vmatprep.mubr.f32.mxu1 %v6358_v4 }
 0x16c   :  { %3306 = vmatpush1.bf16.msra.mxu0 %v5085_v16  ;;  %3338 = vmatpush1.bf16.msra.mxu1 %v5098_v30 }
 0x16d   :  { %3308 = vmatprep.subr.bf16.mxu0 %v5092_v22  ;;  %3340 = vmatprep.subr.bf16.mxu1 %v5107_v39 }
 0x170   :  { %3310 = vmatpush1.bf16.msra.mxu0 %v5101_v32  ;;  %3342 = vmatpush1.bf16.msra.mxu1 %v5110_v44 }
 0x171   :  { %3312 = vmatprep.subr.bf16.mxu0 %v5105_v36  ;;  %3344 = vmatprep.subr.bf16.mxu1 %v5116_v48 }
 0x174   :  { %3314 = vmatpush1.bf16.msra.mxu0 %v5113_v46  ;;  %3346 = vmatpush1.bf16.msra.mxu1 %v5122_v57 }
 0x175   :  { %3316 = vmatprep.subr.bf16.mxu0 %v5119_v51  ;;  %3348 = vmatprep.subr.bf16.mxu1 %v5128_v60 }
 0x178   :  { %3318 = vmatpush1.bf16.msra.mxu0 %v5125_v58  ;;  %3350 = vmatpush1.bf16.msra.mxu1 %v5134_v7 }
 0x179   :  { %3320 = vmatprep.subr.bf16.mxu0 %v5131_v63  ;;  %3352 = vmatprep.subr.bf16.mxu1 %v5140_v12 }
 0x17c   :  { %3322 = vmatpush1.bf16.msra.mxu0 %v5137_v10  ;;  %3354 = vmatpush1.bf16.msra.mxu1 %v5146_v25 }
 0x17d   :  { %3324 = vmatprep.subr.bf16.mxu0 %v5143_v15  ;;  %3356 = vmatprep.subr.bf16.mxu1 %v5152_v29 }
 0x180   :  { %3326 = vmatpush1.bf16.msra.mxu0 %v5149_v27  ;;  %3358 = vmatpush1.bf16.msra.mxu1 %v5158_v42 }
 0x181   :  { %3328 = vmatprep.subr.bf16.mxu0 %v5155_v34  ;;  %3360 = vmatprep.subr.bf16.mxu1 %v5164_v45 }
 0x184   :  { %3330 = vmatpush1.bf16.msra.mxu0 %v5161_v43  ;;  %3362 = vmatpush1.bf16.msra.mxu1 %v5170_v61 }
 0x185   :  { %3364 = vmatprep.subr.bf16.mxu0 %v5167_v52  ;;  %3428 = vmatprep.subr.bf16.mxu1 %v5174_v62 }
 0x187   :  { %703 = vmatmul.mubr.f32.vlgmr.msra.gmra.mrb[4].mxu0 %v322_v28  ;;  %774 = vmatmul.mubr.f32.vlgmr.msra.gmra.mrb[4].mxu1 %v322_v28  ;;  %v6376_v28 = vld [vmem:[#allocation41_spill] sm:$0xff] }
 0x188   :  { %3366 = vmatpush1.bf16.msra.mxu0 %v5176_v1  ;;  %3430 = vmatpush1.bf16.msra.mxu1 %v5183_v21 }
 0x189   :  { %3368 = vmatprep.subr.bf16.mxu0 %v5179_v6  ;;  %3432 = vmatprep.subr.bf16.mxu1 %v5187_v23 }
 0x18c   :  { %3370 = vmatpush1.bf16.msra.mxu0 %v5189_v24  ;;  %3434 = vmatpush1.bf16.msra.mxu1 %v5197_v49 }
 0x18d   :  { %3372 = vmatprep.subr.bf16.mxu0 %v5192_v35  ;;  %3436 = vmatprep.subr.bf16.mxu1 %v5202_v50 }
 0x190   :  { %3374 = vmatpush1.bf16.msra.mxu0 %v5204_v53  ;;  %3438 = vmatpush1.bf16.msra.mxu1 %v6359_v17 }
 0x191   :  { %3376 = vmatprep.subr.bf16.mxu0 %v6360_v13  ;;  %3440 = vmatprep.subr.bf16.mxu1 %v6361_v33 }
 0x194   :  { %3378 = vmatpush1.bf16.msra.mxu0 %v6362_v38  ;;  %3442 = vmatpush1.bf16.msra.mxu1 %v6363_v11 }
 0x195   :  { %3380 = vmatprep.subr.bf16.mxu0 %v6364_v40  ;;  %3444 = vmatprep.subr.bf16.mxu1 %v5226_v56 }
 0x198   :  { %3382 = vmatpush1.bf16.msra.mxu0 %v5228_v2  ;;  %3446 = vmatpush1.bf16.msra.mxu1 %v5234_v19 }
 0x199   :  { %3384 = vmatprep.subr.bf16.mxu0 %v6365_v5  ;;  %3448 = vmatprep.subr.bf16.mxu1 %v6366_v20  ;;  %v6377_v20 = vld [vmem:[#allocation42_spill] sm:$0xff] }
 0x19c   :  { %3386 = vmatpush1.bf16.msra.mxu0 %v6367_v55  ;;  %3450 = vmatpush1.bf16.msra.mxu1 %v6368_v0  ;;  %v6378_v55 = vld [vmem:[#allocation43_spill] sm:$0xff]  ;;  %v6379_v0 = vld [vmem:[#allocation44_spill] sm:$0xff] }
 0x19d   :  { %3388 = vmatprep.subr.bf16.mxu0 %v6369_v31  ;;  %3452 = vmatprep.subr.bf16.mxu1 %v6370_v41  ;;  %v6380_v31 = vld [vmem:[#allocation45_spill] sm:$0xff]  ;;  %v6381_v41 = vld [vmem:[#allocation46_spill] sm:$0xff] }
 0x1a0   :  { %3390 = vmatpush1.bf16.msra.mxu0 %v6371_v37  ;;  %3454 = vmatpush1.bf16.msra.mxu1 %v6372_v14  ;;  %v6382_v37 = vld [vmem:[#allocation47_spill] sm:$0xff]  ;;  %v6383_v14 = vld [vmem:[#allocation48_spill] sm:$0xff] }
 0x1a1   :  { %3392 = vmatprep.subr.bf16.mxu0 %v6373_v3  ;;  %3456 = vmatprep.subr.bf16.mxu1 %v6374_v54  ;;  %v6384_v3 = vld [vmem:[#allocation49_spill] sm:$0xff]  ;;  %v6385_v54 = vld [vmem:[#allocation50_spill] sm:$0xff] }
 0x1a4   :  { %3394 = vmatpush1.bf16.msra.mxu0 %v6375_v47  ;;  %3458 = vmatpush1.bf16.msra.mxu1 %v6376_v28  ;;  %v6386_v47 = vld [vmem:[#allocation51_spill] sm:$0xff]  ;;  %v6387_v28 = vld [vmem:[#allocation52_spill] sm:$0xff] }
 0x1a5   :  { %3396 = vmatprep.subr.bf16.mxu0 %v6377_v20  ;;  %3460 = vmatprep.subr.bf16.mxu1 %v6378_v55  ;;  %v6388_v20 = vld [vmem:[#allocation53_spill] sm:$0xff]  ;;  %v6389_v55 = vld [vmem:[#allocation54_spill] sm:$0xff] }
 0x1a8   :  { %3398 = vmatpush1.bf16.msra.mxu0 %v6379_v0  ;;  %3462 = vmatpush1.bf16.msra.mxu1 %v6380_v31  ;;  %v6390_v0 = vld [vmem:[#allocation55_spill] sm:$0xff]  ;;  %v6391_v31 = vld [vmem:[#allocation56_spill] sm:$0xff] }
 0x1a9   :  { %3400 = vmatprep.subr.bf16.mxu0 %v6381_v41  ;;  %3464 = vmatprep.subr.bf16.mxu1 %v6382_v37  ;;  %v6392_v41 = vld [vmem:[#allocation57_spill] sm:$0xff]  ;;  %v6393_v37 = vld [vmem:[#allocation58_spill] sm:$0xff] }
 0x1ac   :  { %3402 = vmatpush1.bf16.msra.mxu0 %v6383_v14  ;;  %3466 = vmatpush1.bf16.msra.mxu1 %v6384_v3  ;;  %v6394_v14 = vld [vmem:[#allocation59_spill] sm:$0xff]  ;;  %v6395_v3 = vld [vmem:[#allocation60_spill] sm:$0xff] }
 0x1ad   :  { %3404 = vmatprep.subr.bf16.mxu0 %v6385_v54  ;;  %3468 = vmatprep.subr.bf16.mxu1 %v6386_v47  ;;  %v6396_v54 = vld [vmem:[#allocation61_spill] sm:$0xff]  ;;  %v6397_v47 = vld [vmem:[#allocation62_spill] sm:$0xff] }
 0x1b0   :  { %3406 = vmatpush1.bf16.msra.mxu0 %v6387_v28  ;;  %3470 = vmatpush1.bf16.msra.mxu1 %v6388_v20  ;;  %v6398_v28 = vld [vmem:[#allocation63_spill] sm:$0xff]  ;;  %v6399_v20 = vld [vmem:[#allocation64_spill] sm:$0xff] }
 0x1b1   :  { %3408 = vmatprep.subr.bf16.mxu0 %v6389_v55  ;;  %3472 = vmatprep.subr.bf16.mxu1 %v6390_v0  ;;  %v6400_v55 = vld [vmem:[#allocation65_spill] sm:$0xff]  ;;  %v6401_v0 = vld [vmem:[#allocation66_spill] sm:$0xff] }
 0x1b4   :  { %3410 = vmatpush1.bf16.msra.mxu0 %v6391_v31  ;;  %3474 = vmatpush1.bf16.msra.mxu1 %v6392_v41  ;;  %v6402_v31 = vld [vmem:[#allocation67_spill] sm:$0xff]  ;;  %v6403_v41 = vld [vmem:[#allocation68_spill] sm:$0xff] }
 0x1b5   :  { %3412 = vmatprep.subr.bf16.mxu0 %v6393_v37  ;;  %3476 = vmatprep.subr.bf16.mxu1 %v6394_v14  ;;  %v6404_v37 = vld [vmem:[#allocation69_spill] sm:$0xff]  ;;  %v6405_v14 = vld [vmem:[#allocation70_spill] sm:$0xff] }
 0x1b8   :  { %3414 = vmatpush1.bf16.msra.mxu0 %v6395_v3  ;;  %3478 = vmatpush1.bf16.msra.mxu1 %v6396_v54  ;;  %v6406_v3 = vld [vmem:[#allocation71_spill] sm:$0xff]  ;;  %v6407_v54 = vld [vmem:[#allocation72_spill] sm:$0xff] }
 0x1b9   :  { %3416 = vmatprep.subr.bf16.mxu0 %v6397_v47  ;;  %3480 = vmatprep.subr.bf16.mxu1 %v6398_v28  ;;  %v6408_v47 = vld [vmem:[#allocation73_spill] sm:$0xff]  ;;  %v6409_v28 = vld [vmem:[#allocation19_spill] sm:$0xff] }
 0x1bc   :  { %3418 = vmatpush1.bf16.msra.mxu0 %v6399_v20  ;;  %3482 = vmatpush1.bf16.msra.mxu1 %v6400_v55  ;;  %v6410_v20 = vld [vmem:[#allocation20_spill] sm:$0xff]  ;;  %v453_v55 = vlaneseq }
 0x1bd   :  { %3420 = vmatprep.subr.bf16.mxu0 %v6401_v0  ;;  %3484 = vmatprep.subr.bf16.mxu1 %v6402_v31 }
 0x1be   :  { %v454_v0 = vshrl.u32 %v453_v55, 7 }
 0x1c0   :  { %3422 = vmatpush1.bf16.msra.mxu0 %v6403_v41  ;;  %3486 = vmatpush1.bf16.msra.mxu1 %v6404_v37  ;;  %v455_v5 = vsub.s32 0, %v454_v0  ;;  %v451_v41 = vld [vmem:[%s6173_s3] sm:$0xf]  ;;  %v459_v37 = vsub.s32 1, %v454_v0  ;;  %v467_v2 = vsub.s32 3, %v454_v0 }
 0x1c1   :  { %3424 = vmatprep.subr.bf16.mxu0 %v6405_v14  ;;  %3488 = vmatprep.subr.bf16.mxu1 %v6406_v3  ;;  %v463_v14 = vsub.s32 2, %v454_v0 }
 0x1c2   :  { %v5475_v31 = vrot.slane %v451_v41, %v455_v5  ;;  %v5477_v3 = vrot.slane %v451_v41, %v459_v37  ;;  %v5484_v38 = vrot.slane %v451_v41, %v467_v2 }
 0x1c4   :  { %3426 = vmatpush1.bf16.msra.mxu0 %v6407_v54  ;;  %3490 = vmatpush1.bf16.msra.mxu1 %v6408_v47  ;;  %6411 = vst [vmem:[#allocation74_spill] sm:$0xff] %v5475_v31  ;;  %6412 = vst [vmem:[#allocation75_spill] sm:$0xff] %v5477_v3 }
 0x1c5   :  { %3492 = vmatprep.subr.bf16.mxu0 %v6409_v28  ;;  %3524 = vmatprep.subr.bf16.mxu1 %v6410_v20  ;;  %v5480_v28 = vrot.slane %v451_v41, %v463_v14  ;;  %6414 = vst [vmem:[#allocation77_spill] sm:$0xff] %v5484_v38  ;;  %v635_v41 = vld [vmem:[#allocation6 + $0x28] sm:$0xff] }
 0x1c7   :  { %6413 = vst [vmem:[#allocation76_spill] sm:$0xff] %v5480_v28 }
 0x23a   :  { %v539_v54 = vpop.f32.mrb[2].mxu0  ;;  %v610_v19 = vpop.f32.mrb[2].mxu1 }
 0x23b   :  { %v540_v47 = vadd.f32 %v539_v54, %v5475_v31  ;;  %v541_v20 = vpop.f32.mrb[3].mxu0  ;;  %v612_v55 = vpop.f32.mrb[3].mxu1  ;;  %v611_v5 = vadd.f32 %v610_v19, %v5480_v28 }
 0x23c   :  { %v542_v56 = vadd.f32 %v541_v20, %v5477_v3  ;;  %v613_v37 = vadd.f32 %v612_v55, %v5484_v38 }
 0x23d   :  { %v615_v40 = vmul.f32 0.5, %v540_v47 }
 0x23e   :  { %v619_v11 = vmul.f32 0.5, %v542_v56  ;;  %v624_v33 = vmul.f32 0.5, %v613_v37 }
 0x23f   :  { %4689 = vtanh.f32 %v615_v40 }
 0x240   :  { %4691 = vtanh.f32 %v619_v11  ;;  %v634_v11 = vld [vmem:[#allocation6 + $0x20] sm:$0xff] }
 0x241   :  { %4693 = vtanh.f32 %v611_v5 }
 0x242   :  { %4695 = vtanh.f32 %v624_v33  ;;  %v636_v33 = vld [vmem:[#allocation6 + $0x30] sm:$0xff] }
 0x249   :  { %v4690_v54 = vpop.eup %4689 }
 0x24a   :  { %v4692_v14 = vpop.eup %4691  ;;  %v617_v31 = vmul.f32 0.5, %v4690_v54 }
 0x24b   :  { %v621_v13 = vmul.f32 0.5, %v4692_v14  ;;  %v4694_v17 = vpop.eup %4693 }
 0x24c   :  { %v618_v0 = vadd.f32 0.5, %v617_v31  ;;  %v4696_v19 = vpop.eup %4695 }
 0x24d   :  { %v622_v20 = vadd.f32 0.5, %v621_v13  ;;  %v626_v2 = vmul.f32 0.5, %v4696_v19 }
 0x24e   :  { %v629_v47 = vmul.f32 %v4694_v17, %v618_v0 }
 0x24f   :  { %v628_v56 = vmul.f32 0.0, %v622_v20  ;;  %v627_v14 = vadd.f32 0.5, %v626_v2 }
 0x251   :  { %v5487_v40 = vadd.f32 %v629_v47, %v628_v56  ;;  %v637_v47 = vld [vmem:[#allocation6 + $0x38] sm:$0xff] }
 0x253   :  { %6415 = vst [vmem:[#allocation78_spill] sm:$0xff] %v5487_v40  ;;  %4697 = vtanh.f32 %v5487_v40 }
 0x25a   :  { %v704_v55 = vpop.f32.mrb[4].mxu0  ;;  %v775_v5 = vpop.f32.mrb[4].mxu1 }
 0x25b   :  { %v780_v37 = vadd.f32 %v704_v55, %v634_v11  ;;  %v706_v38 = vpop.f32.mrb[5].mxu0  ;;  %v777_v54 = vpop.f32.mrb[5].mxu1  ;;  %v782_v20 = vadd.f32 %v775_v5, %v636_v33 }
 0x25c   :  { %v781_v31 = vadd.f32 %v706_v38, %v635_v41  ;;  %v783_v56 = vadd.f32 %v777_v54, %v637_v47  ;;  %v6422_v47 = vld [vmem:[#allocation27_spill] sm:$0xff] }
 0x25d   :  { %v4698_v28 = vpop.eup %4697  ;;  %v784_v13 = vmul.f32 0.5, %v780_v37 }
 0x25e   :  { %v788_v17 = vmul.f32 0.5, %v781_v31  ;;  %v632_v0 = vmul.f32 %v4698_v28, %v627_v14  ;;  %v793_v19 = vmul.f32 0.5, %v783_v56  ;;  %v6423_v56 = vld [vmem:[#allocation28_spill] sm:$0xff] }
 0x25f   :  { %4699 = vtanh.f32 %v784_v13 }
 0x260   :  { %4701 = vtanh.f32 %v788_v17  ;;  %866 = vmatprep.mubr.f32.mxu0 %v632_v0  ;;  %937 = vmatprep.mubr.f32.mxu1 %v632_v0  ;;  %v6419_v17 = vld [vmem:[#allocation24_spill] sm:$0xff]  ;;  %v6420_v0 = vld [vmem:[#allocation26_spill] sm:$0xff] }
 0x261   :  { %4703 = vtanh.f32 %v782_v20  ;;  %v6421_v20 = vld [vmem:[#allocation25_spill] sm:$0xff] }
 0x262   :  { %4705 = vtanh.f32 %v793_v19  ;;  %v6424_v19 = vld [vmem:[#allocation30_spill] sm:$0xff] }
 0x269   :  { %v4700_v40 = vpop.eup %4699 }
 0x26a   :  { %v4702_v11 = vpop.eup %4701  ;;  %v786_v55 = vmul.f32 0.5, %v4700_v40  ;;  %v6418_v40 = vld [vmem:[#allocation23_spill] sm:$0xff] }
 0x26b   :  { %v790_v3 = vmul.f32 0.5, %v4702_v11  ;;  %v4704_v38 = vpop.eup %4703  ;;  %v6425_v11 = vld [vmem:[#allocation29_spill] sm:$0xff] }
 0x26c   :  { %v787_v2 = vadd.f32 0.5, %v786_v55  ;;  %v4706_v5 = vpop.eup %4705  ;;  %v6426_v55 = vld [vmem:[#allocation31_spill] sm:$0xff] }
 0x26d   :  { %v791_v41 = vadd.f32 0.5, %v790_v3  ;;  %v795_v33 = vmul.f32 0.5, %v4706_v5  ;;  %v6417_v3 = vld [vmem:[#allocation21_spill] sm:$0xff] }
 0x26e   :  { %v798_v37 = vmul.f32 %v4704_v38, %v787_v2  ;;  %v6427_v2 = vld [vmem:[#allocation32_spill] sm:$0xff]  ;;  %v6428_v38 = vld [vmem:[#allocation34_spill] sm:$0xff]  ;;  %v6432_v5 = vld [vmem:[#allocation37_spill] sm:$0xff] }
 0x26f   :  { %v797_v28 = vmul.f32 %v791_v41, %v5371_v59  ;;  %v796_v31 = vadd.f32 0.5, %v795_v33  ;;  %v6416_v59 = vld [vmem:[#allocation22_spill] sm:$0xff]  ;;  %v6429_v41 = vld [vmem:[#allocation33_spill] sm:$0xff] }
 0x270   :  { %v6433_v33 = vld [vmem:[#allocation38_spill] sm:$0xff] }
 0x271   :  { %v5491_v14 = vadd.f32 %v798_v37, %v797_v28  ;;  %v6430_v37 = vld [vmem:[#allocation35_spill] sm:$0xff]  ;;  %v6431_v28 = vld [vmem:[#allocation36_spill] sm:$0xff] }
 0x273   :  { %4707 = vtanh.f32 %v5491_v14 }
 0x27d   :  { %v4708_v54 = vpop.eup %4707 }
 0x27e   :  { %v801_v13 = vmul.f32 %v4708_v54, %v796_v31  ;;  %v6434_v31 = vld [vmem:[#allocation39_spill] sm:$0xff]  ;;  %v6435_v54 = vld [vmem:[#allocation40_spill] sm:$0xff] }
 0x280   :  { %867 = vmatmul.mubr.f32.vlgmr.msra.gmra.mrb[6].mxu0 %v801_v13  ;;  %938 = vmatmul.mubr.f32.vlgmr.msra.gmra.mrb[6].mxu1 %v801_v13 }
 0x281   :  { %3494 = vmatpush1.bf16.msra.mxu0 %v5079_v8  ;;  %3526 = vmatpush1.bf16.msra.mxu1 %v5089_v18 }
 0x282   :  { %3496 = vmatprep.subr.bf16.mxu0 %v5081_v9  ;;  %3528 = vmatprep.subr.bf16.mxu1 %v5095_v26 }
 0x283   :  { %1031 = vmatprep.mubr.f32.mxu0 %v6358_v4  ;;  %1102 = vmatprep.mubr.f32.mxu1 %v6358_v4 }
 0x285   :  { %3498 = vmatpush1.bf16.msra.mxu0 %v5085_v16  ;;  %3530 = vmatpush1.bf16.msra.mxu1 %v5098_v30 }
 0x286   :  { %3500 = vmatprep.subr.bf16.mxu0 %v5092_v22  ;;  %3532 = vmatprep.subr.bf16.mxu1 %v5107_v39 }
 0x289   :  { %3502 = vmatpush1.bf16.msra.mxu0 %v5101_v32  ;;  %3534 = vmatpush1.bf16.msra.mxu1 %v5110_v44 }
 0x28a   :  { %3504 = vmatprep.subr.bf16.mxu0 %v5105_v36  ;;  %3536 = vmatprep.subr.bf16.mxu1 %v5116_v48 }
 0x28d   :  { %3506 = vmatpush1.bf16.msra.mxu0 %v5113_v46  ;;  %3538 = vmatpush1.bf16.msra.mxu1 %v5122_v57 }
 0x28e   :  { %3508 = vmatprep.subr.bf16.mxu0 %v5119_v51  ;;  %3540 = vmatprep.subr.bf16.mxu1 %v5128_v60 }
 0x291   :  { %3510 = vmatpush1.bf16.msra.mxu0 %v5125_v58  ;;  %3542 = vmatpush1.bf16.msra.mxu1 %v5134_v7 }
 0x292   :  { %3512 = vmatprep.subr.bf16.mxu0 %v5131_v63  ;;  %3544 = vmatprep.subr.bf16.mxu1 %v5140_v12 }
 0x295   :  { %3514 = vmatpush1.bf16.msra.mxu0 %v5137_v10  ;;  %3546 = vmatpush1.bf16.msra.mxu1 %v5146_v25 }
 0x296   :  { %3516 = vmatprep.subr.bf16.mxu0 %v5143_v15  ;;  %3548 = vmatprep.subr.bf16.mxu1 %v5152_v29 }
 0x299   :  { %3518 = vmatpush1.bf16.msra.mxu0 %v5149_v27  ;;  %3550 = vmatpush1.bf16.msra.mxu1 %v5158_v42 }
 0x29a   :  { %3520 = vmatprep.subr.bf16.mxu0 %v5155_v34  ;;  %3552 = vmatprep.subr.bf16.mxu1 %v5164_v45 }
 0x29d   :  { %3522 = vmatpush1.bf16.msra.mxu0 %v5161_v43  ;;  %3554 = vmatpush1.bf16.msra.mxu1 %v5170_v61 }
 0x29e   :  { %3556 = vmatprep.subr.bf16.mxu0 %v5167_v52  ;;  %3620 = vmatprep.subr.bf16.mxu1 %v5174_v62 }
 0x2a0   :  { %1032 = vmatmul.mubr.f32.vlgmr.msra.gmra.mrb[8].mxu0 %v801_v13  ;;  %1103 = vmatmul.mubr.f32.vlgmr.msra.gmra.mrb[8].mxu1 %v801_v13  ;;  %v6436_v13 = vld [vmem:[#allocation41_spill] sm:$0xff] }
 0x2a1   :  { %3558 = vmatpush1.bf16.msra.mxu0 %v5176_v1  ;;  %3622 = vmatpush1.bf16.msra.mxu1 %v5183_v21 }
 0x2a2   :  { %3560 = vmatprep.subr.bf16.mxu0 %v5179_v6  ;;  %3624 = vmatprep.subr.bf16.mxu1 %v5187_v23 }
 0x2a5   :  { %3562 = vmatpush1.bf16.msra.mxu0 %v5189_v24  ;;  %3626 = vmatpush1.bf16.msra.mxu1 %v5197_v49 }
 0x2a6   :  { %3564 = vmatprep.subr.bf16.mxu0 %v5192_v35  ;;  %3628 = vmatprep.subr.bf16.mxu1 %v5202_v50 }
 0x2a9   :  { %3566 = vmatpush1.bf16.msra.mxu0 %v5204_v53  ;;  %3630 = vmatpush1.bf16.msra.mxu1 %v6416_v59 }
 0x2aa   :  { %3568 = vmatprep.subr.bf16.mxu0 %v6417_v3  ;;  %3632 = vmatprep.subr.bf16.mxu1 %v6418_v40 }
 0x2ad   :  { %3570 = vmatpush1.bf16.msra.mxu0 %v6419_v17  ;;  %3634 = vmatpush1.bf16.msra.mxu1 %v6420_v0 }
 0x2ae   :  { %3572 = vmatprep.subr.bf16.mxu0 %v6421_v20  ;;  %3636 = vmatprep.subr.bf16.mxu1 %v6422_v47 }
 0x2b1   :  { %3574 = vmatpush1.bf16.msra.mxu0 %v6423_v56  ;;  %3638 = vmatpush1.bf16.msra.mxu1 %v6424_v19  ;;  %v6472_v56 = vld [vmem:[#allocation75_spill] sm:$0xff] }
 0x2b2   :  { %3576 = vmatprep.subr.bf16.mxu0 %v6425_v11  ;;  %3640 = vmatprep.subr.bf16.mxu1 %v6426_v55  ;;  %v6437_v55 = vld [vmem:[#allocation42_spill] sm:$0xff] }
 0x2b3   :  { %v6471_v11 = vld [vmem:[#allocation74_spill] sm:$0xff] }
 0x2b5   :  { %3578 = vmatpush1.bf16.msra.mxu0 %v6427_v2  ;;  %3642 = vmatpush1.bf16.msra.mxu1 %v6428_v38  ;;  %v6438_v2 = vld [vmem:[#allocation43_spill] sm:$0xff]  ;;  %v6439_v38 = vld [vmem:[#allocation44_spill] sm:$0xff] }
 0x2b6   :  { %3580 = vmatprep.subr.bf16.mxu0 %v6429_v41  ;;  %3644 = vmatprep.subr.bf16.mxu1 %v6430_v37  ;;  %v6440_v41 = vld [vmem:[#allocation45_spill] sm:$0xff]  ;;  %v6441_v37 = vld [vmem:[#allocation46_spill] sm:$0xff] }
 0x2b9   :  { %3582 = vmatpush1.bf16.msra.mxu0 %v6431_v28  ;;  %3646 = vmatpush1.bf16.msra.mxu1 %v6432_v5  ;;  %v6442_v28 = vld [vmem:[#allocation47_spill] sm:$0xff]  ;;  %v6443_v5 = vld [vmem:[#allocation48_spill] sm:$0xff] }
 0x2ba   :  { %3584 = vmatprep.subr.bf16.mxu0 %v6433_v33  ;;  %3648 = vmatprep.subr.bf16.mxu1 %v6434_v31  ;;  %v6444_v33 = vld [vmem:[#allocation49_spill] sm:$0xff]  ;;  %v6445_v31 = vld [vmem:[#allocation50_spill] sm:$0xff] }
 0x2bd   :  { %3586 = vmatpush1.bf16.msra.mxu0 %v6435_v54  ;;  %3650 = vmatpush1.bf16.msra.mxu1 %v6436_v13  ;;  %v6446_v54 = vld [vmem:[#allocation51_spill] sm:$0xff]  ;;  %v6447_v13 = vld [vmem:[#allocation52_spill] sm:$0xff] }
 0x2be   :  { %3588 = vmatprep.subr.bf16.mxu0 %v6437_v55  ;;  %3652 = vmatprep.subr.bf16.mxu1 %v6438_v2  ;;  %v6448_v55 = vld [vmem:[#allocation53_spill] sm:$0xff]  ;;  %v6449_v2 = vld [vmem:[#allocation54_spill] sm:$0xff] }
 0x2c1   :  { %3590 = vmatpush1.bf16.msra.mxu0 %v6439_v38  ;;  %3654 = vmatpush1.bf16.msra.mxu1 %v6440_v41  ;;  %v6450_v38 = vld [vmem:[#allocation55_spill] sm:$0xff]  ;;  %v6451_v41 = vld [vmem:[#allocation56_spill] sm:$0xff] }
 0x2c2   :  { %3592 = vmatprep.subr.bf16.mxu0 %v6441_v37  ;;  %3656 = vmatprep.subr.bf16.mxu1 %v6442_v28  ;;  %v6452_v37 = vld [vmem:[#allocation57_spill] sm:$0xff]  ;;  %v6453_v28 = vld [vmem:[#allocation58_spill] sm:$0xff] }
 0x2c5   :  { %3594 = vmatpush1.bf16.msra.mxu0 %v6443_v5  ;;  %3658 = vmatpush1.bf16.msra.mxu1 %v6444_v33  ;;  %v6454_v5 = vld [vmem:[#allocation59_spill] sm:$0xff]  ;;  %v6455_v33 = vld [vmem:[#allocation60_spill] sm:$0xff] }
 0x2c6   :  { %3596 = vmatprep.subr.bf16.mxu0 %v6445_v31  ;;  %3660 = vmatprep.subr.bf16.mxu1 %v6446_v54  ;;  %v6456_v31 = vld [vmem:[#allocation61_spill] sm:$0xff]  ;;  %v6457_v54 = vld [vmem:[#allocation62_spill] sm:$0xff] }
 0x2c9   :  { %3598 = vmatpush1.bf16.msra.mxu0 %v6447_v13  ;;  %3662 = vmatpush1.bf16.msra.mxu1 %v6448_v55  ;;  %v6458_v13 = vld [vmem:[#allocation63_spill] sm:$0xff]  ;;  %v6459_v55 = vld [vmem:[#allocation64_spill] sm:$0xff] }
 0x2ca   :  { %3600 = vmatprep.subr.bf16.mxu0 %v6449_v2  ;;  %3664 = vmatprep.subr.bf16.mxu1 %v6450_v38  ;;  %v6460_v2 = vld [vmem:[#allocation65_spill] sm:$0xff]  ;;  %v6461_v38 = vld [vmem:[#allocation66_spill] sm:$0xff] }
 0x2cd   :  { %3602 = vmatpush1.bf16.msra.mxu0 %v6451_v41  ;;  %3666 = vmatpush1.bf16.msra.mxu1 %v6452_v37  ;;  %v6462_v41 = vld [vmem:[#allocation67_spill] sm:$0xff]  ;;  %v6463_v37 = vld [vmem:[#allocation68_spill] sm:$0xff] }
 0x2ce   :  { %3604 = vmatprep.subr.bf16.mxu0 %v6453_v28  ;;  %3668 = vmatprep.subr.bf16.mxu1 %v6454_v5  ;;  %v6464_v28 = vld [vmem:[#allocation69_spill] sm:$0xff]  ;;  %v6465_v5 = vld [vmem:[#allocation70_spill] sm:$0xff] }
 0x2d1   :  { %3606 = vmatpush1.bf16.msra.mxu0 %v6455_v33  ;;  %3670 = vmatpush1.bf16.msra.mxu1 %v6456_v31  ;;  %v6466_v33 = vld [vmem:[#allocation71_spill] sm:$0xff]  ;;  %v6467_v31 = vld [vmem:[#allocation72_spill] sm:$0xff] }
 0x2d2   :  { %3608 = vmatprep.subr.bf16.mxu0 %v6457_v54  ;;  %3672 = vmatprep.subr.bf16.mxu1 %v6458_v13  ;;  %v6468_v54 = vld [vmem:[#allocation73_spill] sm:$0xff]  ;;  %v6469_v13 = vld [vmem:[#allocation19_spill] sm:$0xff] }
 0x2d5   :  { %3610 = vmatpush1.bf16.msra.mxu0 %v6459_v55  ;;  %3674 = vmatpush1.bf16.msra.mxu1 %v6460_v2  ;;  %v6470_v55 = vld [vmem:[#allocation20_spill] sm:$0xff] }
 0x2d6   :  { %3612 = vmatprep.subr.bf16.mxu0 %v6461_v38  ;;  %3676 = vmatprep.subr.bf16.mxu1 %v6462_v41 }
 0x2d9   :  { %3614 = vmatpush1.bf16.msra.mxu0 %v6463_v37  ;;  %3678 = vmatpush1.bf16.msra.mxu1 %v6464_v28 }
 0x2da   :  { %3616 = vmatprep.subr.bf16.mxu0 %v6465_v5  ;;  %3680 = vmatprep.subr.bf16.mxu1 %v6466_v33  ;;  %v6473_v33 = vld [vmem:[#allocation76_spill] sm:$0xff] }
 0x2dd   :  { %3618 = vmatpush1.bf16.msra.mxu0 %v6467_v31  ;;  %3682 = vmatpush1.bf16.msra.mxu1 %v6468_v54  ;;  %v6474_v54 = vld [vmem:[#allocation77_spill] sm:$0xff] }
 0x2de   :  { %3684 = vmatprep.subr.bf16.mxu0 %v6469_v13  ;;  %3716 = vmatprep.subr.bf16.mxu1 %v6470_v55 }
 0x353   :  { %v868_v2 = vpop.f32.mrb[6].mxu0  ;;  %v939_v38 = vpop.f32.mrb[6].mxu1 }
 0x354   :  { %v869_v41 = vadd.f32 %v868_v2, %v6471_v11  ;;  %v870_v19 = vpop.f32.mrb[7].mxu0  ;;  %v941_v37 = vpop.f32.mrb[7].mxu1  ;;  %v940_v20 = vadd.f32 %v939_v38, %v6473_v33  ;;  %v963_v38 = vld [vmem:[#allocation6 + $0x40] sm:$0xff] }
 0x355   :  { %v871_v28 = vadd.f32 %v870_v19, %v6472_v56  ;;  %v942_v31 = vadd.f32 %v941_v37, %v6474_v54  ;;  %v6475_v19 = vld [vmem:[#allocation78_spill] sm:$0xff]  ;;  %v964_v37 = vld [vmem:[#allocation6 + $0x48] sm:$0xff] }
 0x356   :  { %v944_v47 = vmul.f32 0.5, %v869_v41 }
 0x357   :  { %v948_v5 = vmul.f32 0.5, %v871_v28  ;;  %v953_v13 = vmul.f32 0.5, %v942_v31 }
 0x358   :  { %4709 = vtanh.f32 %v944_v47 }
 0x359   :  { %4711 = vtanh.f32 %v948_v5 }
 0x35a   :  { %4713 = vtanh.f32 %v940_v20 }
 0x35b   :  { %4715 = vtanh.f32 %v953_v13 }
 0x362   :  { %v4710_v0 = vpop.eup %4709 }
 0x363   :  { %v4712_v55 = vpop.eup %4711  ;;  %v946_v17 = vmul.f32 0.5, %v4710_v0 }
 0x364   :  { %v950_v40 = vmul.f32 0.5, %v4712_v55  ;;  %v4714_v11 = vpop.eup %4713 }
 0x365   :  { %v947_v2 = vadd.f32 0.5, %v946_v17  ;;  %v4716_v47 = vpop.eup %4715  ;;  %v965_v17 = vld [vmem:[#allocation6 + $0x50] sm:$0xff] }
 0x366   :  { %v951_v3 = vadd.f32 0.5, %v950_v40  ;;  %v955_v20 = vmul.f32 0.5, %v4716_v47 }
 0x367   :  { %v958_v59 = vmul.f32 %v4714_v11, %v947_v2 }
 0x368   :  { %v957_v41 = vmul.f32 %v951_v3, %v6475_v19  ;;  %v956_v13 = vadd.f32 0.5, %v955_v20  ;;  %v966_v19 = vld [vmem:[#allocation6 + $0x58] sm:$0xff] }
 0x36a   :  { %v5597_v28 = vadd.f32 %v958_v59, %v957_v41 }
 0x36c   :  { %6476 = vst [vmem:[#allocation78_spill] sm:$0xff] %v5597_v28  ;;  %4717 = vtanh.f32 %v5597_v28 }
 0x373   :  { %v1033_v5 = vpop.f32.mrb[8].mxu0  ;;  %v1104_v31 = vpop.f32.mrb[8].mxu1 }
 0x374   :  { %v1109_v54 = vadd.f32 %v1033_v5, %v963_v38  ;;  %v1035_v0 = vpop.f32.mrb[9].mxu0  ;;  %v1106_v55 = vpop.f32.mrb[9].mxu1  ;;  %v1111_v59 = vadd.f32 %v1104_v31, %v965_v17 }
 0x375   :  { %v1110_v33 = vadd.f32 %v1035_v0, %v964_v37  ;;  %v1112_v41 = vadd.f32 %v1106_v55, %v966_v19  ;;  %v6483_v19 = vld [vmem:[#allocation27_spill] sm:$0xff] }
 0x376   :  { %v4718_v40 = vpop.eup %4717  ;;  %v1113_v11 = vmul.f32 0.5, %v1109_v54 }
 0x377   :  { %v1117_v2 = vmul.f32 0.5, %v1110_v33  ;;  %v961_v3 = vmul.f32 %v4718_v40, %v956_v13  ;;  %v1122_v47 = vmul.f32 0.5, %v1112_v41  ;;  %v6484_v41 = vld [vmem:[#allocation28_spill] sm:$0xff] }
 0x378   :  { %4719 = vtanh.f32 %v1113_v11 }
 0x379   :  { %4721 = vtanh.f32 %v1117_v2  ;;  %1195 = vmatprep.mubr.f32.mxu0 %v961_v3  ;;  %1266 = vmatprep.mubr.f32.mxu1 %v961_v3  ;;  %v6480_v2 = vld [vmem:[#allocation24_spill] sm:$0xff]  ;;  %v6481_v3 = vld [vmem:[#allocation26_spill] sm:$0xff] }
 0x37a   :  { %4723 = vtanh.f32 %v1111_v59  ;;  %v6482_v59 = vld [vmem:[#allocation25_spill] sm:$0xff] }
 0x37b   :  { %4725 = vtanh.f32 %v1122_v47  ;;  %v6485_v47 = vld [vmem:[#allocation30_spill] sm:$0xff] }
 0x382   :  { %v4720_v28 = vpop.eup %4719 }
 0x383   :  { %v4722_v38 = vpop.eup %4721  ;;  %v1115_v5 = vmul.f32 0.5, %v4720_v28  ;;  %v6479_v28 = vld [vmem:[#allocation23_spill] sm:$0xff] }
 0x384   :  { %v1119_v56 = vmul.f32 0.5, %v4722_v38  ;;  %v4724_v37 = vpop.eup %4723  ;;  %v6486_v38 = vld [vmem:[#allocation29_spill] sm:$0xff] }
 0x385   :  { %v1116_v20 = vadd.f32 0.5, %v1115_v5  ;;  %v4726_v31 = vpop.eup %4725  ;;  %v6487_v5 = vld [vmem:[#allocation31_spill] sm:$0xff] }
 0x386   :  { %v1120_v0 = vadd.f32 0.5, %v1119_v56  ;;  %v1124_v17 = vmul.f32 0.5, %v4726_v31  ;;  %v6478_v56 = vld [vmem:[#allocation21_spill] sm:$0xff] }
 0x387   :  { %v1127_v54 = vmul.f32 %v4724_v37, %v1116_v20  ;;  %v6488_v20 = vld [vmem:[#allocation32_spill] sm:$0xff]  ;;  %v6489_v37 = vld [vmem:[#allocation34_spill] sm:$0xff]  ;;  %v6493_v31 = vld [vmem:[#allocation37_spill] sm:$0xff] }
 0x388   :  { %v1126_v33 = vmul.f32 %v1120_v0, %v5491_v14  ;;  %v1125_v40 = vadd.f32 0.5, %v1124_v17  ;;  %v6477_v14 = vld [vmem:[#allocation22_spill] sm:$0xff]  ;;  %v6490_v0 = vld [vmem:[#allocation33_spill] sm:$0xff] }
 0x389   :  { %v6494_v17 = vld [vmem:[#allocation38_spill] sm:$0xff] }
 0x38a   :  { %v5601_v13 = vadd.f32 %v1127_v54, %v1126_v33  ;;  %v6491_v54 = vld [vmem:[#allocation35_spill] sm:$0xff]  ;;  %v6492_v33 = vld [vmem:[#allocation36_spill] sm:$0xff] }
 0x38c   :  { %4727 = vtanh.f32 %v5601_v13 }
 0x396   :  { %v4728_v55 = vpop.eup %4727 }
 0x397   :  { %v1130_v11 = vmul.f32 %v4728_v55, %v1125_v40  ;;  %v6495_v40 = vld [vmem:[#allocation39_spill] sm:$0xff]  ;;  %v6496_v55 = vld [vmem:[#allocation40_spill] sm:$0xff] }
 0x399   :  { %1196 = vmatmul.mubr.f32.vlgmr.msra.gmra.mrb[10].mxu0 %v1130_v11  ;;  %1267 = vmatmul.mubr.f32.vlgmr.msra.gmra.mrb[10].mxu1 %v1130_v11 }
 0x39a   :  { %3686 = vmatpush1.bf16.msra.mxu0 %v5079_v8  ;;  %3718 = vmatpush1.bf16.msra.mxu1 %v5089_v18 }
 0x39b   :  { %3688 = vmatprep.subr.bf16.mxu0 %v5081_v9  ;;  %3720 = vmatprep.subr.bf16.mxu1 %v5095_v26 }
 0x39c   :  { %1360 = vmatprep.mubr.f32.mxu0 %v6358_v4  ;;  %1431 = vmatprep.mubr.f32.mxu1 %v6358_v4 }
 0x39e   :  { %3690 = vmatpush1.bf16.msra.mxu0 %v5085_v16  ;;  %3722 = vmatpush1.bf16.msra.mxu1 %v5098_v30 }
 0x39f   :  { %3692 = vmatprep.subr.bf16.mxu0 %v5092_v22  ;;  %3724 = vmatprep.subr.bf16.mxu1 %v5107_v39 }
 0x3a2   :  { %3694 = vmatpush1.bf16.msra.mxu0 %v5101_v32  ;;  %3726 = vmatpush1.bf16.msra.mxu1 %v5110_v44 }
 0x3a3   :  { %3696 = vmatprep.subr.bf16.mxu0 %v5105_v36  ;;  %3728 = vmatprep.subr.bf16.mxu1 %v5116_v48 }
 0x3a6   :  { %3698 = vmatpush1.bf16.msra.mxu0 %v5113_v46  ;;  %3730 = vmatpush1.bf16.msra.mxu1 %v5122_v57 }
 0x3a7   :  { %3700 = vmatprep.subr.bf16.mxu0 %v5119_v51  ;;  %3732 = vmatprep.subr.bf16.mxu1 %v5128_v60 }
 0x3aa   :  { %3702 = vmatpush1.bf16.msra.mxu0 %v5125_v58  ;;  %3734 = vmatpush1.bf16.msra.mxu1 %v5134_v7 }
 0x3ab   :  { %3704 = vmatprep.subr.bf16.mxu0 %v5131_v63  ;;  %3736 = vmatprep.subr.bf16.mxu1 %v5140_v12 }
 0x3ae   :  { %3706 = vmatpush1.bf16.msra.mxu0 %v5137_v10  ;;  %3738 = vmatpush1.bf16.msra.mxu1 %v5146_v25 }
 0x3af   :  { %3708 = vmatprep.subr.bf16.mxu0 %v5143_v15  ;;  %3740 = vmatprep.subr.bf16.mxu1 %v5152_v29 }
 0x3b2   :  { %3710 = vmatpush1.bf16.msra.mxu0 %v5149_v27  ;;  %3742 = vmatpush1.bf16.msra.mxu1 %v5158_v42 }
 0x3b3   :  { %3712 = vmatprep.subr.bf16.mxu0 %v5155_v34  ;;  %3744 = vmatprep.subr.bf16.mxu1 %v5164_v45 }
 0x3b6   :  { %3714 = vmatpush1.bf16.msra.mxu0 %v5161_v43  ;;  %3746 = vmatpush1.bf16.msra.mxu1 %v5170_v61 }
 0x3b7   :  { %3748 = vmatprep.subr.bf16.mxu0 %v5167_v52  ;;  %3812 = vmatprep.subr.bf16.mxu1 %v5174_v62 }
 0x3b9   :  { %1361 = vmatmul.mubr.f32.vlgmr.msra.gmra.mrb[12].mxu0 %v1130_v11  ;;  %1432 = vmatmul.mubr.f32.vlgmr.msra.gmra.mrb[12].mxu1 %v1130_v11  ;;  %v6497_v11 = vld [vmem:[#allocation41_spill] sm:$0xff] }
 0x3ba   :  { %3750 = vmatpush1.bf16.msra.mxu0 %v5176_v1  ;;  %3814 = vmatpush1.bf16.msra.mxu1 %v5183_v21 }
 0x3bb   :  { %3752 = vmatprep.subr.bf16.mxu0 %v5179_v6  ;;  %3816 = vmatprep.subr.bf16.mxu1 %v5187_v23 }
 0x3be   :  { %3754 = vmatpush1.bf16.msra.mxu0 %v5189_v24  ;;  %3818 = vmatpush1.bf16.msra.mxu1 %v5197_v49 }
 0x3bf   :  { %3756 = vmatprep.subr.bf16.mxu0 %v5192_v35  ;;  %3820 = vmatprep.subr.bf16.mxu1 %v5202_v50 }
 0x3c2   :  { %3758 = vmatpush1.bf16.msra.mxu0 %v5204_v53  ;;  %3822 = vmatpush1.bf16.msra.mxu1 %v6477_v14 }
 0x3c3   :  { %3760 = vmatprep.subr.bf16.mxu0 %v6478_v56  ;;  %3824 = vmatprep.subr.bf16.mxu1 %v6479_v28 }
 0x3c6   :  { %3762 = vmatpush1.bf16.msra.mxu0 %v6480_v2  ;;  %3826 = vmatpush1.bf16.msra.mxu1 %v6481_v3 }
 0x3c7   :  { %3764 = vmatprep.subr.bf16.mxu0 %v6482_v59  ;;  %3828 = vmatprep.subr.bf16.mxu1 %v6483_v19 }
 0x3ca   :  { %3766 = vmatpush1.bf16.msra.mxu0 %v6484_v41  ;;  %3830 = vmatpush1.bf16.msra.mxu1 %v6485_v47  ;;  %v6533_v41 = vld [vmem:[#allocation75_spill] sm:$0xff] }
 0x3cb   :  { %3768 = vmatprep.subr.bf16.mxu0 %v6486_v38  ;;  %3832 = vmatprep.subr.bf16.mxu1 %v6487_v5  ;;  %v6498_v5 = vld [vmem:[#allocation42_spill] sm:$0xff] }
 0x3cc   :  { %v6532_v38 = vld [vmem:[#allocation74_spill] sm:$0xff] }
 0x3ce   :  { %3770 = vmatpush1.bf16.msra.mxu0 %v6488_v20  ;;  %3834 = vmatpush1.bf16.msra.mxu1 %v6489_v37  ;;  %v6499_v20 = vld [vmem:[#allocation43_spill] sm:$0xff]  ;;  %v6500_v37 = vld [vmem:[#allocation44_spill] sm:$0xff] }
 0x3cf   :  { %3772 = vmatprep.subr.bf16.mxu0 %v6490_v0  ;;  %3836 = vmatprep.subr.bf16.mxu1 %v6491_v54  ;;  %v6501_v0 = vld [vmem:[#allocation45_spill] sm:$0xff]  ;;  %v6502_v54 = vld [vmem:[#allocation46_spill] sm:$0xff] }
 0x3d2   :  { %3774 = vmatpush1.bf16.msra.mxu0 %v6492_v33  ;;  %3838 = vmatpush1.bf16.msra.mxu1 %v6493_v31  ;;  %v6503_v33 = vld [vmem:[#allocation47_spill] sm:$0xff]  ;;  %v6504_v31 = vld [vmem:[#allocation48_spill] sm:$0xff] }
 0x3d3   :  { %3776 = vmatprep.subr.bf16.mxu0 %v6494_v17  ;;  %3840 = vmatprep.subr.bf16.mxu1 %v6495_v40  ;;  %v6505_v17 = vld [vmem:[#allocation49_spill] sm:$0xff]  ;;  %v6506_v40 = vld [vmem:[#allocation50_spill] sm:$0xff] }
 0x3d6   :  { %3778 = vmatpush1.bf16.msra.mxu0 %v6496_v55  ;;  %3842 = vmatpush1.bf16.msra.mxu1 %v6497_v11  ;;  %v6507_v55 = vld [vmem:[#allocation51_spill] sm:$0xff]  ;;  %v6508_v11 = vld [vmem:[#allocation52_spill] sm:$0xff] }
 0x3d7   :  { %3780 = vmatprep.subr.bf16.mxu0 %v6498_v5  ;;  %3844 = vmatprep.subr.bf16.mxu1 %v6499_v20  ;;  %v6509_v5 = vld [vmem:[#allocation53_spill] sm:$0xff]  ;;  %v6510_v20 = vld [vmem:[#allocation54_spill] sm:$0xff] }
 0x3da   :  { %3782 = vmatpush1.bf16.msra.mxu0 %v6500_v37  ;;  %3846 = vmatpush1.bf16.msra.mxu1 %v6501_v0  ;;  %v6511_v37 = vld [vmem:[#allocation55_spill] sm:$0xff]  ;;  %v6512_v0 = vld [vmem:[#allocation56_spill] sm:$0xff] }
 0x3db   :  { %3784 = vmatprep.subr.bf16.mxu0 %v6502_v54  ;;  %3848 = vmatprep.subr.bf16.mxu1 %v6503_v33  ;;  %v6513_v54 = vld [vmem:[#allocation57_spill] sm:$0xff]  ;;  %v6514_v33 = vld [vmem:[#allocation58_spill] sm:$0xff] }
 0x3de   :  { %3786 = vmatpush1.bf16.msra.mxu0 %v6504_v31  ;;  %3850 = vmatpush1.bf16.msra.mxu1 %v6505_v17  ;;  %v6515_v31 = vld [vmem:[#allocation59_spill] sm:$0xff]  ;;  %v6516_v17 = vld [vmem:[#allocation60_spill] sm:$0xff] }
 0x3df   :  { %3788 = vmatprep.subr.bf16.mxu0 %v6506_v40  ;;  %3852 = vmatprep.subr.bf16.mxu1 %v6507_v55  ;;  %v6517_v40 = vld [vmem:[#allocation61_spill] sm:$0xff]  ;;  %v6518_v55 = vld [vmem:[#allocation62_spill] sm:$0xff] }
 0x3e2   :  { %3790 = vmatpush1.bf16.msra.mxu0 %v6508_v11  ;;  %3854 = vmatpush1.bf16.msra.mxu1 %v6509_v5  ;;  %v6519_v11 = vld [vmem:[#allocation63_spill] sm:$0xff]  ;;  %v6520_v5 = vld [vmem:[#allocation64_spill] sm:$0xff] }
 0x3e3   :  { %3792 = vmatprep.subr.bf16.mxu0 %v6510_v20  ;;  %3856 = vmatprep.subr.bf16.mxu1 %v6511_v37  ;;  %v6521_v20 = vld [vmem:[#allocation65_spill] sm:$0xff]  ;;  %v6522_v37 = vld [vmem:[#allocation66_spill] sm:$0xff] }
 0x3e6   :  { %3794 = vmatpush1.bf16.msra.mxu0 %v6512_v0  ;;  %3858 = vmatpush1.bf16.msra.mxu1 %v6513_v54  ;;  %v6523_v0 = vld [vmem:[#allocation67_spill] sm:$0xff]  ;;  %v6524_v54 = vld [vmem:[#allocation68_spill] sm:$0xff] }
 0x3e7   :  { %3796 = vmatprep.subr.bf16.mxu0 %v6514_v33  ;;  %3860 = vmatprep.subr.bf16.mxu1 %v6515_v31  ;;  %v6525_v33 = vld [vmem:[#allocation69_spill] sm:$0xff]  ;;  %v6526_v31 = vld [vmem:[#allocation70_spill] sm:$0xff] }
 0x3ea   :  { %3798 = vmatpush1.bf16.msra.mxu0 %v6516_v17  ;;  %3862 = vmatpush1.bf16.msra.mxu1 %v6517_v40  ;;  %v6527_v17 = vld [vmem:[#allocation71_spill] sm:$0xff]  ;;  %v6528_v40 = vld [vmem:[#allocation72_spill] sm:$0xff] }
 0x3eb   :  { %3800 = vmatprep.subr.bf16.mxu0 %v6518_v55  ;;  %3864 = vmatprep.subr.bf16.mxu1 %v6519_v11  ;;  %v6529_v55 = vld [vmem:[#allocation73_spill] sm:$0xff]  ;;  %v6530_v11 = vld [vmem:[#allocation19_spill] sm:$0xff] }
 0x3ee   :  { %3802 = vmatpush1.bf16.msra.mxu0 %v6520_v5  ;;  %3866 = vmatpush1.bf16.msra.mxu1 %v6521_v20  ;;  %v6531_v5 = vld [vmem:[#allocation20_spill] sm:$0xff] }
 0x3ef   :  { %3804 = vmatprep.subr.bf16.mxu0 %v6522_v37  ;;  %3868 = vmatprep.subr.bf16.mxu1 %v6523_v0 }
 0x3f2   :  { %3806 = vmatpush1.bf16.msra.mxu0 %v6524_v54  ;;  %3870 = vmatpush1.bf16.msra.mxu1 %v6525_v33 }
 0x3f3   :  { %3808 = vmatprep.subr.bf16.mxu0 %v6526_v31  ;;  %3872 = vmatprep.subr.bf16.mxu1 %v6527_v17  ;;  %v6534_v17 = vld [vmem:[#allocation76_spill] sm:$0xff] }
 0x3f6   :  { %3810 = vmatpush1.bf16.msra.mxu0 %v6528_v40  ;;  %3874 = vmatpush1.bf16.msra.mxu1 %v6529_v55  ;;  %v6535_v55 = vld [vmem:[#allocation77_spill] sm:$0xff] }
 0x3f7   :  { %3876 = vmatprep.subr.bf16.mxu0 %v6530_v11  ;;  %3908 = vmatprep.subr.bf16.mxu1 %v6531_v5 }
 0x46c   :  { %v1197_v20 = vpop.f32.mrb[10].mxu0  ;;  %v1268_v37 = vpop.f32.mrb[10].mxu1 }
 0x46d   :  { %v1198_v0 = vadd.f32 %v1197_v20, %v6532_v38  ;;  %v1199_v47 = vpop.f32.mrb[11].mxu0  ;;  %v1270_v54 = vpop.f32.mrb[11].mxu1  ;;  %v1269_v59 = vadd.f32 %v1268_v37, %v6534_v17  ;;  %v1292_v37 = vld [vmem:[#allocation6 + $0x60] sm:$0xff] }
 0x46e   :  { %v1200_v33 = vadd.f32 %v1199_v47, %v6533_v41  ;;  %v1271_v40 = vadd.f32 %v1270_v54, %v6535_v55  ;;  %v6536_v47 = vld [vmem:[#allocation78_spill] sm:$0xff]  ;;  %v1293_v54 = vld [vmem:[#allocation6 + $0x68] sm:$0xff] }
 0x46f   :  { %v1273_v19 = vmul.f32 0.5, %v1198_v0 }
 0x470   :  { %v1277_v31 = vmul.f32 0.5, %v1200_v33  ;;  %v1282_v11 = vmul.f32 0.5, %v1271_v40 }
 0x471   :  { %4729 = vtanh.f32 %v1273_v19 }
 0x472   :  { %4731 = vtanh.f32 %v1277_v31 }
 0x473   :  { %4733 = vtanh.f32 %v1269_v59 }
 0x474   :  { %4735 = vtanh.f32 %v1282_v11 }
 0x47b   :  { %v4730_v3 = vpop.eup %4729 }
 0x47c   :  { %v4732_v5 = vpop.eup %4731  ;;  %v1275_v2 = vmul.f32 0.5, %v4730_v3 }
 0x47d   :  { %v1279_v28 = vmul.f32 0.5, %v4732_v5  ;;  %v4734_v38 = vpop.eup %4733 }
 0x47e   :  { %v1276_v20 = vadd.f32 0.5, %v1275_v2  ;;  %v4736_v19 = vpop.eup %4735  ;;  %v1294_v2 = vld [vmem:[#allocation6 + $0x70] sm:$0xff] }
 0x47f   :  { %v1280_v56 = vadd.f32 0.5, %v1279_v28  ;;  %v1284_v59 = vmul.f32 0.5, %v4736_v19 }
 0x480   :  { %v1287_v14 = vmul.f32 %v4734_v38, %v1276_v20 }
 0x481   :  { %v1286_v0 = vmul.f32 %v1280_v56, %v6536_v47  ;;  %v1285_v11 = vadd.f32 0.5, %v1284_v59  ;;  %v1295_v47 = vld [vmem:[#allocation6 + $0x78] sm:$0xff] }
 0x483   :  { %v5707_v33 = vadd.f32 %v1287_v14, %v1286_v0 }
 0x485   :  { %6537 = vst [vmem:[#allocation78_spill] sm:$0xff] %v5707_v33  ;;  %4737 = vtanh.f32 %v5707_v33 }
 0x48c   :  { %v1362_v31 = vpop.f32.mrb[12].mxu0  ;;  %v1433_v40 = vpop.f32.mrb[12].mxu1 }
 0x48d   :  { %v1438_v55 = vadd.f32 %v1362_v31, %v1292_v37  ;;  %v1364_v3 = vpop.f32.mrb[13].mxu0  ;;  %v1435_v5 = vpop.f32.mrb[13].mxu1  ;;  %v1440_v14 = vadd.f32 %v1433_v40, %v1294_v2 }
 0x48e   :  { %v1439_v17 = vadd.f32 %v1364_v3, %v1293_v54  ;;  %v1441_v0 = vadd.f32 %v1435_v5, %v1295_v47  ;;  %v6544_v47 = vld [vmem:[#allocation27_spill] sm:$0xff] }
 0x48f   :  { %v4738_v28 = vpop.eup %4737  ;;  %v1442_v38 = vmul.f32 0.5, %v1438_v55 }
 0x490   :  { %v1446_v20 = vmul.f32 0.5, %v1439_v17  ;;  %v1290_v56 = vmul.f32 %v4738_v28, %v1285_v11  ;;  %v1451_v19 = vmul.f32 0.5, %v1441_v0  ;;  %v6545_v0 = vld [vmem:[#allocation28_spill] sm:$0xff] }
 0x491   :  { %4739 = vtanh.f32 %v1442_v38 }
 0x492   :  { %4741 = vtanh.f32 %v1446_v20  ;;  %1524 = vmatprep.mubr.f32.mxu0 %v1290_v56  ;;  %1595 = vmatprep.mubr.f32.mxu1 %v1290_v56  ;;  %v6541_v20 = vld [vmem:[#allocation24_spill] sm:$0xff]  ;;  %v6542_v56 = vld [vmem:[#allocation26_spill] sm:$0xff] }
 0x493   :  { %4743 = vtanh.f32 %v1440_v14  ;;  %v6543_v14 = vld [vmem:[#allocation25_spill] sm:$0xff] }
 0x494   :  { %4745 = vtanh.f32 %v1451_v19  ;;  %v6546_v19 = vld [vmem:[#allocation30_spill] sm:$0xff] }
 0x49b   :  { %v4740_v33 = vpop.eup %4739 }
 0x49c   :  { %v4742_v37 = vpop.eup %4741  ;;  %v1444_v31 = vmul.f32 0.5, %v4740_v33  ;;  %v6540_v33 = vld [vmem:[#allocation23_spill] sm:$0xff] }
 0x49d   :  { %v1448_v41 = vmul.f32 0.5, %v4742_v37  ;;  %v4744_v54 = vpop.eup %4743  ;;  %v6547_v37 = vld [vmem:[#allocation29_spill] sm:$0xff] }
 0x49e   :  { %v1445_v59 = vadd.f32 0.5, %v1444_v31  ;;  %v4746_v40 = vpop.eup %4745  ;;  %v6548_v31 = vld [vmem:[#allocation31_spill] sm:$0xff] }
 0x49f   :  { %v1449_v3 = vadd.f32 0.5, %v1448_v41  ;;  %v1453_v2 = vmul.f32 0.5, %v4746_v40  ;;  %v6539_v41 = vld [vmem:[#allocation21_spill] sm:$0xff] }
 0x4a0   :  { %v1456_v55 = vmul.f32 %v4744_v54, %v1445_v59  ;;  %v6549_v59 = vld [vmem:[#allocation32_spill] sm:$0xff]  ;;  %v6550_v54 = vld [vmem:[#allocation34_spill] sm:$0xff]  ;;  %v6554_v40 = vld [vmem:[#allocation37_spill] sm:$0xff] }
 0x4a1   :  { %v1455_v17 = vmul.f32 %v1449_v3, %v5601_v13  ;;  %v1454_v28 = vadd.f32 0.5, %v1453_v2  ;;  %v6538_v13 = vld [vmem:[#allocation22_spill] sm:$0xff]  ;;  %v6551_v3 = vld [vmem:[#allocation33_spill] sm:$0xff] }
 0x4a2   :  { %v6555_v2 = vld [vmem:[#allocation38_spill] sm:$0xff] }
 0x4a3   :  { %v5711_v11 = vadd.f32 %v1456_v55, %v1455_v17  ;;  %v6552_v55 = vld [vmem:[#allocation35_spill] sm:$0xff]  ;;  %v6553_v17 = vld [vmem:[#allocation36_spill] sm:$0xff] }
 0x4a5   :  { %4747 = vtanh.f32 %v5711_v11 }
 0x4af   :  { %v4748_v5 = vpop.eup %4747 }
 0x4b0   :  { %v1459_v38 = vmul.f32 %v4748_v5, %v1454_v28  ;;  %v6556_v28 = vld [vmem:[#allocation39_spill] sm:$0xff]  ;;  %v6557_v5 = vld [vmem:[#allocation40_spill] sm:$0xff] }
 0x4b2   :  { %1525 = vmatmul.mubr.f32.vlgmr.msra.gmra.mrb[14].mxu0 %v1459_v38  ;;  %1596 = vmatmul.mubr.f32.vlgmr.msra.gmra.mrb[14].mxu1 %v1459_v38 }
 0x4b3   :  { %3878 = vmatpush1.bf16.msra.mxu0 %v5079_v8  ;;  %3910 = vmatpush1.bf16.msra.mxu1 %v5089_v18 }
 0x4b4   :  { %3880 = vmatprep.subr.bf16.mxu0 %v5081_v9  ;;  %3912 = vmatprep.subr.bf16.mxu1 %v5095_v26 }
 0x4b5   :  { %1689 = vmatprep.mubr.f32.mxu0 %v6358_v4  ;;  %1760 = vmatprep.mubr.f32.mxu1 %v6358_v4 }
 0x4b7   :  { %3882 = vmatpush1.bf16.msra.mxu0 %v5085_v16  ;;  %3914 = vmatpush1.bf16.msra.mxu1 %v5098_v30 }
 0x4b8   :  { %3884 = vmatprep.subr.bf16.mxu0 %v5092_v22  ;;  %3916 = vmatprep.subr.bf16.mxu1 %v5107_v39 }
 0x4bb   :  { %3886 = vmatpush1.bf16.msra.mxu0 %v5101_v32  ;;  %3918 = vmatpush1.bf16.msra.mxu1 %v5110_v44 }
 0x4bc   :  { %3888 = vmatprep.subr.bf16.mxu0 %v5105_v36  ;;  %3920 = vmatprep.subr.bf16.mxu1 %v5116_v48 }
 0x4bf   :  { %3890 = vmatpush1.bf16.msra.mxu0 %v5113_v46  ;;  %3922 = vmatpush1.bf16.msra.mxu1 %v5122_v57 }
 0x4c0   :  { %3892 = vmatprep.subr.bf16.mxu0 %v5119_v51  ;;  %3924 = vmatprep.subr.bf16.mxu1 %v5128_v60 }
 0x4c3   :  { %3894 = vmatpush1.bf16.msra.mxu0 %v5125_v58  ;;  %3926 = vmatpush1.bf16.msra.mxu1 %v5134_v7 }
 0x4c4   :  { %3896 = vmatprep.subr.bf16.mxu0 %v5131_v63  ;;  %3928 = vmatprep.subr.bf16.mxu1 %v5140_v12 }
 0x4c7   :  { %3898 = vmatpush1.bf16.msra.mxu0 %v5137_v10  ;;  %3930 = vmatpush1.bf16.msra.mxu1 %v5146_v25 }
 0x4c8   :  { %3900 = vmatprep.subr.bf16.mxu0 %v5143_v15  ;;  %3932 = vmatprep.subr.bf16.mxu1 %v5152_v29 }
 0x4cb   :  { %3902 = vmatpush1.bf16.msra.mxu0 %v5149_v27  ;;  %3934 = vmatpush1.bf16.msra.mxu1 %v5158_v42 }
 0x4cc   :  { %3904 = vmatprep.subr.bf16.mxu0 %v5155_v34  ;;  %3936 = vmatprep.subr.bf16.mxu1 %v5164_v45 }
 0x4cf   :  { %3906 = vmatpush1.bf16.msra.mxu0 %v5161_v43  ;;  %3938 = vmatpush1.bf16.msra.mxu1 %v5170_v61 }
 0x4d0   :  { %3940 = vmatprep.subr.bf16.mxu0 %v5167_v52  ;;  %4004 = vmatprep.subr.bf16.mxu1 %v5174_v62 }
 0x4d2   :  { %1690 = vmatmul.mubr.f32.vlgmr.msra.gmra.mrb[16].mxu0 %v1459_v38  ;;  %1761 = vmatmul.mubr.f32.vlgmr.msra.gmra.mrb[16].mxu1 %v1459_v38  ;;  %v6558_v38 = vld [vmem:[#allocation41_spill] sm:$0xff] }
 0x4d3   :  { %3942 = vmatpush1.bf16.msra.mxu0 %v5176_v1  ;;  %4006 = vmatpush1.bf16.msra.mxu1 %v5183_v21 }
 0x4d4   :  { %3944 = vmatprep.subr.bf16.mxu0 %v5179_v6  ;;  %4008 = vmatprep.subr.bf16.mxu1 %v5187_v23 }
 0x4d7   :  { %3946 = vmatpush1.bf16.msra.mxu0 %v5189_v24  ;;  %4010 = vmatpush1.bf16.msra.mxu1 %v5197_v49 }
 0x4d8   :  { %3948 = vmatprep.subr.bf16.mxu0 %v5192_v35  ;;  %4012 = vmatprep.subr.bf16.mxu1 %v5202_v50 }
 0x4db   :  { %3950 = vmatpush1.bf16.msra.mxu0 %v5204_v53  ;;  %4014 = vmatpush1.bf16.msra.mxu1 %v6538_v13 }
 0x4dc   :  { %3952 = vmatprep.subr.bf16.mxu0 %v6539_v41  ;;  %4016 = vmatprep.subr.bf16.mxu1 %v6540_v33 }
 0x4df   :  { %3954 = vmatpush1.bf16.msra.mxu0 %v6541_v20  ;;  %4018 = vmatpush1.bf16.msra.mxu1 %v6542_v56 }
 0x4e0   :  { %3956 = vmatprep.subr.bf16.mxu0 %v6543_v14  ;;  %4020 = vmatprep.subr.bf16.mxu1 %v6544_v47 }
 0x4e3   :  { %3958 = vmatpush1.bf16.msra.mxu0 %v6545_v0  ;;  %4022 = vmatpush1.bf16.msra.mxu1 %v6546_v19  ;;  %v6594_v0 = vld [vmem:[#allocation75_spill] sm:$0xff] }
 0x4e4   :  { %3960 = vmatprep.subr.bf16.mxu0 %v6547_v37  ;;  %4024 = vmatprep.subr.bf16.mxu1 %v6548_v31  ;;  %v6559_v31 = vld [vmem:[#allocation42_spill] sm:$0xff] }
 0x4e5   :  { %v6593_v37 = vld [vmem:[#allocation74_spill] sm:$0xff] }
 0x4e7   :  { %3962 = vmatpush1.bf16.msra.mxu0 %v6549_v59  ;;  %4026 = vmatpush1.bf16.msra.mxu1 %v6550_v54  ;;  %v6560_v59 = vld [vmem:[#allocation43_spill] sm:$0xff]  ;;  %v6561_v54 = vld [vmem:[#allocation44_spill] sm:$0xff] }
 0x4e8   :  { %3964 = vmatprep.subr.bf16.mxu0 %v6551_v3  ;;  %4028 = vmatprep.subr.bf16.mxu1 %v6552_v55  ;;  %v6562_v3 = vld [vmem:[#allocation45_spill] sm:$0xff]  ;;  %v6563_v55 = vld [vmem:[#allocation46_spill] sm:$0xff] }
 0x4eb   :  { %3966 = vmatpush1.bf16.msra.mxu0 %v6553_v17  ;;  %4030 = vmatpush1.bf16.msra.mxu1 %v6554_v40  ;;  %v6564_v17 = vld [vmem:[#allocation47_spill] sm:$0xff]  ;;  %v6565_v40 = vld [vmem:[#allocation48_spill] sm:$0xff] }
 0x4ec   :  { %3968 = vmatprep.subr.bf16.mxu0 %v6555_v2  ;;  %4032 = vmatprep.subr.bf16.mxu1 %v6556_v28  ;;  %v6566_v2 = vld [vmem:[#allocation49_spill] sm:$0xff]  ;;  %v6567_v28 = vld [vmem:[#allocation50_spill] sm:$0xff] }
 0x4ef   :  { %3970 = vmatpush1.bf16.msra.mxu0 %v6557_v5  ;;  %4034 = vmatpush1.bf16.msra.mxu1 %v6558_v38  ;;  %v6568_v5 = vld [vmem:[#allocation51_spill] sm:$0xff]  ;;  %v6569_v38 = vld [vmem:[#allocation52_spill] sm:$0xff] }
 0x4f0   :  { %3972 = vmatprep.subr.bf16.mxu0 %v6559_v31  ;;  %4036 = vmatprep.subr.bf16.mxu1 %v6560_v59  ;;  %v6570_v31 = vld [vmem:[#allocation53_spill] sm:$0xff]  ;;  %v6571_v59 = vld [vmem:[#allocation54_spill] sm:$0xff] }
 0x4f3   :  { %3974 = vmatpush1.bf16.msra.mxu0 %v6561_v54  ;;  %4038 = vmatpush1.bf16.msra.mxu1 %v6562_v3  ;;  %v6572_v54 = vld [vmem:[#allocation55_spill] sm:$0xff]  ;;  %v6573_v3 = vld [vmem:[#allocation56_spill] sm:$0xff] }
 0x4f4   :  { %3976 = vmatprep.subr.bf16.mxu0 %v6563_v55  ;;  %4040 = vmatprep.subr.bf16.mxu1 %v6564_v17  ;;  %v6574_v55 = vld [vmem:[#allocation57_spill] sm:$0xff]  ;;  %v6575_v17 = vld [vmem:[#allocation58_spill] sm:$0xff] }
 0x4f7   :  { %3978 = vmatpush1.bf16.msra.mxu0 %v6565_v40  ;;  %4042 = vmatpush1.bf16.msra.mxu1 %v6566_v2  ;;  %v6576_v40 = vld [vmem:[#allocation59_spill] sm:$0xff]  ;;  %v6577_v2 = vld [vmem:[#allocation60_spill] sm:$0xff] }
 0x4f8   :  { %3980 = vmatprep.subr.bf16.mxu0 %v6567_v28  ;;  %4044 = vmatprep.subr.bf16.mxu1 %v6568_v5  ;;  %v6578_v28 = vld [vmem:[#allocation61_spill] sm:$0xff]  ;;  %v6579_v5 = vld [vmem:[#allocation62_spill] sm:$0xff] }
 0x4fb   :  { %3982 = vmatpush1.bf16.msra.mxu0 %v6569_v38  ;;  %4046 = vmatpush1.bf16.msra.mxu1 %v6570_v31  ;;  %v6580_v38 = vld [vmem:[#allocation63_spill] sm:$0xff]  ;;  %v6581_v31 = vld [vmem:[#allocation64_spill] sm:$0xff] }
 0x4fc   :  { %3984 = vmatprep.subr.bf16.mxu0 %v6571_v59  ;;  %4048 = vmatprep.subr.bf16.mxu1 %v6572_v54  ;;  %v6582_v59 = vld [vmem:[#allocation65_spill] sm:$0xff]  ;;  %v6583_v54 = vld [vmem:[#allocation66_spill] sm:$0xff] }
 0x4ff   :  { %3986 = vmatpush1.bf16.msra.mxu0 %v6573_v3  ;;  %4050 = vmatpush1.bf16.msra.mxu1 %v6574_v55  ;;  %v6584_v3 = vld [vmem:[#allocation67_spill] sm:$0xff]  ;;  %v6585_v55 = vld [vmem:[#allocation68_spill] sm:$0xff] }
 0x500   :  { %3988 = vmatprep.subr.bf16.mxu0 %v6575_v17  ;;  %4052 = vmatprep.subr.bf16.mxu1 %v6576_v40  ;;  %v6586_v17 = vld [vmem:[#allocation69_spill] sm:$0xff]  ;;  %v6587_v40 = vld [vmem:[#allocation70_spill] sm:$0xff] }
 0x503   :  { %3990 = vmatpush1.bf16.msra.mxu0 %v6577_v2  ;;  %4054 = vmatpush1.bf16.msra.mxu1 %v6578_v28  ;;  %v6588_v2 = vld [vmem:[#allocation71_spill] sm:$0xff]  ;;  %v6589_v28 = vld [vmem:[#allocation72_spill] sm:$0xff] }
 0x504   :  { %3992 = vmatprep.subr.bf16.mxu0 %v6579_v5  ;;  %4056 = vmatprep.subr.bf16.mxu1 %v6580_v38  ;;  %v6590_v5 = vld [vmem:[#allocation73_spill] sm:$0xff]  ;;  %v6591_v38 = vld [vmem:[#allocation19_spill] sm:$0xff] }
 0x507   :  { %3994 = vmatpush1.bf16.msra.mxu0 %v6581_v31  ;;  %4058 = vmatpush1.bf16.msra.mxu1 %v6582_v59  ;;  %v6592_v31 = vld [vmem:[#allocation20_spill] sm:$0xff] }
 0x508   :  { %3996 = vmatprep.subr.bf16.mxu0 %v6583_v54  ;;  %4060 = vmatprep.subr.bf16.mxu1 %v6584_v3 }
 0x50b   :  { %3998 = vmatpush1.bf16.msra.mxu0 %v6585_v55  ;;  %4062 = vmatpush1.bf16.msra.mxu1 %v6586_v17 }
 0x50c   :  { %4000 = vmatprep.subr.bf16.mxu0 %v6587_v40  ;;  %4064 = vmatprep.subr.bf16.mxu1 %v6588_v2  ;;  %v6595_v2 = vld [vmem:[#allocation76_spill] sm:$0xff] }
 0x50f   :  { %4002 = vmatpush1.bf16.msra.mxu0 %v6589_v28  ;;  %4066 = vmatpush1.bf16.msra.mxu1 %v6590_v5  ;;  %v6596_v5 = vld [vmem:[#allocation77_spill] sm:$0xff] }
 0x510   :  { %4068 = vmatprep.subr.bf16.mxu0 %v6591_v38  ;;  %4100 = vmatprep.subr.bf16.mxu1 %v6592_v31 }
 0x585   :  { %v1526_v59 = vpop.f32.mrb[14].mxu0  ;;  %v1597_v54 = vpop.f32.mrb[14].mxu1 }
 0x586   :  { %v1527_v3 = vadd.f32 %v1526_v59, %v6593_v37  ;;  %v1528_v19 = vpop.f32.mrb[15].mxu0  ;;  %v1599_v55 = vpop.f32.mrb[15].mxu1  ;;  %v1598_v14 = vadd.f32 %v1597_v54, %v6595_v2  ;;  %v1621_v54 = vld [vmem:[#allocation6 + $0x80] sm:$0xff] }
 0x587   :  { %v1529_v17 = vadd.f32 %v1528_v19, %v6594_v0  ;;  %v1600_v28 = vadd.f32 %v1599_v55, %v6596_v5  ;;  %v6597_v19 = vld [vmem:[#allocation78_spill] sm:$0xff]  ;;  %v1622_v55 = vld [vmem:[#allocation6 + $0x88] sm:$0xff] }
 0x588   :  { %v1602_v47 = vmul.f32 0.5, %v1527_v3 }
 0x589   :  { %v1606_v40 = vmul.f32 0.5, %v1529_v17  ;;  %v1611_v38 = vmul.f32 0.5, %v1600_v28 }
 0x58a   :  { %4749 = vtanh.f32 %v1602_v47 }
 0x58b   :  { %4751 = vtanh.f32 %v1606_v40 }
 0x58c   :  { %4753 = vtanh.f32 %v1598_v14 }
 0x58d   :  { %4755 = vtanh.f32 %v1611_v38 }
 0x594   :  { %v4750_v56 = vpop.eup %4749 }
 0x595   :  { %v4752_v31 = vpop.eup %4751  ;;  %v1604_v20 = vmul.f32 0.5, %v4750_v56 }
 0x596   :  { %v1608_v33 = vmul.f32 0.5, %v4752_v31  ;;  %v4754_v37 = vpop.eup %4753 }
 0x597   :  { %v1605_v59 = vadd.f32 0.5, %v1604_v20  ;;  %v4756_v47 = vpop.eup %4755  ;;  %v1623_v20 = vld [vmem:[#allocation6 + $0x90] sm:$0xff] }
 0x598   :  { %v1609_v41 = vadd.f32 0.5, %v1608_v33  ;;  %v1613_v14 = vmul.f32 0.5, %v4756_v47 }
 0x599   :  { %v1616_v13 = vmul.f32 %v4754_v37, %v1605_v59 }
 0x59a   :  { %v1615_v3 = vmul.f32 %v1609_v41, %v6597_v19  ;;  %v1614_v38 = vadd.f32 0.5, %v1613_v14  ;;  %v1624_v19 = vld [vmem:[#allocation6 + $0x98] sm:$0xff] }
 0x59c   :  { %v5817_v17 = vadd.f32 %v1616_v13, %v1615_v3 }
 0x59e   :  { %6598 = vst [vmem:[#allocation78_spill] sm:$0xff] %v5817_v17  ;;  %4757 = vtanh.f32 %v5817_v17 }
 0x5a5   :  { %v1691_v40 = vpop.f32.mrb[16].mxu0  ;;  %v1762_v28 = vpop.f32.mrb[16].mxu1 }
 0x5a6   :  { %v1767_v5 = vadd.f32 %v1691_v40, %v1621_v54  ;;  %v1693_v56 = vpop.f32.mrb[17].mxu0  ;;  %v1764_v31 = vpop.f32.mrb[17].mxu1  ;;  %v1769_v13 = vadd.f32 %v1762_v28, %v1623_v20 }
 0x5a7   :  { %v1768_v2 = vadd.f32 %v1693_v56, %v1622_v55  ;;  %v1770_v3 = vadd.f32 %v1764_v31, %v1624_v19  ;;  %v6605_v19 = vld [vmem:[#allocation27_spill] sm:$0xff] }
 0x5a8   :  { %v4758_v33 = vpop.eup %4757  ;;  %v1771_v37 = vmul.f32 0.5, %v1767_v5 }
 0x5a9   :  { %v1775_v59 = vmul.f32 0.5, %v1768_v2  ;;  %v1619_v41 = vmul.f32 %v4758_v33, %v1614_v38  ;;  %v1780_v47 = vmul.f32 0.5, %v1770_v3  ;;  %v6606_v3 = vld [vmem:[#allocation28_spill] sm:$0xff] }
 0x5aa   :  { %4759 = vtanh.f32 %v1771_v37 }
 0x5ab   :  { %4761 = vtanh.f32 %v1775_v59  ;;  %1853 = vmatprep.mubr.f32.mxu0 %v1619_v41  ;;  %1924 = vmatprep.mubr.f32.mxu1 %v1619_v41  ;;  %v6602_v59 = vld [vmem:[#allocation24_spill] sm:$0xff]  ;;  %v6603_v41 = vld [vmem:[#allocation26_spill] sm:$0xff] }
 0x5ac   :  { %4763 = vtanh.f32 %v1769_v13  ;;  %v6604_v13 = vld [vmem:[#allocation25_spill] sm:$0xff] }
 0x5ad   :  { %4765 = vtanh.f32 %v1780_v47  ;;  %v6607_v47 = vld [vmem:[#allocation30_spill] sm:$0xff] }
 0x5b4   :  { %v4760_v17 = vpop.eup %4759 }
 0x5b5   :  { %v4762_v54 = vpop.eup %4761  ;;  %v1773_v40 = vmul.f32 0.5, %v4760_v17  ;;  %v6601_v17 = vld [vmem:[#allocation23_spill] sm:$0xff] }
 0x5b6   :  { %v1777_v0 = vmul.f32 0.5, %v4762_v54  ;;  %v4764_v55 = vpop.eup %4763  ;;  %v6608_v54 = vld [vmem:[#allocation29_spill] sm:$0xff] }
 0x5b7   :  { %v1774_v14 = vadd.f32 0.5, %v1773_v40  ;;  %v4766_v28 = vpop.eup %4765  ;;  %v6609_v40 = vld [vmem:[#allocation31_spill] sm:$0xff] }
 0x5b8   :  { %v1778_v56 = vadd.f32 0.5, %v1777_v0  ;;  %v1782_v20 = vmul.f32 0.5, %v4766_v28  ;;  %v6600_v0 = vld [vmem:[#allocation21_spill] sm:$0xff] }
 0x5b9   :  { %v1785_v5 = vmul.f32 %v4764_v55, %v1774_v14  ;;  %v6610_v14 = vld [vmem:[#allocation32_spill] sm:$0xff]  ;;  %v6611_v55 = vld [vmem:[#allocation34_spill] sm:$0xff]  ;;  %v6615_v28 = vld [vmem:[#allocation37_spill] sm:$0xff] }
 0x5ba   :  { %v1784_v2 = vmul.f32 %v1778_v56, %v5711_v11  ;;  %v1783_v33 = vadd.f32 0.5, %v1782_v20  ;;  %v6599_v11 = vld [vmem:[#allocation22_spill] sm:$0xff]  ;;  %v6612_v56 = vld [vmem:[#allocation33_spill] sm:$0xff] }
 0x5bb   :  { %v6616_v20 = vld [vmem:[#allocation38_spill] sm:$0xff] }
 0x5bc   :  { %v5821_v38 = vadd.f32 %v1785_v5, %v1784_v2  ;;  %v6613_v5 = vld [vmem:[#allocation35_spill] sm:$0xff]  ;;  %v6614_v2 = vld [vmem:[#allocation36_spill] sm:$0xff] }
 0x5be   :  { %4767 = vtanh.f32 %v5821_v38 }
 0x5c8   :  { %v4768_v31 = vpop.eup %4767 }
 0x5c9   :  { %v1788_v37 = vmul.f32 %v4768_v31, %v1783_v33  ;;  %v6617_v33 = vld [vmem:[#allocation39_spill] sm:$0xff]  ;;  %v6618_v31 = vld [vmem:[#allocation40_spill] sm:$0xff] }
 0x5cb   :  { %1854 = vmatmul.mubr.f32.vlgmr.msra.gmra.mrb[18].mxu0 %v1788_v37  ;;  %1925 = vmatmul.mubr.f32.vlgmr.msra.gmra.mrb[18].mxu1 %v1788_v37 }
 0x5cc   :  { %4070 = vmatpush1.bf16.msra.mxu0 %v5079_v8  ;;  %4102 = vmatpush1.bf16.msra.mxu1 %v5089_v18 }
 0x5cd   :  { %4072 = vmatprep.subr.bf16.mxu0 %v5081_v9  ;;  %4104 = vmatprep.subr.bf16.mxu1 %v5095_v26 }
 0x5ce   :  { %2018 = vmatprep.mubr.f32.mxu0 %v6358_v4  ;;  %2089 = vmatprep.mubr.f32.mxu1 %v6358_v4 }
 0x5d0   :  { %4074 = vmatpush1.bf16.msra.mxu0 %v5085_v16  ;;  %4106 = vmatpush1.bf16.msra.mxu1 %v5098_v30 }
 0x5d1   :  { %4076 = vmatprep.subr.bf16.mxu0 %v5092_v22  ;;  %4108 = vmatprep.subr.bf16.mxu1 %v5107_v39 }
 0x5d4   :  { %4078 = vmatpush1.bf16.msra.mxu0 %v5101_v32  ;;  %4110 = vmatpush1.bf16.msra.mxu1 %v5110_v44 }
 0x5d5   :  { %4080 = vmatprep.subr.bf16.mxu0 %v5105_v36  ;;  %4112 = vmatprep.subr.bf16.mxu1 %v5116_v48 }
 0x5d8   :  { %4082 = vmatpush1.bf16.msra.mxu0 %v5113_v46  ;;  %4114 = vmatpush1.bf16.msra.mxu1 %v5122_v57 }
 0x5d9   :  { %4084 = vmatprep.subr.bf16.mxu0 %v5119_v51  ;;  %4116 = vmatprep.subr.bf16.mxu1 %v5128_v60 }
 0x5dc   :  { %4086 = vmatpush1.bf16.msra.mxu0 %v5125_v58  ;;  %4118 = vmatpush1.bf16.msra.mxu1 %v5134_v7 }
 0x5dd   :  { %4088 = vmatprep.subr.bf16.mxu0 %v5131_v63  ;;  %4120 = vmatprep.subr.bf16.mxu1 %v5140_v12 }
 0x5e0   :  { %4090 = vmatpush1.bf16.msra.mxu0 %v5137_v10  ;;  %4122 = vmatpush1.bf16.msra.mxu1 %v5146_v25 }
 0x5e1   :  { %4092 = vmatprep.subr.bf16.mxu0 %v5143_v15  ;;  %4124 = vmatprep.subr.bf16.mxu1 %v5152_v29 }
 0x5e4   :  { %4094 = vmatpush1.bf16.msra.mxu0 %v5149_v27  ;;  %4126 = vmatpush1.bf16.msra.mxu1 %v5158_v42 }
 0x5e5   :  { %4096 = vmatprep.subr.bf16.mxu0 %v5155_v34  ;;  %4128 = vmatprep.subr.bf16.mxu1 %v5164_v45 }
 0x5e8   :  { %4098 = vmatpush1.bf16.msra.mxu0 %v5161_v43  ;;  %4130 = vmatpush1.bf16.msra.mxu1 %v5170_v61 }
 0x5e9   :  { %4132 = vmatprep.subr.bf16.mxu0 %v5167_v52  ;;  %4196 = vmatprep.subr.bf16.mxu1 %v5174_v62 }
 0x5eb   :  { %2019 = vmatmul.mubr.f32.vlgmr.msra.gmra.mrb[20].mxu0 %v1788_v37  ;;  %2090 = vmatmul.mubr.f32.vlgmr.msra.gmra.mrb[20].mxu1 %v1788_v37  ;;  %v6619_v37 = vld [vmem:[#allocation41_spill] sm:$0xff] }
 0x5ec   :  { %4134 = vmatpush1.bf16.msra.mxu0 %v5176_v1  ;;  %4198 = vmatpush1.bf16.msra.mxu1 %v5183_v21 }
 0x5ed   :  { %4136 = vmatprep.subr.bf16.mxu0 %v5179_v6  ;;  %4200 = vmatprep.subr.bf16.mxu1 %v5187_v23 }
 0x5f0   :  { %4138 = vmatpush1.bf16.msra.mxu0 %v5189_v24  ;;  %4202 = vmatpush1.bf16.msra.mxu1 %v5197_v49 }
 0x5f1   :  { %4140 = vmatprep.subr.bf16.mxu0 %v5192_v35  ;;  %4204 = vmatprep.subr.bf16.mxu1 %v5202_v50 }
 0x5f4   :  { %4142 = vmatpush1.bf16.msra.mxu0 %v5204_v53  ;;  %4206 = vmatpush1.bf16.msra.mxu1 %v6599_v11 }
 0x5f5   :  { %4144 = vmatprep.subr.bf16.mxu0 %v6600_v0  ;;  %4208 = vmatprep.subr.bf16.mxu1 %v6601_v17 }
 0x5f8   :  { %4146 = vmatpush1.bf16.msra.mxu0 %v6602_v59  ;;  %4210 = vmatpush1.bf16.msra.mxu1 %v6603_v41 }
 0x5f9   :  { %4148 = vmatprep.subr.bf16.mxu0 %v6604_v13  ;;  %4212 = vmatprep.subr.bf16.mxu1 %v6605_v19 }
 0x5fc   :  { %4150 = vmatpush1.bf16.msra.mxu0 %v6606_v3  ;;  %4214 = vmatpush1.bf16.msra.mxu1 %v6607_v47  ;;  %v6655_v3 = vld [vmem:[#allocation75_spill] sm:$0xff] }
 0x5fd   :  { %4152 = vmatprep.subr.bf16.mxu0 %v6608_v54  ;;  %4216 = vmatprep.subr.bf16.mxu1 %v6609_v40  ;;  %v6620_v40 = vld [vmem:[#allocation42_spill] sm:$0xff] }
 0x5fe   :  { %v6654_v54 = vld [vmem:[#allocation74_spill] sm:$0xff] }
 0x600   :  { %4154 = vmatpush1.bf16.msra.mxu0 %v6610_v14  ;;  %4218 = vmatpush1.bf16.msra.mxu1 %v6611_v55  ;;  %v6621_v14 = vld [vmem:[#allocation43_spill] sm:$0xff]  ;;  %v6622_v55 = vld [vmem:[#allocation44_spill] sm:$0xff] }
 0x601   :  { %4156 = vmatprep.subr.bf16.mxu0 %v6612_v56  ;;  %4220 = vmatprep.subr.bf16.mxu1 %v6613_v5  ;;  %v6623_v56 = vld [vmem:[#allocation45_spill] sm:$0xff]  ;;  %v6624_v5 = vld [vmem:[#allocation46_spill] sm:$0xff] }
 0x604   :  { %4158 = vmatpush1.bf16.msra.mxu0 %v6614_v2  ;;  %4222 = vmatpush1.bf16.msra.mxu1 %v6615_v28  ;;  %v6625_v2 = vld [vmem:[#allocation47_spill] sm:$0xff]  ;;  %v6626_v28 = vld [vmem:[#allocation48_spill] sm:$0xff] }
 0x605   :  { %4160 = vmatprep.subr.bf16.mxu0 %v6616_v20  ;;  %4224 = vmatprep.subr.bf16.mxu1 %v6617_v33  ;;  %v6627_v20 = vld [vmem:[#allocation49_spill] sm:$0xff]  ;;  %v6628_v33 = vld [vmem:[#allocation50_spill] sm:$0xff] }
 0x608   :  { %4162 = vmatpush1.bf16.msra.mxu0 %v6618_v31  ;;  %4226 = vmatpush1.bf16.msra.mxu1 %v6619_v37  ;;  %v6629_v31 = vld [vmem:[#allocation51_spill] sm:$0xff]  ;;  %v6630_v37 = vld [vmem:[#allocation52_spill] sm:$0xff] }
 0x609   :  { %4164 = vmatprep.subr.bf16.mxu0 %v6620_v40  ;;  %4228 = vmatprep.subr.bf16.mxu1 %v6621_v14  ;;  %v6631_v40 = vld [vmem:[#allocation53_spill] sm:$0xff]  ;;  %v6632_v14 = vld [vmem:[#allocation54_spill] sm:$0xff] }
 0x60c   :  { %4166 = vmatpush1.bf16.msra.mxu0 %v6622_v55  ;;  %4230 = vmatpush1.bf16.msra.mxu1 %v6623_v56  ;;  %v6633_v55 = vld [vmem:[#allocation55_spill] sm:$0xff]  ;;  %v6634_v56 = vld [vmem:[#allocation56_spill] sm:$0xff] }
 0x60d   :  { %4168 = vmatprep.subr.bf16.mxu0 %v6624_v5  ;;  %4232 = vmatprep.subr.bf16.mxu1 %v6625_v2  ;;  %v6635_v5 = vld [vmem:[#allocation57_spill] sm:$0xff]  ;;  %v6636_v2 = vld [vmem:[#allocation58_spill] sm:$0xff] }
 0x610   :  { %4170 = vmatpush1.bf16.msra.mxu0 %v6626_v28  ;;  %4234 = vmatpush1.bf16.msra.mxu1 %v6627_v20  ;;  %v6637_v28 = vld [vmem:[#allocation59_spill] sm:$0xff]  ;;  %v6638_v20 = vld [vmem:[#allocation60_spill] sm:$0xff] }
 0x611   :  { %4172 = vmatprep.subr.bf16.mxu0 %v6628_v33  ;;  %4236 = vmatprep.subr.bf16.mxu1 %v6629_v31  ;;  %v6639_v33 = vld [vmem:[#allocation61_spill] sm:$0xff]  ;;  %v6640_v31 = vld [vmem:[#allocation62_spill] sm:$0xff] }
 0x614   :  { %4174 = vmatpush1.bf16.msra.mxu0 %v6630_v37  ;;  %4238 = vmatpush1.bf16.msra.mxu1 %v6631_v40  ;;  %v6641_v37 = vld [vmem:[#allocation63_spill] sm:$0xff]  ;;  %v6642_v40 = vld [vmem:[#allocation64_spill] sm:$0xff] }
 0x615   :  { %4176 = vmatprep.subr.bf16.mxu0 %v6632_v14  ;;  %4240 = vmatprep.subr.bf16.mxu1 %v6633_v55  ;;  %v6643_v14 = vld [vmem:[#allocation65_spill] sm:$0xff]  ;;  %v6644_v55 = vld [vmem:[#allocation66_spill] sm:$0xff] }
 0x618   :  { %4178 = vmatpush1.bf16.msra.mxu0 %v6634_v56  ;;  %4242 = vmatpush1.bf16.msra.mxu1 %v6635_v5  ;;  %v6645_v56 = vld [vmem:[#allocation67_spill] sm:$0xff]  ;;  %v6646_v5 = vld [vmem:[#allocation68_spill] sm:$0xff] }
 0x619   :  { %4180 = vmatprep.subr.bf16.mxu0 %v6636_v2  ;;  %4244 = vmatprep.subr.bf16.mxu1 %v6637_v28  ;;  %v6647_v2 = vld [vmem:[#allocation69_spill] sm:$0xff]  ;;  %v6648_v28 = vld [vmem:[#allocation70_spill] sm:$0xff] }
 0x61c   :  { %4182 = vmatpush1.bf16.msra.mxu0 %v6638_v20  ;;  %4246 = vmatpush1.bf16.msra.mxu1 %v6639_v33  ;;  %v6649_v20 = vld [vmem:[#allocation71_spill] sm:$0xff]  ;;  %v6650_v33 = vld [vmem:[#allocation72_spill] sm:$0xff] }
 0x61d   :  { %4184 = vmatprep.subr.bf16.mxu0 %v6640_v31  ;;  %4248 = vmatprep.subr.bf16.mxu1 %v6641_v37  ;;  %v6651_v31 = vld [vmem:[#allocation73_spill] sm:$0xff]  ;;  %v6652_v37 = vld [vmem:[#allocation19_spill] sm:$0xff] }
 0x620   :  { %4186 = vmatpush1.bf16.msra.mxu0 %v6642_v40  ;;  %4250 = vmatpush1.bf16.msra.mxu1 %v6643_v14  ;;  %v6653_v40 = vld [vmem:[#allocation20_spill] sm:$0xff] }
 0x621   :  { %4188 = vmatprep.subr.bf16.mxu0 %v6644_v55  ;;  %4252 = vmatprep.subr.bf16.mxu1 %v6645_v56 }
 0x624   :  { %4190 = vmatpush1.bf16.msra.mxu0 %v6646_v5  ;;  %4254 = vmatpush1.bf16.msra.mxu1 %v6647_v2 }
 0x625   :  { %4192 = vmatprep.subr.bf16.mxu0 %v6648_v28  ;;  %4256 = vmatprep.subr.bf16.mxu1 %v6649_v20  ;;  %v6656_v20 = vld [vmem:[#allocation76_spill] sm:$0xff] }
 0x628   :  { %4194 = vmatpush1.bf16.msra.mxu0 %v6650_v33  ;;  %4258 = vmatpush1.bf16.msra.mxu1 %v6651_v31  ;;  %v6657_v31 = vld [vmem:[#allocation77_spill] sm:$0xff] }
 0x629   :  { %4260 = vmatprep.subr.bf16.mxu0 %v6652_v37  ;;  %4292 = vmatprep.subr.bf16.mxu1 %v6653_v40 }
 0x69e   :  { %v1855_v14 = vpop.f32.mrb[18].mxu0  ;;  %v1926_v55 = vpop.f32.mrb[18].mxu1 }
 0x69f   :  { %v1856_v56 = vadd.f32 %v1855_v14, %v6654_v54  ;;  %v1857_v47 = vpop.f32.mrb[19].mxu0  ;;  %v1928_v5 = vpop.f32.mrb[19].mxu1  ;;  %v1927_v13 = vadd.f32 %v1926_v55, %v6656_v20  ;;  %v1950_v55 = vld [vmem:[#allocation6 + $0xa0] sm:$0xff] }
 0x6a0   :  { %v1858_v2 = vadd.f32 %v1857_v47, %v6655_v3  ;;  %v1929_v33 = vadd.f32 %v1928_v5, %v6657_v31  ;;  %v6658_v47 = vld [vmem:[#allocation78_spill] sm:$0xff]  ;;  %v1951_v5 = vld [vmem:[#allocation6 + $0xa8] sm:$0xff] }
 0x6a1   :  { %v1931_v19 = vmul.f32 0.5, %v1856_v56 }
 0x6a2   :  { %v1935_v28 = vmul.f32 0.5, %v1858_v2  ;;  %v1940_v37 = vmul.f32 0.5, %v1929_v33 }
 0x6a3   :  { %4769 = vtanh.f32 %v1931_v19 }
 0x6a4   :  { %4771 = vtanh.f32 %v1935_v28 }
 0x6a5   :  { %4773 = vtanh.f32 %v1927_v13 }
 0x6a6   :  { %4775 = vtanh.f32 %v1940_v37 }
 0x6ad   :  { %v4770_v41 = vpop.eup %4769 }
 0x6ae   :  { %v4772_v40 = vpop.eup %4771  ;;  %v1933_v59 = vmul.f32 0.5, %v4770_v41 }
 0x6af   :  { %v1937_v17 = vmul.f32 0.5, %v4772_v40  ;;  %v4774_v54 = vpop.eup %4773 }
 0x6b0   :  { %v1934_v14 = vadd.f32 0.5, %v1933_v59  ;;  %v4776_v19 = vpop.eup %4775  ;;  %v1952_v59 = vld [vmem:[#allocation6 + $0xb0] sm:$0xff] }
 0x6b1   :  { %v1938_v0 = vadd.f32 0.5, %v1937_v17  ;;  %v1942_v13 = vmul.f32 0.5, %v4776_v19 }
 0x6b2   :  { %v1945_v11 = vmul.f32 %v4774_v54, %v1934_v14 }
 0x6b3   :  { %v1944_v56 = vmul.f32 %v1938_v0, %v6658_v47  ;;  %v1943_v37 = vadd.f32 0.5, %v1942_v13  ;;  %v1953_v47 = vld [vmem:[#allocation6 + $0xb8] sm:$0xff] }
 0x6b5   :  { %v5927_v2 = vadd.f32 %v1945_v11, %v1944_v56 }
 0x6b7   :  { %6659 = vst [vmem:[#allocation78_spill] sm:$0xff] %v5927_v2  ;;  %4777 = vtanh.f32 %v5927_v2 }
 0x6be   :  { %v2020_v28 = vpop.f32.mrb[20].mxu0  ;;  %v2091_v33 = vpop.f32.mrb[20].mxu1 }
 0x6bf   :  { %v2096_v31 = vadd.f32 %v2020_v28, %v1950_v55  ;;  %v2022_v41 = vpop.f32.mrb[21].mxu0  ;;  %v2093_v40 = vpop.f32.mrb[21].mxu1  ;;  %v2098_v11 = vadd.f32 %v2091_v33, %v1952_v59 }
 0x6c0   :  { %v2097_v20 = vadd.f32 %v2022_v41, %v1951_v5  ;;  %v2099_v56 = vadd.f32 %v2093_v40, %v1953_v47  ;;  %v6666_v47 = vld [vmem:[#allocation27_spill] sm:$0xff] }
 0x6c1   :  { %v4778_v17 = vpop.eup %4777  ;;  %v2100_v54 = vmul.f32 0.5, %v2096_v31 }
 0x6c2   :  { %v2104_v14 = vmul.f32 0.5, %v2097_v20  ;;  %v1948_v0 = vmul.f32 %v4778_v17, %v1943_v37  ;;  %v2109_v19 = vmul.f32 0.5, %v2099_v56  ;;  %v6667_v56 = vld [vmem:[#allocation28_spill] sm:$0xff] }
 0x6c3   :  { %4779 = vtanh.f32 %v2100_v54 }
 0x6c4   :  { %4781 = vtanh.f32 %v2104_v14  ;;  %2182 = vmatprep.mubr.f32.mxu0 %v1948_v0  ;;  %2253 = vmatprep.mubr.f32.mxu1 %v1948_v0  ;;  %v6663_v14 = vld [vmem:[#allocation24_spill] sm:$0xff]  ;;  %v6664_v0 = vld [vmem:[#allocation26_spill] sm:$0xff] }
 0x6c5   :  { %4783 = vtanh.f32 %v2098_v11  ;;  %v6665_v11 = vld [vmem:[#allocation25_spill] sm:$0xff] }
 0x6c6   :  { %4785 = vtanh.f32 %v2109_v19  ;;  %v6668_v19 = vld [vmem:[#allocation30_spill] sm:$0xff] }
 0x6cd   :  { %v4780_v2 = vpop.eup %4779 }
 0x6ce   :  { %v4782_v55 = vpop.eup %4781  ;;  %v2102_v28 = vmul.f32 0.5, %v4780_v2  ;;  %v6662_v2 = vld [vmem:[#allocation23_spill] sm:$0xff] }
 0x6cf   :  { %v2106_v3 = vmul.f32 0.5, %v4782_v55  ;;  %v4784_v5 = vpop.eup %4783  ;;  %v6669_v55 = vld [vmem:[#allocation29_spill] sm:$0xff] }
 0x6d0   :  { %v2103_v13 = vadd.f32 0.5, %v2102_v28  ;;  %v4786_v33 = vpop.eup %4785  ;;  %v6670_v28 = vld [vmem:[#allocation31_spill] sm:$0xff] }
 0x6d1   :  { %v2107_v41 = vadd.f32 0.5, %v2106_v3  ;;  %v2111_v59 = vmul.f32 0.5, %v4786_v33  ;;  %v6661_v3 = vld [vmem:[#allocation21_spill] sm:$0xff] }
 0x6d2   :  { %v2114_v31 = vmul.f32 %v4784_v5, %v2103_v13  ;;  %v6671_v13 = vld [vmem:[#allocation32_spill] sm:$0xff]  ;;  %v6672_v5 = vld [vmem:[#allocation34_spill] sm:$0xff]  ;;  %v6676_v33 = vld [vmem:[#allocation37_spill] sm:$0xff] }
 0x6d3   :  { %v2113_v20 = vmul.f32 %v2107_v41, %v5821_v38  ;;  %v2112_v17 = vadd.f32 0.5, %v2111_v59  ;;  %v6660_v38 = vld [vmem:[#allocation22_spill] sm:$0xff]  ;;  %v6673_v41 = vld [vmem:[#allocation33_spill] sm:$0xff] }
 0x6d4   :  { %v6677_v59 = vld [vmem:[#allocation38_spill] sm:$0xff] }
 0x6d5   :  { %v5931_v37 = vadd.f32 %v2114_v31, %v2113_v20  ;;  %v6674_v31 = vld [vmem:[#allocation35_spill] sm:$0xff]  ;;  %v6675_v20 = vld [vmem:[#allocation36_spill] sm:$0xff] }
 0x6d7   :  { %4787 = vtanh.f32 %v5931_v37 }
 0x6e1   :  { %v4788_v40 = vpop.eup %4787 }
 0x6e2   :  { %v2117_v54 = vmul.f32 %v4788_v40, %v2112_v17  ;;  %v6678_v17 = vld [vmem:[#allocation39_spill] sm:$0xff]  ;;  %v6679_v40 = vld [vmem:[#allocation40_spill] sm:$0xff] }
 0x6e4   :  { %2183 = vmatmul.mubr.f32.vlgmr.msra.gmra.mrb[22].mxu0 %v2117_v54  ;;  %2254 = vmatmul.mubr.f32.vlgmr.msra.gmra.mrb[22].mxu1 %v2117_v54 }
 0x6e5   :  { %4262 = vmatpush1.bf16.msra.mxu0 %v5079_v8  ;;  %4294 = vmatpush1.bf16.msra.mxu1 %v5089_v18 }
 0x6e6   :  { %4264 = vmatprep.subr.bf16.mxu0 %v5081_v9  ;;  %4296 = vmatprep.subr.bf16.mxu1 %v5095_v26 }
 0x6e7   :  { %2347 = vmatprep.mubr.f32.mxu0 %v6358_v4  ;;  %2418 = vmatprep.mubr.f32.mxu1 %v6358_v4 }
 0x6e9   :  { %4266 = vmatpush1.bf16.msra.mxu0 %v5085_v16  ;;  %4298 = vmatpush1.bf16.msra.mxu1 %v5098_v30 }
 0x6ea   :  { %4268 = vmatprep.subr.bf16.mxu0 %v5092_v22  ;;  %4300 = vmatprep.subr.bf16.mxu1 %v5107_v39 }
 0x6ed   :  { %4270 = vmatpush1.bf16.msra.mxu0 %v5101_v32  ;;  %4302 = vmatpush1.bf16.msra.mxu1 %v5110_v44 }
 0x6ee   :  { %4272 = vmatprep.subr.bf16.mxu0 %v5105_v36  ;;  %4304 = vmatprep.subr.bf16.mxu1 %v5116_v48 }
 0x6f1   :  { %4274 = vmatpush1.bf16.msra.mxu0 %v5113_v46  ;;  %4306 = vmatpush1.bf16.msra.mxu1 %v5122_v57 }
 0x6f2   :  { %4276 = vmatprep.subr.bf16.mxu0 %v5119_v51  ;;  %4308 = vmatprep.subr.bf16.mxu1 %v5128_v60 }
 0x6f5   :  { %4278 = vmatpush1.bf16.msra.mxu0 %v5125_v58  ;;  %4310 = vmatpush1.bf16.msra.mxu1 %v5134_v7 }
 0x6f6   :  { %4280 = vmatprep.subr.bf16.mxu0 %v5131_v63  ;;  %4312 = vmatprep.subr.bf16.mxu1 %v5140_v12 }
 0x6f9   :  { %4282 = vmatpush1.bf16.msra.mxu0 %v5137_v10  ;;  %4314 = vmatpush1.bf16.msra.mxu1 %v5146_v25 }
 0x6fa   :  { %4284 = vmatprep.subr.bf16.mxu0 %v5143_v15  ;;  %4316 = vmatprep.subr.bf16.mxu1 %v5152_v29 }
 0x6fd   :  { %4286 = vmatpush1.bf16.msra.mxu0 %v5149_v27  ;;  %4318 = vmatpush1.bf16.msra.mxu1 %v5158_v42 }
 0x6fe   :  { %4288 = vmatprep.subr.bf16.mxu0 %v5155_v34  ;;  %4320 = vmatprep.subr.bf16.mxu1 %v5164_v45 }
 0x701   :  { %4290 = vmatpush1.bf16.msra.mxu0 %v5161_v43  ;;  %4322 = vmatpush1.bf16.msra.mxu1 %v5170_v61 }
 0x702   :  { %4324 = vmatprep.subr.bf16.mxu0 %v5167_v52  ;;  %4388 = vmatprep.subr.bf16.mxu1 %v5174_v62 }
 0x704   :  { %2348 = vmatmul.mubr.f32.vlgmr.msra.gmra.mrb[24].mxu0 %v2117_v54  ;;  %2419 = vmatmul.mubr.f32.vlgmr.msra.gmra.mrb[24].mxu1 %v2117_v54  ;;  %v6680_v54 = vld [vmem:[#allocation41_spill] sm:$0xff] }
 0x705   :  { %4326 = vmatpush1.bf16.msra.mxu0 %v5176_v1  ;;  %4390 = vmatpush1.bf16.msra.mxu1 %v5183_v21 }
 0x706   :  { %4328 = vmatprep.subr.bf16.mxu0 %v5179_v6  ;;  %4392 = vmatprep.subr.bf16.mxu1 %v5187_v23 }
 0x709   :  { %4330 = vmatpush1.bf16.msra.mxu0 %v5189_v24  ;;  %4394 = vmatpush1.bf16.msra.mxu1 %v5197_v49 }
 0x70a   :  { %4332 = vmatprep.subr.bf16.mxu0 %v5192_v35  ;;  %4396 = vmatprep.subr.bf16.mxu1 %v5202_v50 }
 0x70d   :  { %4334 = vmatpush1.bf16.msra.mxu0 %v5204_v53  ;;  %4398 = vmatpush1.bf16.msra.mxu1 %v6660_v38 }
 0x70e   :  { %4336 = vmatprep.subr.bf16.mxu0 %v6661_v3  ;;  %4400 = vmatprep.subr.bf16.mxu1 %v6662_v2 }
 0x711   :  { %4338 = vmatpush1.bf16.msra.mxu0 %v6663_v14  ;;  %4402 = vmatpush1.bf16.msra.mxu1 %v6664_v0 }
 0x712   :  { %4340 = vmatprep.subr.bf16.mxu0 %v6665_v11  ;;  %4404 = vmatprep.subr.bf16.mxu1 %v6666_v47 }
 0x715   :  { %4342 = vmatpush1.bf16.msra.mxu0 %v6667_v56  ;;  %4406 = vmatpush1.bf16.msra.mxu1 %v6668_v19  ;;  %v6716_v56 = vld [vmem:[#allocation75_spill] sm:$0xff] }
 0x716   :  { %4344 = vmatprep.subr.bf16.mxu0 %v6669_v55  ;;  %4408 = vmatprep.subr.bf16.mxu1 %v6670_v28  ;;  %v6681_v28 = vld [vmem:[#allocation42_spill] sm:$0xff] }
 0x717   :  { %v6715_v55 = vld [vmem:[#allocation74_spill] sm:$0xff] }
 0x719   :  { %4346 = vmatpush1.bf16.msra.mxu0 %v6671_v13  ;;  %4410 = vmatpush1.bf16.msra.mxu1 %v6672_v5  ;;  %v6682_v13 = vld [vmem:[#allocation43_spill] sm:$0xff]  ;;  %v6683_v5 = vld [vmem:[#allocation44_spill] sm:$0xff] }
 0x71a   :  { %4348 = vmatprep.subr.bf16.mxu0 %v6673_v41  ;;  %4412 = vmatprep.subr.bf16.mxu1 %v6674_v31  ;;  %v6684_v41 = vld [vmem:[#allocation45_spill] sm:$0xff]  ;;  %v6685_v31 = vld [vmem:[#allocation46_spill] sm:$0xff] }
 0x71d   :  { %4350 = vmatpush1.bf16.msra.mxu0 %v6675_v20  ;;  %4414 = vmatpush1.bf16.msra.mxu1 %v6676_v33  ;;  %v6686_v20 = vld [vmem:[#allocation47_spill] sm:$0xff]  ;;  %v6687_v33 = vld [vmem:[#allocation48_spill] sm:$0xff] }
 0x71e   :  { %4352 = vmatprep.subr.bf16.mxu0 %v6677_v59  ;;  %4416 = vmatprep.subr.bf16.mxu1 %v6678_v17  ;;  %v6688_v59 = vld [vmem:[#allocation49_spill] sm:$0xff]  ;;  %v6689_v17 = vld [vmem:[#allocation50_spill] sm:$0xff] }
 0x721   :  { %4354 = vmatpush1.bf16.msra.mxu0 %v6679_v40  ;;  %4418 = vmatpush1.bf16.msra.mxu1 %v6680_v54  ;;  %v6690_v40 = vld [vmem:[#allocation51_spill] sm:$0xff]  ;;  %v6691_v54 = vld [vmem:[#allocation52_spill] sm:$0xff] }
 0x722   :  { %4356 = vmatprep.subr.bf16.mxu0 %v6681_v28  ;;  %4420 = vmatprep.subr.bf16.mxu1 %v6682_v13  ;;  %v6692_v28 = vld [vmem:[#allocation53_spill] sm:$0xff]  ;;  %v6693_v13 = vld [vmem:[#allocation54_spill] sm:$0xff] }
 0x725   :  { %4358 = vmatpush1.bf16.msra.mxu0 %v6683_v5  ;;  %4422 = vmatpush1.bf16.msra.mxu1 %v6684_v41  ;;  %v6694_v5 = vld [vmem:[#allocation55_spill] sm:$0xff]  ;;  %v6695_v41 = vld [vmem:[#allocation56_spill] sm:$0xff] }
 0x726   :  { %4360 = vmatprep.subr.bf16.mxu0 %v6685_v31  ;;  %4424 = vmatprep.subr.bf16.mxu1 %v6686_v20  ;;  %v6696_v31 = vld [vmem:[#allocation57_spill] sm:$0xff]  ;;  %v6697_v20 = vld [vmem:[#allocation58_spill] sm:$0xff] }
 0x729   :  { %4362 = vmatpush1.bf16.msra.mxu0 %v6687_v33  ;;  %4426 = vmatpush1.bf16.msra.mxu1 %v6688_v59  ;;  %v6698_v33 = vld [vmem:[#allocation59_spill] sm:$0xff]  ;;  %v6699_v59 = vld [vmem:[#allocation60_spill] sm:$0xff] }
 0x72a   :  { %4364 = vmatprep.subr.bf16.mxu0 %v6689_v17  ;;  %4428 = vmatprep.subr.bf16.mxu1 %v6690_v40  ;;  %v6700_v17 = vld [vmem:[#allocation61_spill] sm:$0xff]  ;;  %v6701_v40 = vld [vmem:[#allocation62_spill] sm:$0xff] }
 0x72d   :  { %4366 = vmatpush1.bf16.msra.mxu0 %v6691_v54  ;;  %4430 = vmatpush1.bf16.msra.mxu1 %v6692_v28  ;;  %v6702_v54 = vld [vmem:[#allocation63_spill] sm:$0xff]  ;;  %v6703_v28 = vld [vmem:[#allocation64_spill] sm:$0xff] }
 0x72e   :  { %4368 = vmatprep.subr.bf16.mxu0 %v6693_v13  ;;  %4432 = vmatprep.subr.bf16.mxu1 %v6694_v5  ;;  %v6704_v13 = vld [vmem:[#allocation65_spill] sm:$0xff]  ;;  %v6705_v5 = vld [vmem:[#allocation66_spill] sm:$0xff] }
 0x731   :  { %4370 = vmatpush1.bf16.msra.mxu0 %v6695_v41  ;;  %4434 = vmatpush1.bf16.msra.mxu1 %v6696_v31  ;;  %v6706_v41 = vld [vmem:[#allocation67_spill] sm:$0xff]  ;;  %v6707_v31 = vld [vmem:[#allocation68_spill] sm:$0xff] }
 0x732   :  { %4372 = vmatprep.subr.bf16.mxu0 %v6697_v20  ;;  %4436 = vmatprep.subr.bf16.mxu1 %v6698_v33  ;;  %v6708_v20 = vld [vmem:[#allocation69_spill] sm:$0xff]  ;;  %v6709_v33 = vld [vmem:[#allocation70_spill] sm:$0xff] }
 0x735   :  { %4374 = vmatpush1.bf16.msra.mxu0 %v6699_v59  ;;  %4438 = vmatpush1.bf16.msra.mxu1 %v6700_v17  ;;  %v6710_v59 = vld [vmem:[#allocation71_spill] sm:$0xff]  ;;  %v6711_v17 = vld [vmem:[#allocation72_spill] sm:$0xff] }
 0x736   :  { %4376 = vmatprep.subr.bf16.mxu0 %v6701_v40  ;;  %4440 = vmatprep.subr.bf16.mxu1 %v6702_v54  ;;  %v6712_v40 = vld [vmem:[#allocation73_spill] sm:$0xff]  ;;  %v6713_v54 = vld [vmem:[#allocation19_spill] sm:$0xff] }
 0x739   :  { %4378 = vmatpush1.bf16.msra.mxu0 %v6703_v28  ;;  %4442 = vmatpush1.bf16.msra.mxu1 %v6704_v13  ;;  %v6714_v28 = vld [vmem:[#allocation20_spill] sm:$0xff] }
 0x73a   :  { %4380 = vmatprep.subr.bf16.mxu0 %v6705_v5  ;;  %4444 = vmatprep.subr.bf16.mxu1 %v6706_v41 }
 0x73d   :  { %4382 = vmatpush1.bf16.msra.mxu0 %v6707_v31  ;;  %4446 = vmatpush1.bf16.msra.mxu1 %v6708_v20 }
 0x73e   :  { %4384 = vmatprep.subr.bf16.mxu0 %v6709_v33  ;;  %4448 = vmatprep.subr.bf16.mxu1 %v6710_v59  ;;  %v6717_v59 = vld [vmem:[#allocation76_spill] sm:$0xff] }
 0x741   :  { %4386 = vmatpush1.bf16.msra.mxu0 %v6711_v17  ;;  %4450 = vmatpush1.bf16.msra.mxu1 %v6712_v40  ;;  %v6718_v40 = vld [vmem:[#allocation77_spill] sm:$0xff] }
 0x742   :  { %4452 = vmatprep.subr.bf16.mxu0 %v6713_v54  ;;  %4484 = vmatprep.subr.bf16.mxu1 %v6714_v28 }
 0x7b7   :  { %v2184_v13 = vpop.f32.mrb[22].mxu0  ;;  %v2255_v5 = vpop.f32.mrb[22].mxu1 }
 0x7b8   :  { %v2185_v41 = vadd.f32 %v2184_v13, %v6715_v55  ;;  %v2186_v19 = vpop.f32.mrb[23].mxu0  ;;  %v2257_v31 = vpop.f32.mrb[23].mxu1  ;;  %v2256_v11 = vadd.f32 %v2255_v5, %v6717_v59  ;;  %v2279_v5 = vld [vmem:[#allocation6 + $0xc0] sm:$0xff] }
 0x7b9   :  { %v2187_v20 = vadd.f32 %v2186_v19, %v6716_v56  ;;  %v2258_v17 = vadd.f32 %v2257_v31, %v6718_v40  ;;  %v6719_v19 = vld [vmem:[#allocation78_spill] sm:$0xff]  ;;  %v2280_v31 = vld [vmem:[#allocation6 + $0xc8] sm:$0xff] }
 0x7ba   :  { %v2260_v47 = vmul.f32 0.5, %v2185_v41 }
 0x7bb   :  { %v2264_v33 = vmul.f32 0.5, %v2187_v20  ;;  %v2269_v54 = vmul.f32 0.5, %v2258_v17 }
 0x7bc   :  { %4789 = vtanh.f32 %v2260_v47 }
 0x7bd   :  { %4791 = vtanh.f32 %v2264_v33 }
 0x7be   :  { %4793 = vtanh.f32 %v2256_v11 }
 0x7bf   :  { %4795 = vtanh.f32 %v2269_v54 }
 0x7c6   :  { %v4790_v0 = vpop.eup %4789 }
 0x7c7   :  { %v4792_v28 = vpop.eup %4791  ;;  %v2262_v14 = vmul.f32 0.5, %v4790_v0 }
 0x7c8   :  { %v2266_v2 = vmul.f32 0.5, %v4792_v28  ;;  %v4794_v55 = vpop.eup %4793 }
 0x7c9   :  { %v2263_v13 = vadd.f32 0.5, %v2262_v14  ;;  %v4796_v47 = vpop.eup %4795  ;;  %v2281_v14 = vld [vmem:[#allocation6 + $0xd0] sm:$0xff] }
 0x7ca   :  { %v2267_v3 = vadd.f32 0.5, %v2266_v2  ;;  %v2271_v11 = vmul.f32 0.5, %v4796_v47 }
 0x7cb   :  { %v2274_v38 = vmul.f32 %v4794_v55, %v2263_v13 }
 0x7cc   :  { %v2273_v41 = vmul.f32 %v2267_v3, %v6719_v19  ;;  %v2272_v54 = vadd.f32 0.5, %v2271_v11  ;;  %v2282_v19 = vld [vmem:[#allocation6 + $0xd8] sm:$0xff] }
 0x7ce   :  { %v6037_v20 = vadd.f32 %v2274_v38, %v2273_v41 }
 0x7d0   :  { %6720 = vst [vmem:[#allocation19_spill] sm:$0xff] %v6037_v20  ;;  %4797 = vtanh.f32 %v6037_v20 }
 0x7d7   :  { %v2349_v33 = vpop.f32.mrb[24].mxu0  ;;  %v2420_v17 = vpop.f32.mrb[24].mxu1 }
 0x7d8   :  { %v2425_v40 = vadd.f32 %v2349_v33, %v2279_v5  ;;  %v2351_v0 = vpop.f32.mrb[25].mxu0  ;;  %v2422_v28 = vpop.f32.mrb[25].mxu1  ;;  %v2427_v38 = vadd.f32 %v2420_v17, %v2281_v14 }
 0x7d9   :  { %v2426_v59 = vadd.f32 %v2351_v0, %v2280_v31  ;;  %v2428_v41 = vadd.f32 %v2422_v28, %v2282_v19  ;;  %v6768_v19 = vld [vmem:[#allocation68_spill] sm:$0xff] }
 0x7da   :  { %v4798_v2 = vpop.eup %4797  ;;  %v2429_v55 = vmul.f32 0.5, %v2425_v40 }
 0x7db   :  { %v2433_v13 = vmul.f32 0.5, %v2426_v59  ;;  %v2277_v3 = vmul.f32 %v4798_v2, %v2272_v54  ;;  %v2438_v47 = vmul.f32 0.5, %v2428_v41  ;;  %v6769_v41 = vld [vmem:[#allocation69_spill] sm:$0xff] }
 0x7dc   :  { %4799 = vtanh.f32 %v2429_v55 }
 0x7dd   :  { %4801 = vtanh.f32 %v2433_v13  ;;  %2511 = vmatprep.mubr.f32.mxu0 %v2277_v3  ;;  %2582 = vmatprep.mubr.f32.mxu1 %v2277_v3  ;;  %v6765_v13 = vld [vmem:[#allocation65_spill] sm:$0xff]  ;;  %v6766_v3 = vld [vmem:[#allocation66_spill] sm:$0xff] }
 0x7de   :  { %4803 = vtanh.f32 %v2427_v38  ;;  %v6767_v38 = vld [vmem:[#allocation67_spill] sm:$0xff] }
 0x7df   :  { %4805 = vtanh.f32 %v2438_v47  ;;  %v6770_v47 = vld [vmem:[#allocation70_spill] sm:$0xff] }
 0x7e6   :  { %v4800_v20 = vpop.eup %4799 }
 0x7e7   :  { %v4802_v5 = vpop.eup %4801  ;;  %v2431_v33 = vmul.f32 0.5, %v4800_v20  ;;  %v6764_v20 = vld [vmem:[#allocation64_spill] sm:$0xff] }
 0x7e8   :  { %v2435_v56 = vmul.f32 0.5, %v4802_v5  ;;  %v4804_v31 = vpop.eup %4803  ;;  %v6771_v5 = vld [vmem:[#allocation71_spill] sm:$0xff] }
 0x7e9   :  { %v2432_v11 = vadd.f32 0.5, %v2431_v33  ;;  %v4806_v17 = vpop.eup %4805  ;;  %v6772_v33 = vld [vmem:[#allocation72_spill] sm:$0xff] }
 0x7ea   :  { %v2436_v0 = vadd.f32 0.5, %v2435_v56  ;;  %v2440_v14 = vmul.f32 0.5, %v4806_v17  ;;  %v6763_v56 = vld [vmem:[#allocation63_spill] sm:$0xff] }
 0x7eb   :  { %v2443_v40 = vmul.f32 %v4804_v31, %v2432_v11  ;;  %v6773_v11 = vld [vmem:[#allocation73_spill] sm:$0xff] }
 0x7ec   :  { %v2442_v59 = vmul.f32 %v2436_v0, %v5931_v37  ;;  %v2441_v2 = vadd.f32 0.5, %v2440_v14  ;;  %v6762_v37 = vld [vmem:[#allocation62_spill] sm:$0xff] }
 0x7ee   :  { %v6041_v54 = vadd.f32 %v2443_v40, %v2442_v59  ;;  %v6774_v40 = vld [vmem:[#allocation74_spill] sm:$0xff] }
 0x7f0   :  { %4807 = vtanh.f32 %v6041_v54 }
 0x7fa   :  { %v4808_v28 = vpop.eup %4807 }
 0x7fb   :  { %v2446_v55 = vmul.f32 %v4808_v28, %v2441_v2  ;;  %v6775_v2 = vld [vmem:[#allocation75_spill] sm:$0xff] }
 0x7fd   :  { %2512 = vmatmul.mubr.f32.vlgmr.msra.gmra.mrb[26].mxu0 %v2446_v55  ;;  %2583 = vmatmul.mubr.f32.vlgmr.msra.gmra.mrb[26].mxu1 %v2446_v55 }
 0x7fe   :  { %4454 = vmatpush1.bf16.msra.mxu0 %v5079_v8  ;;  %4486 = vmatpush1.bf16.msra.mxu1 %v5089_v18  ;;  %v6721_v8 = vld [vmem:[#allocation22_spill] sm:$0xff]  ;;  %v6724_v18 = vld [vmem:[#allocation24_spill] sm:$0xff] }
 0x7ff   :  { %4456 = vmatprep.subr.bf16.mxu0 %v5081_v9  ;;  %4488 = vmatprep.subr.bf16.mxu1 %v5095_v26  ;;  %v6722_v9 = vld [vmem:[#allocation21_spill] sm:$0xff] }
 0x800   :  { %2676 = vmatprep.mubr.f32.mxu0 %v6358_v4  ;;  %2747 = vmatprep.mubr.f32.mxu1 %v6358_v4  ;;  %v6726_v26 = vld [vmem:[#allocation25_spill] sm:$0xff] }
 0x802   :  { %4458 = vmatpush1.bf16.msra.mxu0 %v5085_v16  ;;  %4490 = vmatpush1.bf16.msra.mxu1 %v5098_v30  ;;  %v6723_v16 = vld [vmem:[#allocation23_spill] sm:$0xff] }
 0x803   :  { %4460 = vmatprep.subr.bf16.mxu0 %v5092_v22  ;;  %4492 = vmatprep.subr.bf16.mxu1 %v5107_v39  ;;  %v6725_v22 = vld [vmem:[#allocation26_spill] sm:$0xff]  ;;  %v6727_v30 = vld [vmem:[#allocation27_spill] sm:$0xff]  ;;  %v6730_v39 = vld [vmem:[#allocation29_spill] sm:$0xff] }
 0x806   :  { %4462 = vmatpush1.bf16.msra.mxu0 %v5101_v32  ;;  %4494 = vmatpush1.bf16.msra.mxu1 %v5110_v44  ;;  %v6728_v32 = vld [vmem:[#allocation28_spill] sm:$0xff]  ;;  %v6731_v44 = vld [vmem:[#allocation31_spill] sm:$0xff] }
 0x807   :  { %4464 = vmatprep.subr.bf16.mxu0 %v5105_v36  ;;  %4496 = vmatprep.subr.bf16.mxu1 %v5116_v48  ;;  %v6729_v36 = vld [vmem:[#allocation30_spill] sm:$0xff] }
 0x808   :  { %v6733_v48 = vld [vmem:[#allocation34_spill] sm:$0xff] }
 0x80a   :  { %4466 = vmatpush1.bf16.msra.mxu0 %v5113_v46  ;;  %4498 = vmatpush1.bf16.msra.mxu1 %v5122_v57  ;;  %v6732_v46 = vld [vmem:[#allocation32_spill] sm:$0xff]  ;;  %v6735_v57 = vld [vmem:[#allocation35_spill] sm:$0xff] }
 0x80b   :  { %4468 = vmatprep.subr.bf16.mxu0 %v5119_v51  ;;  %4500 = vmatprep.subr.bf16.mxu1 %v5128_v60  ;;  %v6734_v51 = vld [vmem:[#allocation33_spill] sm:$0xff] }
 0x80c   :  { %v6737_v60 = vld [vmem:[#allocation37_spill] sm:$0xff] }
 0x80e   :  { %4470 = vmatpush1.bf16.msra.mxu0 %v5125_v58  ;;  %4502 = vmatpush1.bf16.msra.mxu1 %v5134_v7  ;;  %v6736_v58 = vld [vmem:[#allocation36_spill] sm:$0xff]  ;;  %v6739_v7 = vld [vmem:[#allocation39_spill] sm:$0xff] }
 0x80f   :  { %4472 = vmatprep.subr.bf16.mxu0 %v5131_v63  ;;  %4504 = vmatprep.subr.bf16.mxu1 %v5140_v12  ;;  %v6738_v63 = vld [vmem:[#allocation38_spill] sm:$0xff]  ;;  %v6741_v12 = vld [vmem:[#allocation41_spill] sm:$0xff] }
 0x812   :  { %4474 = vmatpush1.bf16.msra.mxu0 %v5137_v10  ;;  %4506 = vmatpush1.bf16.msra.mxu1 %v5146_v25  ;;  %v6740_v10 = vld [vmem:[#allocation40_spill] sm:$0xff]  ;;  %v6743_v25 = vld [vmem:[#allocation43_spill] sm:$0xff] }
 0x813   :  { %4476 = vmatprep.subr.bf16.mxu0 %v5143_v15  ;;  %4508 = vmatprep.subr.bf16.mxu1 %v5152_v29  ;;  %v6742_v15 = vld [vmem:[#allocation42_spill] sm:$0xff]  ;;  %v6745_v29 = vld [vmem:[#allocation45_spill] sm:$0xff] }
 0x816   :  { %4478 = vmatpush1.bf16.msra.mxu0 %v5149_v27  ;;  %4510 = vmatpush1.bf16.msra.mxu1 %v5158_v42  ;;  %v6744_v27 = vld [vmem:[#allocation44_spill] sm:$0xff]  ;;  %v6747_v42 = vld [vmem:[#allocation47_spill] sm:$0xff] }
 0x817   :  { %4480 = vmatprep.subr.bf16.mxu0 %v5155_v34  ;;  %4512 = vmatprep.subr.bf16.mxu1 %v5164_v45  ;;  %v6746_v34 = vld [vmem:[#allocation46_spill] sm:$0xff]  ;;  %v6749_v45 = vld [vmem:[#allocation49_spill] sm:$0xff] }
 0x81a   :  { %4482 = vmatpush1.bf16.msra.mxu0 %v5161_v43  ;;  %4514 = vmatpush1.bf16.msra.mxu1 %v5170_v61  ;;  %v6748_v43 = vld [vmem:[#allocation48_spill] sm:$0xff]  ;;  %v6751_v61 = vld [vmem:[#allocation51_spill] sm:$0xff] }
 0x81b   :  { %4516 = vmatprep.subr.bf16.mxu0 %v5167_v52  ;;  %4580 = vmatprep.subr.bf16.mxu1 %v5174_v62  ;;  %v6750_v52 = vld [vmem:[#allocation50_spill] sm:$0xff]  ;;  %v6752_v62 = vld [vmem:[#allocation52_spill] sm:$0xff] }
 0x81d   :  { %2677 = vmatmul.mubr.f32.vlgmr.msra.gmra.mrb[28].mxu0 %v2446_v55  ;;  %2748 = vmatmul.mubr.f32.vlgmr.msra.gmra.mrb[28].mxu1 %v2446_v55 }
 0x81e   :  { %4518 = vmatpush1.bf16.msra.mxu0 %v5176_v1  ;;  %4582 = vmatpush1.bf16.msra.mxu1 %v5183_v21  ;;  %v6753_v1 = vld [vmem:[#allocation53_spill] sm:$0xff]  ;;  %v6755_v21 = vld [vmem:[#allocation55_spill] sm:$0xff] }
 0x81f   :  { %4520 = vmatprep.subr.bf16.mxu0 %v5179_v6  ;;  %4584 = vmatprep.subr.bf16.mxu1 %v5187_v23  ;;  %v6754_v6 = vld [vmem:[#allocation54_spill] sm:$0xff]  ;;  %v6756_v23 = vld [vmem:[#allocation56_spill] sm:$0xff] }
 0x822   :  { %4522 = vmatpush1.bf16.msra.mxu0 %v5189_v24  ;;  %4586 = vmatpush1.bf16.msra.mxu1 %v5197_v49  ;;  %v6757_v24 = vld [vmem:[#allocation57_spill] sm:$0xff]  ;;  %v6759_v49 = vld [vmem:[#allocation59_spill] sm:$0xff] }
 0x823   :  { %4524 = vmatprep.subr.bf16.mxu0 %v5192_v35  ;;  %4588 = vmatprep.subr.bf16.mxu1 %v5202_v50  ;;  %v6758_v35 = vld [vmem:[#allocation58_spill] sm:$0xff]  ;;  %v6760_v50 = vld [vmem:[#allocation60_spill] sm:$0xff] }
 0x826   :  { %4526 = vmatpush1.bf16.msra.mxu0 %v5204_v53  ;;  %4590 = vmatpush1.bf16.msra.mxu1 %v6721_v8  ;;  %v6761_v53 = vld [vmem:[#allocation61_spill] sm:$0xff] }
 0x827   :  { %4528 = vmatprep.subr.bf16.mxu0 %v6722_v9  ;;  %4592 = vmatprep.subr.bf16.mxu1 %v6723_v16  ;;  %v6776_v9 = vld [vmem:[#allocation76_spill] sm:$0xff] }
 0x82a   :  { %4530 = vmatpush1.bf16.msra.mxu0 %v6724_v18  ;;  %4594 = vmatpush1.bf16.msra.mxu1 %v6725_v22  ;;  %v6777_v18 = vld [vmem:[#allocation77_spill] sm:$0xff] }
 0x82b   :  { %4532 = vmatprep.subr.bf16.mxu0 %v6726_v26  ;;  %4596 = vmatprep.subr.bf16.mxu1 %v6727_v30 }
 0x82e   :  { %4534 = vmatpush1.bf16.msra.mxu0 %v6728_v32  ;;  %4598 = vmatpush1.bf16.msra.mxu1 %v6729_v36 }
 0x82f   :  { %4536 = vmatprep.subr.bf16.mxu0 %v6730_v39  ;;  %4600 = vmatprep.subr.bf16.mxu1 %v6731_v44 }
 0x832   :  { %4538 = vmatpush1.bf16.msra.mxu0 %v6732_v46  ;;  %4602 = vmatpush1.bf16.msra.mxu1 %v6733_v48 }
 0x833   :  { %4540 = vmatprep.subr.bf16.mxu0 %v6734_v51  ;;  %4604 = vmatprep.subr.bf16.mxu1 %v6735_v57  ;;  %v6778_v57 = vld [vmem:[#allocation19_spill] sm:$0xff] }
 0x836   :  { %4542 = vmatpush1.bf16.msra.mxu0 %v6736_v58  ;;  %4606 = vmatpush1.bf16.msra.mxu1 %v6737_v60 }
 0x837   :  { %4544 = vmatprep.subr.bf16.mxu0 %v6738_v63  ;;  %4608 = vmatprep.subr.bf16.mxu1 %v6739_v7 }
 0x83a   :  { %4546 = vmatpush1.bf16.msra.mxu0 %v6740_v10  ;;  %4610 = vmatpush1.bf16.msra.mxu1 %v6741_v12  ;;  %v2608_v10 = vld [vmem:[#allocation6 + $0xe0] sm:$0xff]  ;;  %v2609_v12 = vld [vmem:[#allocation6 + $0xe8] sm:$0xff] }
 0x83b   :  { %4548 = vmatprep.subr.bf16.mxu0 %v6742_v15  ;;  %4612 = vmatprep.subr.bf16.mxu1 %v6743_v25 }
 0x83e   :  { %4550 = vmatpush1.bf16.msra.mxu0 %v6744_v27  ;;  %4614 = vmatpush1.bf16.msra.mxu1 %v6745_v29 }
 0x83f   :  { %4552 = vmatprep.subr.bf16.mxu0 %v6746_v34  ;;  %4616 = vmatprep.subr.bf16.mxu1 %v6747_v42 }
 0x842   :  { %4554 = vmatpush1.bf16.msra.mxu0 %v6748_v43  ;;  %4618 = vmatpush1.bf16.msra.mxu1 %v6749_v45  ;;  %v2610_v43 = vld [vmem:[#allocation6 + $0xf0] sm:$0xff] }
 0x843   :  { %4556 = vmatprep.subr.bf16.mxu0 %v6750_v52  ;;  %4620 = vmatprep.subr.bf16.mxu1 %v6751_v61 }
 0x846   :  { %4558 = vmatpush1.bf16.msra.mxu0 %v6752_v62  ;;  %4622 = vmatpush1.bf16.msra.mxu1 %v6753_v1 }
 0x847   :  { %4560 = vmatprep.subr.bf16.mxu0 %v6754_v6  ;;  %4624 = vmatprep.subr.bf16.mxu1 %v6755_v21  ;;  %v2611_v21 = vld [vmem:[#allocation6 + $0xf8] sm:$0xff] }
 0x84a   :  { %4562 = vmatpush1.bf16.msra.mxu0 %v6756_v23  ;;  %4626 = vmatpush1.bf16.msra.mxu1 %v6757_v24 }
 0x84b   :  { %4564 = vmatprep.subr.bf16.mxu0 %v6758_v35  ;;  %4628 = vmatprep.subr.bf16.mxu1 %v6759_v49 }
 0x84e   :  { %4566 = vmatpush1.bf16.msra.mxu0 %v6760_v50  ;;  %4630 = vmatpush1.bf16.msra.mxu1 %v6761_v53 }
 0x84f   :  { %4568 = vmatprep.subr.bf16.mxu0 %v6762_v37  ;;  %4632 = vmatprep.subr.bf16.mxu1 %v6763_v56 }
 0x852   :  { %4570 = vmatpush1.bf16.msra.mxu0 %v6764_v20  ;;  %4634 = vmatpush1.bf16.msra.mxu1 %v6765_v13 }
 0x853   :  { %4572 = vmatprep.subr.bf16.mxu0 %v6766_v3  ;;  %4636 = vmatprep.subr.bf16.mxu1 %v6767_v38 }
 0x856   :  { %4574 = vmatpush1.bf16.msra.mxu0 %v6768_v19  ;;  %4638 = vmatpush1.bf16.msra.mxu1 %v6769_v41 }
 0x857   :  { %4576 = vmatprep.subr.bf16.mxu0 %v6770_v47  ;;  %4640 = vmatprep.subr.bf16.mxu1 %v6771_v5 }
 0x85a   :  { %4578 = vmatpush1.bf16.msra.mxu0 %v6772_v33  ;;  %4642 = vmatpush1.bf16.msra.mxu1 %v6773_v11  ;;  %v2943_v11 = vld [vmem:[#allocation12] sm:$0xff] }
 0x8d0   :  { %v2513_v31 = vpop.f32.mrb[26].mxu0  ;;  %v2584_v0 = vpop.f32.mrb[26].mxu1 }
 0x8d1   :  { %v2514_v59 = vadd.f32 %v2513_v31, %v6774_v40  ;;  %v2515_v17 = vpop.f32.mrb[27].mxu0  ;;  %v2586_v14 = vpop.f32.mrb[27].mxu1  ;;  %v2585_v16 = vadd.f32 %v2584_v0, %v6776_v9  ;;  %v2944_v31 = vld [vmem:[#allocation12 + $0x8] sm:$0xff] }
 0x8d2   :  { %v2516_v28 = vadd.f32 %v2515_v17, %v6775_v2  ;;  %v2587_v22 = vadd.f32 %v2586_v14, %v6777_v18  ;;  %v4644_v0 = vpack.c.bf16 %v2944_v31, %v2943_v11  ;;  %v2945_v17 = vld [vmem:[#allocation12 + $0x10] sm:$0xff]  ;;  %v2946_v14 = vld [vmem:[#allocation12 + $0x18] sm:$0xff] }
 0x8d3   :  { %v2589_v55 = vmul.f32 0.5, %v2514_v59  ;;  %v4966_v59 = vmov 0.0|0.0  }
 0x8d4   :  { %v2593_v8 = vmul.f32 0.5, %v2516_v28  ;;  %v2598_v26 = vmul.f32 0.5, %v2587_v22  ;;  %4643 = vmatprep.subr.bf16.mxu0 %v4966_v59  ;;  %v4647_v28 = vpack.c.bf16 %v2946_v14, %v2945_v17  ;;  %v2950_v22 = vld [vmem:[#allocation12 + $0x38] sm:$0xff] }
 0x8d5   :  { %4809 = vtanh.f32 %v2589_v55  ;;  %v2948_v55 = vld [vmem:[#allocation12 + $0x28] sm:$0xff] }
 0x8d6   :  { %4811 = vtanh.f32 %v2593_v8 }
 0x8d7   :  { %4813 = vtanh.f32 %v2585_v16  ;;  %v2949_v16 = vld [vmem:[#allocation12 + $0x30] sm:$0xff] }
 0x8d8   :  { %4815 = vtanh.f32 %v2598_v26  ;;  %v4653_v26 = vpack.c.bf16 %v2950_v22, %v2949_v16 }
 0x8df   :  { %v4810_v30 = vpop.eup %4809 }
 0x8e0   :  { %v4812_v32 = vpop.eup %4811  ;;  %v2591_v36 = vmul.f32 0.5, %v4810_v30  ;;  %v2951_v30 = vld [vmem:[#allocation12 + $0x40] sm:$0xff] }
 0x8e1   :  { %v2595_v39 = vmul.f32 0.5, %v4812_v32  ;;  %v4814_v46 = vpop.eup %4813  ;;  %v2952_v32 = vld [vmem:[#allocation12 + $0x48] sm:$0xff] }
 0x8e2   :  { %v2592_v44 = vadd.f32 0.5, %v2591_v36  ;;  %v4816_v63 = vpop.eup %4815  ;;  %v4656_v36 = vpack.c.bf16 %v2952_v32, %v2951_v30 }
 0x8e3   :  { %v2596_v48 = vadd.f32 0.5, %v2595_v39  ;;  %v2600_v7 = vmul.f32 0.5, %v4816_v63  ;;  %v2953_v39 = vld [vmem:[#allocation12 + $0x50] sm:$0xff]  ;;  %v2958_v63 = vld [vmem:[#allocation12 + $0x78] sm:$0xff] }
 0x8e4   :  { %v2603_v51 = vmul.f32 %v4814_v46, %v2592_v44  ;;  %v2954_v44 = vld [vmem:[#allocation12 + $0x58] sm:$0xff] }
 0x8e5   :  { %v2602_v58 = vmul.f32 %v2596_v48, %v6778_v57  ;;  %v2601_v42 = vadd.f32 0.5, %v2600_v7  ;;  %v4659_v46 = vpack.c.bf16 %v2954_v44, %v2953_v39  ;;  %v2955_v48 = vld [vmem:[#allocation12 + $0x60] sm:$0xff] }
 0x8e7   :  { %v6145_v60 = vadd.f32 %v2603_v51, %v2602_v58  ;;  %v2956_v51 = vld [vmem:[#allocation12 + $0x68] sm:$0xff]  ;;  %v2957_v58 = vld [vmem:[#allocation12 + $0x70] sm:$0xff] }
 0x8e8   :  { %v4662_v57 = vpack.c.bf16 %v2956_v51, %v2955_v48  ;;  %v4665_v7 = vpack.c.bf16 %v2958_v63, %v2957_v58 }
 0x8e9   :  { %4817 = vtanh.f32 %v6145_v60 }
 0x8f0   :  { %v2678_v15 = vpop.f32.mrb[28].mxu0  ;;  %v2749_v25 = vpop.f32.mrb[28].mxu1 }
 0x8f1   :  { %v2754_v27 = vadd.f32 %v2678_v15, %v2608_v10  ;;  %v2680_v29 = vpop.f32.mrb[29].mxu0  ;;  %v2751_v34 = vpop.f32.mrb[29].mxu1  ;;  %v2756_v6 = vadd.f32 %v2749_v25, %v2610_v43 }
 0x8f2   :  { %v2755_v45 = vadd.f32 %v2680_v29, %v2609_v12  ;;  %v2757_v23 = vadd.f32 %v2751_v34, %v2611_v21 }
 0x8f3   :  { %v4818_v52 = vpop.eup %4817  ;;  %v2758_v61 = vmul.f32 0.5, %v2754_v27 }
 0x8f4   :  { %v2762_v62 = vmul.f32 0.5, %v2755_v45  ;;  %v2606_v1 = vmul.f32 %v4818_v52, %v2601_v42  ;;  %v2767_v24 = vmul.f32 0.5, %v2757_v23 }
 0x8f5   :  { %4819 = vtanh.f32 %v2758_v61 }
 0x8f6   :  { %4821 = vtanh.f32 %v2762_v62  ;;  %2840 = vmatprep.mubr.f32.mxu0 %v2606_v1  ;;  %2911 = vmatprep.mubr.f32.mxu1 %v2606_v1 }
 0x8f7   :  { %4823 = vtanh.f32 %v2756_v6 }
 0x8f8   :  { %4825 = vtanh.f32 %v2767_v24 }
 0x8ff   :  { %v4820_v35 = vpop.eup %4819 }
 0x900   :  { %v4822_v49 = vpop.eup %4821  ;;  %v2760_v50 = vmul.f32 0.5, %v4820_v35 }
 0x901   :  { %v2764_v53 = vmul.f32 0.5, %v4822_v49  ;;  %v4824_v56 = vpop.eup %4823 }
 0x902   :  { %v2761_v37 = vadd.f32 0.5, %v2760_v50  ;;  %v4826_v19 = vpop.eup %4825 }
 0x903   :  { %v2765_v20 = vadd.f32 0.5, %v2764_v53  ;;  %v2769_v41 = vmul.f32 0.5, %v4826_v19 }
 0x904   :  { %v2772_v13 = vmul.f32 %v4824_v56, %v2761_v37 }
 0x905   :  { %v2771_v3 = vmul.f32 %v2765_v20, %v6041_v54  ;;  %v2770_v47 = vadd.f32 0.5, %v2769_v41  ;;  %v2947_v54 = vld [vmem:[#allocation12 + $0x20] sm:$0xff] }
 0x906   :  { %v4650_v8 = vpack.c.bf16 %v2948_v55, %v2947_v54 }
 0x907   :  { %v2773_v38 = vadd.f32 %v2772_v13, %v2771_v3 }
 0x909   :  { %4827 = vtanh.f32 %v2773_v38 }
 0x913   :  { %v4828_v5 = vpop.eup %4827 }
 0x914   :  { %v2775_v33 = vmul.f32 %v4828_v5, %v2770_v47 }
 0x916   :  { %2841 = vmatmul.mubr.f32.vlgmr.msra.gmra.mrb[30].mxu0 %v2775_v33  ;;  %2912 = vmatmul.mubr.f32.vlgmr.msra.gmra.mrb[30].mxu1 %v2775_v33 }
 0x917   :  { %4645 = vmatpush3.bf16.msra.mxu0 %v4644_v0  ;;  %3104 = vmatprep.mubr.msk.f32.mxu0 %vm4967_vm0, %v6358_v4 }
 0x918   :  { %4646 = vmatprep.subr.bf16.mxu0 %v4966_v59 }
 0x91b   :  { %4648 = vmatpush3.bf16.msra.mxu0 %v4647_v28 }
 0x91c   :  { %4649 = vmatprep.subr.bf16.mxu0 %v4966_v59 }
 0x91f   :  { %4651 = vmatpush3.bf16.msra.mxu0 %v4650_v8 }
 0x920   :  { %4652 = vmatprep.subr.bf16.mxu0 %v4966_v59 }
 0x923   :  { %4654 = vmatpush3.bf16.msra.mxu0 %v4653_v26 }
 0x924   :  { %4655 = vmatprep.subr.bf16.mxu0 %v4966_v59 }
 0x927   :  { %4657 = vmatpush3.bf16.msra.mxu0 %v4656_v36 }
 0x928   :  { %4658 = vmatprep.subr.bf16.mxu0 %v4966_v59 }
 0x92b   :  { %4660 = vmatpush3.bf16.msra.mxu0 %v4659_v46 }
 0x92c   :  { %4661 = vmatprep.subr.bf16.mxu0 %v4966_v59 }
 0x92f   :  { %4663 = vmatpush3.bf16.msra.mxu0 %v4662_v57 }
 0x930   :  { %4664 = vmatprep.subr.bf16.mxu0 %v4966_v59 }
 0x933   :  { %4666 = vmatpush3.bf16.msra.mxu0 %v4665_v7 }
 0x9e9   :  { %v2842_v10 = vpop.f32.mrb[30].mxu0  ;;  %v2913_v12 = vpop.f32.mrb[30].mxu1 }
 0x9ea   :  { %v2843_v15 = vadd.f32 %v2842_v10, %v6774_v40  ;;  %v2844_v25 = vpop.f32.mrb[31].mxu0  ;;  %v2915_v27 = vpop.f32.mrb[31].mxu1  ;;  %v2914_v43 = vadd.f32 %v2913_v12, %v6776_v9 }
 0x9eb   :  { %v2845_v29 = vadd.f32 %v2844_v25, %v6775_v2  ;;  %v2916_v45 = vadd.f32 %v2915_v27, %v6777_v18  ;;  %v3054_v18 = vld [vmem:[%s6175_s5] ss:$0 sm:$0xff] }
 0x9ec   :  { %v2918_v34 = vmul.f32 0.5, %v2843_v15 }
 0x9ed   :  { %v2922_v42 = vmul.f32 0.5, %v2845_v29  ;;  %v2927_v52 = vmul.f32 0.5, %v2916_v45 }
 0x9ee   :  { %4829 = vtanh.f32 %v2918_v34 }
 0x9ef   :  { %4831 = vtanh.f32 %v2922_v42 }
 0x9f0   :  { %4833 = vtanh.f32 %v2914_v43 }
 0x9f1   :  { %4835 = vtanh.f32 %v2927_v52 }
 0x9f8   :  { %v4830_v61 = vpop.eup %4829 }
 0x9f9   :  { %v4832_v4 = vpop.eup %4831  ;;  %v2920_v62 = vmul.f32 0.5, %v4830_v61 }
 0x9fa   :  { %v2924_v1 = vmul.f32 0.5, %v4832_v4  ;;  %v4834_v6 = vpop.eup %4833 }
 0x9fb   :  { %v2921_v40 = vadd.f32 0.5, %v2920_v62  ;;  %v4836_v35 = vpop.eup %4835 }
 0x9fc   :  { %v2925_v21 = vadd.f32 0.5, %v2924_v1  ;;  %v2929_v9 = vmul.f32 0.5, %v4836_v35 }
 0x9fd   :  { %v2932_v23 = vmul.f32 %v4834_v6, %v2921_v40 }
 0x9fe   :  { %v2931_v2 = vmul.f32 %v2925_v21, %v6145_v60  ;;  %v2930_v49 = vadd.f32 0.5, %v2929_v9 }
 0xa00   :  { %v2933_v24 = vadd.f32 %v2932_v23, %v2931_v2 }
 0xa02   :  { %4837 = vtanh.f32 %v2933_v24 }
 0xa0c   :  { %v4838_v50 = vpop.eup %4837 }
 0xa0d   :  { %v2935_v53 = vmul.f32 %v4838_v50, %v2930_v49 }
 0xa0f   :  { %3105 = vmatmul.mubr.f32.vlgmr.msra.gmra.mrb[32].mxu0 %v2935_v53 }
 0xae2   :  { %v3032_v37 = vpop.f32.mrb[32].mxu0 }
 0xae3   :  { %v3033_v56 = vadd.f32 %v3054_v18, %v3032_v37  ;;  %v3106_v20 = vpop.f32.mrb[33].mxu0 }
 0xae5   :  { %3036 = vst [vmem:[#allocation14] sm:$0xff] %v3033_v56 }
 0xae6   :  { %4938 = shalt.err (!%p4935_p8)
}
 0xae7   :  { %s4939_s29 = scalar_lea.hbm %s6176_s6, 128 }
 0xae8   :  { %p4940_p9 = scmp.ne.s32.totalorder %s6176_s6, %s4939_s29  ;;  %p4943_p10 = scmp.lt.u32.totalorder %s4939_s29, %s6176_s6 }
 0xaea   :  { %p4945_p11 = pnand %p4943_p10, %p4940_p9 }
 0xaec   :  { %4948 = shalt.err (!%p4945_p11)
}
 0xaed   :  { %3046 = dma.vmem_to_hbm [thread:$0]  %s3044_s25, 128, %s6176_s6, [#allocation8]  }
 0xaee   :  { %4955 = dma.done.wait [#allocation8], 128  }
 0xaef   :  { %4956 = vsyncadd [#allocation8], 4294967168 }
 0xaf0   :  { %3050 = vsyncpa [#allocation7], 1 }
 0xaf1   :  { %3051 = vsyncpa [#allocation10], 1 }
 0xaf2   :  { %3052 = vsyncpa [#allocation13], 1 }
 0xaf3   :  { %3053 = vsyncpa [#allocation8], 1 }

</bundles_post_ra>
